<compile_context>
chip_gen: v7x
topology: tpu7x:2x2x1
jax: 0.10.0
libtpu: 0.0.40
codegen_flags: <defaults>
</compile_context>

<pallas_src>
import math
import jax
import jax.numpy as jnp
from jax.experimental import pallas as pl
from jax.experimental.pallas import tpu as pltpu

# ---------------- small synthetic configuration ----------------
CFG = dict(
    B=2, T=1, V=1, C_in=3, H=16, W=16,
    patch=8,                      # patchify "conv" stride/kernel
    film_cond_channel=16,
    efficientnet_channels=24,     # stands in for `original_channels`
    vision_token_dim=32,
    token_learner_tokens=4,
    ff_dim=32,
    n_heads=2,
    head_dim=16,
    depth=2,
    mlp_ratio=4,
    lowdim_obs_dim=8,
    num_actions=7,
    chunk_size=4,
    max_T=32,
)

LANES = 128   # lane width of the packed weight slab / padded action head


# ---------------- parameter initialization ----------------
def init_params(key):
    c = CFG
    keys = iter(jax.random.split(key, 64))

    def lin(k_in, k_out):
        return (jax.random.normal(next(keys), (k_in, k_out), jnp.float32) * 0.02,
                jnp.zeros((k_out,), jnp.float32))

    p = {}
    patch_dim = c['C_in'] * c['patch'] * c['patch']
    p['patch_w'], p['patch_b'] = lin(patch_dim, c['efficientnet_channels'])
    p['film_w'], p['film_b'] = lin(c['film_cond_channel'], 2 * c['efficientnet_channels'])
    p['pre_proj_w'], p['pre_proj_b'] = lin(c['efficientnet_channels'], c['vision_token_dim'])
    p['tl_w'], p['tl_b'] = lin(c['vision_token_dim'], c['token_learner_tokens'])
    p['after_proj_w'], p['after_proj_b'] = lin(c['vision_token_dim'], c['ff_dim'])
    p['lowdim_w'], p['lowdim_b'] = lin(c['lowdim_obs_dim'], c['ff_dim'])
    p['lan_w'], p['lan_b'] = lin(c['film_cond_channel'], c['ff_dim'])
    # faithful to the module's __init__: zeros
    p['action_query'] = jnp.zeros((c['chunk_size'], c['ff_dim']), jnp.float32)
    p['dummy_text_embeds'] = jnp.zeros((1, c['film_cond_channel']), jnp.float32)
    p['pos_emb'] = jax.random.normal(next(keys), (c['max_T'], c['ff_dim']), jnp.float32) * 0.02

    hidden = c['n_heads'] * c['head_dim']
    blocks = []
    for _ in range(c['depth']):
        b = {}
        b['ln1_g'] = jnp.ones((c['ff_dim'],), jnp.float32)
        b['ln1_b'] = jnp.zeros((c['ff_dim'],), jnp.float32)
        b['qkv_w'], b['qkv_b'] = lin(c['ff_dim'], 3 * hidden)
        b['out_w'], b['out_b'] = lin(hidden, c['ff_dim'])
        b['ln2_g'] = jnp.ones((c['ff_dim'],), jnp.float32)
        b['ln2_b'] = jnp.zeros((c['ff_dim'],), jnp.float32)
        b['mlp1_w'], b['mlp1_b'] = lin(c['ff_dim'], c['mlp_ratio'] * c['ff_dim'])
        b['mlp2_w'], b['mlp2_b'] = lin(c['mlp_ratio'] * c['ff_dim'], c['ff_dim'])
        blocks.append(b)
    p['blocks'] = blocks
    p['lnf_g'] = jnp.ones((c['ff_dim'],), jnp.float32)
    p['lnf_b'] = jnp.zeros((c['ff_dim'],), jnp.float32)
    p['act_w'], p['act_b'] = lin(c['ff_dim'], c['num_actions'])
    return p


# ---------------- pack every parameter into one VMEM slab ----------------
def _pack_params(params, B, S):
    """Returns (slab[f32, rows x 128], layout: name -> (row_off, rows, cols)).

    Each leaf starts on an 8-row (sublane-tile) boundary; lane axis is 128-wide
    so in-kernel static slices never cross a lane tile.
    """
    c = CFG
    A = c['num_actions']
    entries = []

    def add(name, arr):
        arr = jnp.asarray(arr, jnp.float32)
        if arr.ndim == 1:
            arr = arr.reshape(1, -1)
        entries.append((name, arr))

    add('patch_w', params['patch_w']);          add('patch_b', params['patch_b'])
    add('film_w', params['film_w']);            add('film_b', params['film_b'])
    add('pre_proj_w', params['pre_proj_w']);    add('pre_proj_b', params['pre_proj_b'])
    add('tl_w', params['tl_w']);                add('tl_b', params['tl_b'])
    add('after_proj_w', params['after_proj_w']); add('after_proj_b', params['after_proj_b'])
    add('lowdim_w', params['lowdim_w']);        add('lowdim_b', params['lowdim_b'])
    add('lan_w', params['lan_w']);              add('lan_b', params['lan_b'])
    add('action_query', params['action_query'])
    add('dummy_text', params['dummy_text_embeds'])
    # pos_emb pre-tiled across the fused batch so the in-kernel add is a plain vadd
    add('pos_emb', jnp.tile(params['pos_emb'][:S], (B, 1)))
    for d, blk in enumerate(params['blocks']):
        for k in ('ln1_g', 'ln1_b', 'qkv_w', 'qkv_b', 'out_w', 'out_b',
                  'ln2_g', 'ln2_b', 'mlp1_w', 'mlp1_b', 'mlp2_w', 'mlp2_b'):
            add('b%d_%s' % (d, k), blk[k])
    add('lnf_g', params['lnf_g']);              add('lnf_b', params['lnf_b'])
    # lane-dense action head: pad to 128 output lanes, slice back in the wrapper
    act_w = jnp.zeros((c['ff_dim'], LANES), jnp.float32).at[:, :A].set(params['act_w'])
    act_b = jnp.zeros((1, LANES), jnp.float32).at[:, :A].set(params['act_b'].reshape(1, -1))
    add('act_w', act_w);                        add('act_b', act_b)

    layout, parts, off = {}, [], 0
    for name, arr in entries:
        r, cd = arr.shape
        assert cd <= LANES, (name, arr.shape)
        r_pad = -(-r // 8) * 8
        block = jnp.zeros((r_pad, LANES), jnp.float32).at[:r, :cd].set(arr)
        parts.append(block)
        layout[name] = (off, r, cd)
        off += r_pad
    slab = jnp.concatenate(parts, axis=0)
    return slab, layout


# ---------------- fused RT1 forward (one pallas_call, no grid) ----------------
def rt1_forward(params, rgb, low_dim):
    c = CFG
    B, T, V, Ci, H, W = rgb.shape
    n_img = T * V
    P = c['patch']
    Hp, Wpw = H // P, W // P
    HW = Hp * Wpw
    G = c['token_learner_tokens']
    Cf = c['efficientnet_channels']
    ff = c['ff_dim']
    nh, hd = c['n_heads'], c['head_dim']
    chunk = c['chunk_size']
    lowdim = low_dim.shape[-1]
    A = c['num_actions']
    depth = c['depth']
    S = n_img * G + T + 1 + chunk          # rgb tokens + lowdim + lan + action query
    assert S <= c['max_T'], "token count exceeds max_T (pos_emb rows)"
    patch_dim = Ci * P * P

    # ---- one-time im2col for the patchify stand-in conv (layout glue only) ----
    x = rgb.reshape(B * n_img, Ci, H, W).transpose(0, 2, 3, 1)            # NCHW -> NHWC
    x = x.reshape(B * n_img, Hp, P, Wpw, P, Ci).transpose(0, 1, 3, 2, 4, 5)
    x_patches = x.reshape(B * n_img * HW, patch_dim).astype(jnp.float32)  # (rows, P*P*Ci)
    low = low_dim.reshape(B * T, lowdim).astype(jnp.float32)              # (B*T, lowdim)

    slab, layout = _pack_params(params, B, S)

    def kernel(x_ref, low_ref, w_ref, o_ref, tok):
        f32 = jnp.float32

        def Wp_(name):                         # static slice of the weight slab
            off, r, cd = layout[name]
            return w_ref[off:off + r, :cd]

        def lin(xv, wname, bname, act=None):
            y = jnp.dot(xv, Wp_(wname), preferred_element_type=f32) + Wp_(bname)
            if act == "gelu":
                y = jax.nn.gelu(y)             # tanh approximation (see header TODO)
            elif act == "swish":
                y = y * jax.nn.sigmoid(y)
            return y

        def layernorm(xv, gname, bname):
            mu = jnp.mean(xv, axis=-1, keepdims=True)
            xc = xv - mu
            var = jnp.mean(xc * xc, axis=-1, keepdims=True)
            return xc * jax.lax.rsqrt(var + 1e-5) * Wp_(gname) + Wp_(bname)

        text = Wp_('dummy_text')                                      # (1, cond), shared

        # ---- vision encoder stand-in: patchify matmul + FiLM + swish (batch fused) ----
        feat = lin(x_ref[...], 'patch_w', 'patch_b')                  # (B*n_img*HW, Cf)
        gb = lin(text, 'film_w', 'film_b')                            # (1, 2*Cf)
        gamma, beta = gb[:, :Cf], gb[:, Cf:]
        yv = feat * (1.0 + gamma) + beta
        feat = yv * jax.nn.sigmoid(yv)                                # swish
        feat = lin(feat, 'pre_proj_w', 'pre_proj_b')                  # (rows, Dv)
        logits = lin(feat, 'tl_w', 'tl_b')                            # (rows, G)

        # ---- TokenLearner: spatial softmax, then ONE (G,HW)x(HW,Dv) matmul per image ----
        for i in range(B * n_img):
            b, v = divmod(i, n_img)
            fv = feat[i * HW:(i + 1) * HW, :]                         # (HW, Dv)
            lg = logits[i * HW:(i + 1) * HW, :]                       # (HW, G)
            lg = lg - jnp.max(lg, axis=0, keepdims=True)
            a = jnp.exp(lg)
            a = a * pl.reciprocal(jnp.sum(a, axis=0, keepdims=True), approx=True)
            pooled = jax.lax.dot_general(a, fv, (((0,), (0,)), ((), ())),
                                         preferred_element_type=f32)  # (G, Dv)
            row = b * S + v * G
            tok[row:row + G, :] = lin(pooled, 'after_proj_w', 'after_proj_b')

        # ---- low-dim, language and action-query tokens ----
        ld = lin(low_ref[...], 'lowdim_w', 'lowdim_b')                # (B*T, ff)
        lan = lin(text, 'lan_w', 'lan_b')                             # (1, ff)
        aq = Wp_('action_query')                                      # (chunk, ff)
        for b in range(B):
            base = b * S + n_img * G
            tok[base:base + T, :] = ld[b * T:(b + 1) * T, :]
            tok[base + T:base + T + 1, :] = lan
            tok[base + T + 1:base + T + 1 + chunk, :] = aq

        h = tok[...] + Wp_('pos_emb')                                 # (B*S, ff)

        # ---- pre-LN BERT-style transformer, non-causal ----
        scale = 1.0 / math.sqrt(hd)
        for d in range(depth):
            pre = 'b%d_' % d
            yv = layernorm(h, pre + 'ln1_g', pre + 'ln1_b')
            qkv = lin(yv, pre + 'qkv_w', pre + 'qkv_b')               # (B*S, 3*nh*hd)
            ow = Wp_(pre + 'out_w')                                   # (nh*hd, ff)
            for b in range(B):                                        # per-batch attention
                r0, r1 = b * S, (b + 1) * S
                bacc = None
                for hh in range(nh):
                    q = qkv[r0:r1, hh * hd:(hh + 1) * hd]
                    k = qkv[r0:r1, (nh + hh) * hd:(nh + hh + 1) * hd]
                    vv = qkv[r0:r1, (2 * nh + hh) * hd:(2 * nh + hh + 1) * hd]
                    s = jax.lax.dot_general(q, k, (((1,), (1,)), ((), ())),
                                            preferred_element_type=f32) * scale
                    s = s - jnp.max(s, axis=-1, keepdims=True)
                    pr = jnp.exp(s)
                    pr = pr * pl.reciprocal(jnp.sum(pr, axis=-1, keepdims=True),
                                            approx=True)
                    o_h = jnp.dot(pr, vv, preferred_element_type=f32)          # (S, hd)
                    # head-concat folded into the output projection
                    contrib = jnp.dot(o_h, ow[hh * hd:(hh + 1) * hd, :],
                                      preferred_element_type=f32)              # (S, ff)
                    bacc = contrib if bacc is None else bacc + contrib
                tok[r0:r1, :] = bacc                                  # reuse token scratch
            h = h + tok[...] + Wp_(pre + 'out_b')
            yv = layernorm(h, pre + 'ln2_g', pre + 'ln2_b')
            yv = lin(yv, pre + 'mlp1_w', pre + 'mlp1_b', act="gelu")
            h = h + lin(yv, pre + 'mlp2_w', pre + 'mlp2_b')

        h = layernorm(h, 'lnf_g', 'lnf_b')

        # ---- to_actions on the last chunk_size tokens: lane-dense 128-wide store ----
        for b in range(B):
            r0 = b * S + S - chunk
            o_ref[b * chunk:(b + 1) * chunk, :] = lin(h[r0:r0 + chunk, :],
                                                      'act_w', 'act_b')

    out_padded = pl.pallas_call(
        kernel,
        out_shape=jax.ShapeDtypeStruct((B * chunk, LANES), jnp.float32),
        in_specs=[pl.BlockSpec(memory_space=pltpu.MemorySpace.VMEM)] * 3,
        out_specs=pl.BlockSpec(memory_space=pltpu.MemorySpace.VMEM),
        scratch_shapes=[pltpu.VMEM((B * S, ff), jnp.float32)],
    )(x_patches, low, slab)

    actions = out_padded.reshape(B, chunk, LANES)[:, :, :A]
    return {'action': actions}


if __name__ == "__main__":
    key = jax.random.PRNGKey(0)
    kp, kr, kl = jax.random.split(key, 3)
    params = init_params(kp)
    c = CFG
    rgb = jax.random.normal(
        kr, (c['B'], c['T'], c['V'], c['C_in'], c['H'], c['W']), jnp.float32)
    low_dim = jax.random.normal(kl, (c['B'], c['T'], c['lowdim_obs_dim']), jnp.float32)

    fwd = jax.jit(rt1_forward)
    out = fwd(params, rgb, low_dim)
    jax.block_until_ready(out)
    a = out['action']
    assert a.shape == (c['B'], c['chunk_size'], c['num_actions']), a.shape
    assert a.dtype == jnp.float32
    print("KERNEL_OK")
</pallas_src>

<mosaic_0001>
module attributes {stable_mosaic.version = 11 : i64} {
  func.func @kernel(%arg0: memref<8x192xf32, #tpu.memory_space<vmem>>, %arg1: memref<2x8xf32, #tpu.memory_space<vmem>>, %arg2: memref<1048x128xf32, #tpu.memory_space<vmem>>, %arg3: memref<8x128xf32, #tpu.memory_space<vmem>>, %arg4: memref<20x32xf32, #tpu.memory_space<vmem>>) attributes {dimension_semantics = [], scalar_prefetch = 0 : i64, scratch_operands = 1 : i64, tpu.core_type = #tpu.core_type<tc>} {
    %c384 = arith.constant 384 : index
    %c0 = arith.constant 0 : index
    %0 = vector.load %arg2[%c384, %c0] : memref<1048x128xf32, #tpu.memory_space<vmem>>, vector<1x16xf32>
    %c0_0 = arith.constant 0 : index
    %c0_1 = arith.constant 0 : index
    %1 = vector.load %arg0[%c0_0, %c0_1] : memref<8x192xf32, #tpu.memory_space<vmem>>, vector<8x192xf32>
    %c0_2 = arith.constant 0 : index
    %c0_3 = arith.constant 0 : index
    %2 = vector.load %arg2[%c0_2, %c0_3] : memref<1048x128xf32, #tpu.memory_space<vmem>>, vector<192x24xf32>
    %cst = arith.constant dense<0.000000e+00> : vector<8x24xf32>
    %3 = tpu.matmul %1, %2, %cst {dimension_numbers = #tpu.dot_dimension_numbers<[1], [0], [0], [1], [0, 0, 1, 1], [], []>} : vector<8x192xf32>, vector<192x24xf32>, vector<8x24xf32> -> vector<8x24xf32>
    %c192 = arith.constant 192 : index
    %c0_4 = arith.constant 0 : index
    %4 = vector.load %arg2[%c192, %c0_4] : memref<1048x128xf32, #tpu.memory_space<vmem>>, vector<1x24xf32>
    %5 = vector.broadcast %4 : vector<1x24xf32> to vector<8x24xf32>
    %6 = arith.addf %3, %5 : vector<8x24xf32>
    %c200 = arith.constant 200 : index
    %c0_5 = arith.constant 0 : index
    %7 = vector.load %arg2[%c200, %c0_5] : memref<1048x128xf32, #tpu.memory_space<vmem>>, vector<16x48xf32>
    %cst_6 = arith.constant dense<0.000000e+00> : vector<1x48xf32>
    %8 = tpu.matmul %0, %7, %cst_6 {dimension_numbers = #tpu.dot_dimension_numbers<[1], [0], [0], [1], [0, 0, 1, 1], [], []>} : vector<1x16xf32>, vector<16x48xf32>, vector<1x48xf32> -> vector<1x48xf32>
    %c216 = arith.constant 216 : index
    %c0_7 = arith.constant 0 : index
    %9 = vector.load %arg2[%c216, %c0_7] : memref<1048x128xf32, #tpu.memory_space<vmem>>, vector<1x48xf32>
    %10 = arith.addf %8, %9 : vector<1x48xf32>
    %11 = vector.extract_strided_slice %10 {offsets = [0, 0], sizes = [1, 24], strides = [1, 1]} : vector<1x48xf32> to vector<1x24xf32>
    %12 = vector.extract_strided_slice %10 {offsets = [0, 24], sizes = [1, 24], strides = [1, 1]} : vector<1x48xf32> to vector<1x24xf32>
    %cst_8 = arith.constant 1.000000e+00 : f32
    %13 = vector.broadcast %cst_8 : f32 to vector<1x24xf32>
    %14 = arith.addf %13, %11 : vector<1x24xf32>
    %15 = vector.broadcast %14 : vector<1x24xf32> to vector<8x24xf32>
    %16 = arith.mulf %6, %15 : vector<8x24xf32>
    %17 = vector.broadcast %12 : vector<1x24xf32> to vector<8x24xf32>
    %18 = arith.addf %16, %17 : vector<8x24xf32>
    %19 = arith.negf %18 : vector<8x24xf32>
    %20 = math.exp %19 : vector<8x24xf32>
    %cst_9 = arith.constant 1.000000e+00 : f32
    %21 = vector.broadcast %cst_9 : f32 to vector<8x24xf32>
    %22 = arith.addf %21, %20 : vector<8x24xf32>
    %23 = arith.divf %21, %22 : vector<8x24xf32>
    %24 = arith.mulf %18, %23 : vector<8x24xf32>
    %c224 = arith.constant 224 : index
    %c0_10 = arith.constant 0 : index
    %25 = vector.load %arg2[%c224, %c0_10] : memref<1048x128xf32, #tpu.memory_space<vmem>>, vector<24x32xf32>
    %cst_11 = arith.constant dense<0.000000e+00> : vector<8x32xf32>
    %26 = tpu.matmul %24, %25, %cst_11 {dimension_numbers = #tpu.dot_dimension_numbers<[1], [0], [0], [1], [0, 0, 1, 1], [], []>} : vector<8x24xf32>, vector<24x32xf32>, vector<8x32xf32> -> vector<8x32xf32>
    %c248 = arith.constant 248 : index
    %c0_12 = arith.constant 0 : index
    %27 = vector.load %arg2[%c248, %c0_12] : memref<1048x128xf32, #tpu.memory_space<vmem>>, vector<1x32xf32>
    %28 = vector.broadcast %27 : vector<1x32xf32> to vector<8x32xf32>
    %29 = arith.addf %26, %28 : vector<8x32xf32>
    %c256 = arith.constant 256 : index
    %c0_13 = arith.constant 0 : index
    %30 = vector.load %arg2[%c256, %c0_13] : memref<1048x128xf32, #tpu.memory_space<vmem>>, vector<32x4xf32>
    %cst_14 = arith.constant dense<0.000000e+00> : vector<8x4xf32>
    %31 = tpu.matmul %29, %30, %cst_14 {dimension_numbers = #tpu.dot_dimension_numbers<[1], [0], [0], [1], [0, 0, 1, 1], [], []>} : vector<8x32xf32>, vector<32x4xf32>, vector<8x4xf32> -> vector<8x4xf32>
    %c288 = arith.constant 288 : index
    %c0_15 = arith.constant 0 : index
    %32 = vector.load %arg2[%c288, %c0_15] : memref<1048x128xf32, #tpu.memory_space<vmem>>, vector<1x4xf32>
    %33 = vector.broadcast %32 : vector<1x4xf32> to vector<8x4xf32>
    %34 = arith.addf %31, %33 : vector<8x4xf32>
    %35 = vector.extract_strided_slice %29 {offsets = [0, 0], sizes = [4, 32], strides = [1, 1]} : vector<8x32xf32> to vector<4x32xf32>
    %36 = vector.extract_strided_slice %34 {offsets = [0, 0], sizes = [4, 4], strides = [1, 1]} : vector<8x4xf32> to vector<4x4xf32>
    %cst_16 = arith.constant dense<0xFF800000> : vector<4xf32>
    %37 = vector.multi_reduction <maximumf>, %36, %cst_16 [0] : vector<4x4xf32> to vector<4xf32>
    %38 = vector.shape_cast %37 : vector<4xf32> to vector<1x4xf32>
    %39 = vector.broadcast %38 : vector<1x4xf32> to vector<4x4xf32>
    %40 = arith.subf %36, %39 : vector<4x4xf32>
    %41 = math.exp %40 : vector<4x4xf32>
    %cst_17 = arith.constant dense<0.000000e+00> : vector<4xf32>
    %42 = vector.multi_reduction <add>, %41, %cst_17 [0] : vector<4x4xf32> to vector<4xf32>
    %43 = vector.shape_cast %42 : vector<4xf32> to vector<1x4xf32>
    %44 = tpu.reciprocal %43 {approx = true} : vector<1x4xf32> -> vector<1x4xf32>
    %45 = vector.broadcast %44 : vector<1x4xf32> to vector<4x4xf32>
    %46 = arith.mulf %41, %45 : vector<4x4xf32>
    %cst_18 = arith.constant dense<0.000000e+00> : vector<4x32xf32>
    %47 = tpu.matmul %46, %35, %cst_18 {dimension_numbers = #tpu.dot_dimension_numbers<[0], [0], [1], [1], [0, 1, 1, 1], [], []>} : vector<4x4xf32>, vector<4x32xf32>, vector<4x32xf32> -> vector<4x32xf32>
    %c296 = arith.constant 296 : index
    %c0_19 = arith.constant 0 : index
    %48 = vector.load %arg2[%c296, %c0_19] : memref<1048x128xf32, #tpu.memory_space<vmem>>, vector<32x32xf32>
    %cst_20 = arith.constant dense<0.000000e+00> : vector<4x32xf32>
    %49 = tpu.matmul %47, %48, %cst_20 {dimension_numbers = #tpu.dot_dimension_numbers<[1], [0], [0], [1], [0, 0, 1, 1], [], []>} : vector<4x32xf32>, vector<32x32xf32>, vector<4x32xf32> -> vector<4x32xf32>
    %c328 = arith.constant 328 : index
    %c0_21 = arith.constant 0 : index
    %50 = vector.load %arg2[%c328, %c0_21] : memref<1048x128xf32, #tpu.memory_space<vmem>>, vector<1x32xf32>
    %51 = vector.broadcast %50 : vector<1x32xf32> to vector<4x32xf32>
    %52 = arith.addf %49, %51 : vector<4x32xf32>
    %c0_22 = arith.constant 0 : index
    %c0_23 = arith.constant 0 : index
    %53 = vector.load %arg4[%c0_22, %c0_23] : memref<20x32xf32, #tpu.memory_space<vmem>>, vector<4x32xf32>
    tpu.vector_store %arg4[%c0_22, %c0_23], %52 {strides = array<i32>} : memref<20x32xf32, #tpu.memory_space<vmem>>, vector<4x32xf32>,
    %54 = vector.extract_strided_slice %29 {offsets = [4, 0], sizes = [4, 32], strides = [1, 1]} : vector<8x32xf32> to vector<4x32xf32>
    %55 = vector.extract_strided_slice %34 {offsets = [4, 0], sizes = [4, 4], strides = [1, 1]} : vector<8x4xf32> to vector<4x4xf32>
    %cst_24 = arith.constant dense<0xFF800000> : vector<4xf32>
    %56 = vector.multi_reduction <maximumf>, %55, %cst_24 [0] : vector<4x4xf32> to vector<4xf32>
    %57 = vector.shape_cast %56 : vector<4xf32> to vector<1x4xf32>
    %58 = vector.broadcast %57 : vector<1x4xf32> to vector<4x4xf32>
    %59 = arith.subf %55, %58 : vector<4x4xf32>
    %60 = math.exp %59 : vector<4x4xf32>
    %cst_25 = arith.constant dense<0.000000e+00> : vector<4xf32>
    %61 = vector.multi_reduction <add>, %60, %cst_25 [0] : vector<4x4xf32> to vector<4xf32>
    %62 = vector.shape_cast %61 : vector<4xf32> to vector<1x4xf32>
    %63 = tpu.reciprocal %62 {approx = true} : vector<1x4xf32> -> vector<1x4xf32>
    %64 = vector.broadcast %63 : vector<1x4xf32> to vector<4x4xf32>
    %65 = arith.mulf %60, %64 : vector<4x4xf32>
    %cst_26 = arith.constant dense<0.000000e+00> : vector<4x32xf32>
    %66 = tpu.matmul %65, %54, %cst_26 {dimension_numbers = #tpu.dot_dimension_numbers<[0], [0], [1], [1], [0, 1, 1, 1], [], []>} : vector<4x4xf32>, vector<4x32xf32>, vector<4x32xf32> -> vector<4x32xf32>
    %c296_27 = arith.constant 296 : index
    %c0_28 = arith.constant 0 : index
    %67 = vector.load %arg2[%c296_27, %c0_28] : memref<1048x128xf32, #tpu.memory_space<vmem>>, vector<32x32xf32>
    %cst_29 = arith.constant dense<0.000000e+00> : vector<4x32xf32>
    %68 = tpu.matmul %66, %67, %cst_29 {dimension_numbers = #tpu.dot_dimension_numbers<[1], [0], [0], [1], [0, 0, 1, 1], [], []>} : vector<4x32xf32>, vector<32x32xf32>, vector<4x32xf32> -> vector<4x32xf32>
    %c328_30 = arith.constant 328 : index
    %c0_31 = arith.constant 0 : index
    %69 = vector.load %arg2[%c328_30, %c0_31] : memref<1048x128xf32, #tpu.memory_space<vmem>>, vector<1x32xf32>
    %70 = vector.broadcast %69 : vector<1x32xf32> to vector<4x32xf32>
    %71 = arith.addf %68, %70 : vector<4x32xf32>
    %c10 = arith.constant 10 : index
    %c0_32 = arith.constant 0 : index
    %72 = vector.load %arg4[%c10, %c0_32] : memref<20x32xf32, #tpu.memory_space<vmem>>, vector<4x32xf32>
    tpu.vector_store %arg4[%c10, %c0_32], %71 {strides = array<i32>} : memref<20x32xf32, #tpu.memory_space<vmem>>, vector<4x32xf32>,
    %c0_33 = arith.constant 0 : index
    %c0_34 = arith.constant 0 : index
    %73 = vector.load %arg1[%c0_33, %c0_34] : memref<2x8xf32, #tpu.memory_space<vmem>>, vector<2x8xf32>
    %c336 = arith.constant 336 : index
    %c0_35 = arith.constant 0 : index
    %74 = vector.load %arg2[%c336, %c0_35] : memref<1048x128xf32, #tpu.memory_space<vmem>>, vector<8x32xf32>
    %cst_36 = arith.constant dense<0.000000e+00> : vector<2x32xf32>
    %75 = tpu.matmul %73, %74, %cst_36 {dimension_numbers = #tpu.dot_dimension_numbers<[1], [0], [0], [1], [0, 0, 1, 1], [], []>} : vector<2x8xf32>, vector<8x32xf32>, vector<2x32xf32> -> vector<2x32xf32>
    %c344 = arith.constant 344 : index
    %c0_37 = arith.constant 0 : index
    %76 = vector.load %arg2[%c344, %c0_37] : memref<1048x128xf32, #tpu.memory_space<vmem>>, vector<1x32xf32>
    %77 = vector.broadcast %76 : vector<1x32xf32> to vector<2x32xf32>
    %78 = arith.addf %75, %77 : vector<2x32xf32>
    %c352 = arith.constant 352 : index
    %c0_38 = arith.constant 0 : index
    %79 = vector.load %arg2[%c352, %c0_38] : memref<1048x128xf32, #tpu.memory_space<vmem>>, vector<16x32xf32>
    %cst_39 = arith.constant dense<0.000000e+00> : vector<1x32xf32>
    %80 = tpu.matmul %0, %79, %cst_39 {dimension_numbers = #tpu.dot_dimension_numbers<[1], [0], [0], [1], [0, 0, 1, 1], [], []>} : vector<1x16xf32>, vector<16x32xf32>, vector<1x32xf32> -> vector<1x32xf32>
    %c368 = arith.constant 368 : index
    %c0_40 = arith.constant 0 : index
    %81 = vector.load %arg2[%c368, %c0_40] : memref<1048x128xf32, #tpu.memory_space<vmem>>, vector<1x32xf32>
    %82 = arith.addf %80, %81 : vector<1x32xf32>
    %c376 = arith.constant 376 : index
    %c0_41 = arith.constant 0 : index
    %83 = vector.load %arg2[%c376, %c0_41] : memref<1048x128xf32, #tpu.memory_space<vmem>>, vector<4x32xf32>
    %84 = vector.extract_strided_slice %78 {offsets = [0, 0], sizes = [1, 32], strides = [1, 1]} : vector<2x32xf32> to vector<1x32xf32>
    %c4 = arith.constant 4 : index
    %c0_42 = arith.constant 0 : index
    %85 = vector.load %arg4[%c4, %c0_42] : memref<20x32xf32, #tpu.memory_space<vmem>>, vector<1x32xf32>
    tpu.vector_store %arg4[%c4, %c0_42], %84 {strides = array<i32>} : memref<20x32xf32, #tpu.memory_space<vmem>>, vector<1x32xf32>,
    %c5 = arith.constant 5 : index
    %c0_43 = arith.constant 0 : index
    %86 = vector.load %arg4[%c5, %c0_43] : memref<20x32xf32, #tpu.memory_space<vmem>>, vector<1x32xf32>
    tpu.vector_store %arg4[%c5, %c0_43], %82 {strides = array<i32>} : memref<20x32xf32, #tpu.memory_space<vmem>>, vector<1x32xf32>,
    %c6 = arith.constant 6 : index
    %c0_44 = arith.constant 0 : index
    %87 = vector.load %arg4[%c6, %c0_44] : memref<20x32xf32, #tpu.memory_space<vmem>>, vector<4x32xf32>
    tpu.vector_store %arg4[%c6, %c0_44], %83 {strides = array<i32>} : memref<20x32xf32, #tpu.memory_space<vmem>>, vector<4x32xf32>,
    %88 = vector.extract_strided_slice %78 {offsets = [1, 0], sizes = [1, 32], strides = [1, 1]} : vector<2x32xf32> to vector<1x32xf32>
    %c14 = arith.constant 14 : index
    %c0_45 = arith.constant 0 : index
    %89 = vector.load %arg4[%c14, %c0_45] : memref<20x32xf32, #tpu.memory_space<vmem>>, vector<1x32xf32>
    tpu.vector_store %arg4[%c14, %c0_45], %88 {strides = array<i32>} : memref<20x32xf32, #tpu.memory_space<vmem>>, vector<1x32xf32>,
    %c15 = arith.constant 15 : index
    %c0_46 = arith.constant 0 : index
    %90 = vector.load %arg4[%c15, %c0_46] : memref<20x32xf32, #tpu.memory_space<vmem>>, vector<1x32xf32>
    tpu.vector_store %arg4[%c15, %c0_46], %82 {strides = array<i32>} : memref<20x32xf32, #tpu.memory_space<vmem>>, vector<1x32xf32>,
    %c16 = arith.constant 16 : index
    %c0_47 = arith.constant 0 : index
    %91 = vector.load %arg4[%c16, %c0_47] : memref<20x32xf32, #tpu.memory_space<vmem>>, vector<4x32xf32>
    tpu.vector_store %arg4[%c16, %c0_47], %83 {strides = array<i32>} : memref<20x32xf32, #tpu.memory_space<vmem>>, vector<4x32xf32>,
    %c0_48 = arith.constant 0 : index
    %c0_49 = arith.constant 0 : index
    %92 = vector.load %arg4[%c0_48, %c0_49] : memref<20x32xf32, #tpu.memory_space<vmem>>, vector<20x32xf32>
    %c392 = arith.constant 392 : index
    %c0_50 = arith.constant 0 : index
    %93 = vector.load %arg2[%c392, %c0_50] : memref<1048x128xf32, #tpu.memory_space<vmem>>, vector<20x32xf32>
    %94 = arith.addf %92, %93 : vector<20x32xf32>
    %cst_51 = arith.constant dense<0.000000e+00> : vector<20xf32>
    %95 = vector.multi_reduction <add>, %94, %cst_51 [1] : vector<20x32xf32> to vector<20xf32>
    %96 = vector.shape_cast %95 : vector<20xf32> to vector<20x1xf32>
    %cst_52 = arith.constant 3.200000e+01 : f32
    %97 = vector.broadcast %cst_52 : f32 to vector<20x1xf32>
    %98 = arith.divf %96, %97 : vector<20x1xf32>
    %99 = vector.broadcast %98 : vector<20x1xf32> to vector<20x32xf32>
    %100 = arith.subf %94, %99 : vector<20x32xf32>
    %101 = arith.mulf %100, %100 : vector<20x32xf32>
    %cst_53 = arith.constant dense<0.000000e+00> : vector<20xf32>
    %102 = vector.multi_reduction <add>, %101, %cst_53 [1] : vector<20x32xf32> to vector<20xf32>
    %103 = vector.shape_cast %102 : vector<20xf32> to vector<20x1xf32>
    %cst_54 = arith.constant 3.200000e+01 : f32
    %104 = vector.broadcast %cst_54 : f32 to vector<20x1xf32>
    %105 = arith.divf %103, %104 : vector<20x1xf32>
    %cst_55 = arith.constant 9.99999974E-6 : f32
    %106 = vector.broadcast %cst_55 : f32 to vector<20x1xf32>
    %107 = arith.addf %105, %106 : vector<20x1xf32>
    %108 = math.rsqrt %107 : vector<20x1xf32>
    %109 = vector.broadcast %108 : vector<20x1xf32> to vector<20x32xf32>
    %110 = arith.mulf %100, %109 : vector<20x32xf32>
    %c416 = arith.constant 416 : index
    %c0_56 = arith.constant 0 : index
    %111 = vector.load %arg2[%c416, %c0_56] : memref<1048x128xf32, #tpu.memory_space<vmem>>, vector<1x32xf32>
    %112 = vector.broadcast %111 : vector<1x32xf32> to vector<20x32xf32>
    %113 = arith.mulf %110, %112 : vector<20x32xf32>
    %c424 = arith.constant 424 : index
    %c0_57 = arith.constant 0 : index
    %114 = vector.load %arg2[%c424, %c0_57] : memref<1048x128xf32, #tpu.memory_space<vmem>>, vector<1x32xf32>
    %115 = vector.broadcast %114 : vector<1x32xf32> to vector<20x32xf32>
    %116 = arith.addf %113, %115 : vector<20x32xf32>
    %c432 = arith.constant 432 : index
    %c0_58 = arith.constant 0 : index
    %117 = vector.load %arg2[%c432, %c0_58] : memref<1048x128xf32, #tpu.memory_space<vmem>>, vector<32x96xf32>
    %cst_59 = arith.constant dense<0.000000e+00> : vector<20x96xf32>
    %118 = tpu.matmul %116, %117, %cst_59 {dimension_numbers = #tpu.dot_dimension_numbers<[1], [0], [0], [1], [0, 0, 1, 1], [], []>} : vector<20x32xf32>, vector<32x96xf32>, vector<20x96xf32> -> vector<20x96xf32>
    %c464 = arith.constant 464 : index
    %c0_60 = arith.constant 0 : index
    %119 = vector.load %arg2[%c464, %c0_60] : memref<1048x128xf32, #tpu.memory_space<vmem>>, vector<1x96xf32>
    %120 = vector.broadcast %119 : vector<1x96xf32> to vector<20x96xf32>
    %121 = arith.addf %118, %120 : vector<20x96xf32>
    %c472 = arith.constant 472 : index
    %c0_61 = arith.constant 0 : index
    %122 = vector.load %arg2[%c472, %c0_61] : memref<1048x128xf32, #tpu.memory_space<vmem>>, vector<32x32xf32>
    %123 = vector.extract_strided_slice %121 {offsets = [0, 0], sizes = [10, 16], strides = [1, 1]} : vector<20x96xf32> to vector<10x16xf32>
    %124 = vector.extract_strided_slice %121 {offsets = [0, 32], sizes = [10, 16], strides = [1, 1]} : vector<20x96xf32> to vector<10x16xf32>
    %125 = vector.extract_strided_slice %121 {offsets = [0, 64], sizes = [10, 16], strides = [1, 1]} : vector<20x96xf32> to vector<10x16xf32>
    %cst_62 = arith.constant dense<0.000000e+00> : vector<10x10xf32>
    %126 = tpu.matmul %123, %124, %cst_62 {dimension_numbers = #tpu.dot_dimension_numbers<[1], [1], [0], [0], [0, 0, 1, 0], [], []>} : vector<10x16xf32>, vector<10x16xf32>, vector<10x10xf32> -> vector<10x10xf32>
    %cst_63 = arith.constant 2.500000e-01 : f32
    %127 = vector.broadcast %cst_63 : f32 to vector<10x10xf32>
    %128 = arith.mulf %126, %127 : vector<10x10xf32>
    %cst_64 = arith.constant dense<0xFF800000> : vector<10xf32>
    %129 = vector.multi_reduction <maximumf>, %128, %cst_64 [1] : vector<10x10xf32> to vector<10xf32>
    %130 = vector.shape_cast %129 : vector<10xf32> to vector<10x1xf32>
    %131 = vector.broadcast %130 : vector<10x1xf32> to vector<10x10xf32>
    %132 = arith.subf %128, %131 : vector<10x10xf32>
    %133 = math.exp %132 : vector<10x10xf32>
    %cst_65 = arith.constant dense<0.000000e+00> : vector<10xf32>
    %134 = vector.multi_reduction <add>, %133, %cst_65 [1] : vector<10x10xf32> to vector<10xf32>
    %135 = vector.shape_cast %134 : vector<10xf32> to vector<10x1xf32>
    %136 = tpu.reciprocal %135 {approx = true} : vector<10x1xf32> -> vector<10x1xf32>
    %137 = vector.broadcast %136 : vector<10x1xf32> to vector<10x10xf32>
    %138 = arith.mulf %133, %137 : vector<10x10xf32>
    %cst_66 = arith.constant dense<0.000000e+00> : vector<10x16xf32>
    %139 = tpu.matmul %138, %125, %cst_66 {dimension_numbers = #tpu.dot_dimension_numbers<[1], [0], [0], [1], [0, 0, 1, 1], [], []>} : vector<10x10xf32>, vector<10x16xf32>, vector<10x16xf32> -> vector<10x16xf32>
    %140 = vector.extract_strided_slice %122 {offsets = [0, 0], sizes = [16, 32], strides = [1, 1]} : vector<32x32xf32> to vector<16x32xf32>
    %cst_67 = arith.constant dense<0.000000e+00> : vector<10x32xf32>
    %141 = tpu.matmul %139, %140, %cst_67 {dimension_numbers = #tpu.dot_dimension_numbers<[1], [0], [0], [1], [0, 0, 1, 1], [], []>} : vector<10x16xf32>, vector<16x32xf32>, vector<10x32xf32> -> vector<10x32xf32>
    %142 = vector.extract_strided_slice %121 {offsets = [0, 16], sizes = [10, 16], strides = [1, 1]} : vector<20x96xf32> to vector<10x16xf32>
    %143 = vector.extract_strided_slice %121 {offsets = [0, 48], sizes = [10, 16], strides = [1, 1]} : vector<20x96xf32> to vector<10x16xf32>
    %144 = vector.extract_strided_slice %121 {offsets = [0, 80], sizes = [10, 16], strides = [1, 1]} : vector<20x96xf32> to vector<10x16xf32>
    %cst_68 = arith.constant dense<0.000000e+00> : vector<10x10xf32>
    %145 = tpu.matmul %142, %143, %cst_68 {dimension_numbers = #tpu.dot_dimension_numbers<[1], [1], [0], [0], [0, 0, 1, 0], [], []>} : vector<10x16xf32>, vector<10x16xf32>, vector<10x10xf32> -> vector<10x10xf32>
    %cst_69 = arith.constant 2.500000e-01 : f32
    %146 = vector.broadcast %cst_69 : f32 to vector<10x10xf32>
    %147 = arith.mulf %145, %146 : vector<10x10xf32>
    %cst_70 = arith.constant dense<0xFF800000> : vector<10xf32>
    %148 = vector.multi_reduction <maximumf>, %147, %cst_70 [1] : vector<10x10xf32> to vector<10xf32>
    %149 = vector.shape_cast %148 : vector<10xf32> to vector<10x1xf32>
    %150 = vector.broadcast %149 : vector<10x1xf32> to vector<10x10xf32>
    %151 = arith.subf %147, %150 : vector<10x10xf32>
    %152 = math.exp %151 : vector<10x10xf32>
    %cst_71 = arith.constant dense<0.000000e+00> : vector<10xf32>
    %153 = vector.multi_reduction <add>, %152, %cst_71 [1] : vector<10x10xf32> to vector<10xf32>
    %154 = vector.shape_cast %153 : vector<10xf32> to vector<10x1xf32>
    %155 = tpu.reciprocal %154 {approx = true} : vector<10x1xf32> -> vector<10x1xf32>
    %156 = vector.broadcast %155 : vector<10x1xf32> to vector<10x10xf32>
    %157 = arith.mulf %152, %156 : vector<10x10xf32>
    %cst_72 = arith.constant dense<0.000000e+00> : vector<10x16xf32>
    %158 = tpu.matmul %157, %144, %cst_72 {dimension_numbers = #tpu.dot_dimension_numbers<[1], [0], [0], [1], [0, 0, 1, 1], [], []>} : vector<10x10xf32>, vector<10x16xf32>, vector<10x16xf32> -> vector<10x16xf32>
    %159 = vector.extract_strided_slice %122 {offsets = [16, 0], sizes = [16, 32], strides = [1, 1]} : vector<32x32xf32> to vector<16x32xf32>
    %cst_73 = arith.constant dense<0.000000e+00> : vector<10x32xf32>
    %160 = tpu.matmul %158, %159, %cst_73 {dimension_numbers = #tpu.dot_dimension_numbers<[1], [0], [0], [1], [0, 0, 1, 1], [], []>} : vector<10x16xf32>, vector<16x32xf32>, vector<10x32xf32> -> vector<10x32xf32>
    %161 = arith.addf %141, %160 : vector<10x32xf32>
    %c0_74 = arith.constant 0 : index
    %c0_75 = arith.constant 0 : index
    %162 = vector.load %arg4[%c0_74, %c0_75] : memref<20x32xf32, #tpu.memory_space<vmem>>, vector<10x32xf32>
    tpu.vector_store %arg4[%c0_74, %c0_75], %161 {strides = array<i32>} : memref<20x32xf32, #tpu.memory_space<vmem>>, vector<10x32xf32>,
    %163 = vector.extract_strided_slice %121 {offsets = [10, 0], sizes = [10, 16], strides = [1, 1]} : vector<20x96xf32> to vector<10x16xf32>
    %164 = vector.extract_strided_slice %121 {offsets = [10, 32], sizes = [10, 16], strides = [1, 1]} : vector<20x96xf32> to vector<10x16xf32>
    %165 = vector.extract_strided_slice %121 {offsets = [10, 64], sizes = [10, 16], strides = [1, 1]} : vector<20x96xf32> to vector<10x16xf32>
    %cst_76 = arith.constant dense<0.000000e+00> : vector<10x10xf32>
    %166 = tpu.matmul %163, %164, %cst_76 {dimension_numbers = #tpu.dot_dimension_numbers<[1], [1], [0], [0], [0, 0, 1, 0], [], []>} : vector<10x16xf32>, vector<10x16xf32>, vector<10x10xf32> -> vector<10x10xf32>
    %cst_77 = arith.constant 2.500000e-01 : f32
    %167 = vector.broadcast %cst_77 : f32 to vector<10x10xf32>
    %168 = arith.mulf %166, %167 : vector<10x10xf32>
    %cst_78 = arith.constant dense<0xFF800000> : vector<10xf32>
    %169 = vector.multi_reduction <maximumf>, %168, %cst_78 [1] : vector<10x10xf32> to vector<10xf32>
    %170 = vector.shape_cast %169 : vector<10xf32> to vector<10x1xf32>
    %171 = vector.broadcast %170 : vector<10x1xf32> to vector<10x10xf32>
    %172 = arith.subf %168, %171 : vector<10x10xf32>
    %173 = math.exp %172 : vector<10x10xf32>
    %cst_79 = arith.constant dense<0.000000e+00> : vector<10xf32>
    %174 = vector.multi_reduction <add>, %173, %cst_79 [1] : vector<10x10xf32> to vector<10xf32>
    %175 = vector.shape_cast %174 : vector<10xf32> to vector<10x1xf32>
    %176 = tpu.reciprocal %175 {approx = true} : vector<10x1xf32> -> vector<10x1xf32>
    %177 = vector.broadcast %176 : vector<10x1xf32> to vector<10x10xf32>
    %178 = arith.mulf %173, %177 : vector<10x10xf32>
    %cst_80 = arith.constant dense<0.000000e+00> : vector<10x16xf32>
    %179 = tpu.matmul %178, %165, %cst_80 {dimension_numbers = #tpu.dot_dimension_numbers<[1], [0], [0], [1], [0, 0, 1, 1], [], []>} : vector<10x10xf32>, vector<10x16xf32>, vector<10x16xf32> -> vector<10x16xf32>
    %180 = vector.extract_strided_slice %122 {offsets = [0, 0], sizes = [16, 32], strides = [1, 1]} : vector<32x32xf32> to vector<16x32xf32>
    %cst_81 = arith.constant dense<0.000000e+00> : vector<10x32xf32>
    %181 = tpu.matmul %179, %180, %cst_81 {dimension_numbers = #tpu.dot_dimension_numbers<[1], [0], [0], [1], [0, 0, 1, 1], [], []>} : vector<10x16xf32>, vector<16x32xf32>, vector<10x32xf32> -> vector<10x32xf32>
    %182 = vector.extract_strided_slice %121 {offsets = [10, 16], sizes = [10, 16], strides = [1, 1]} : vector<20x96xf32> to vector<10x16xf32>
    %183 = vector.extract_strided_slice %121 {offsets = [10, 48], sizes = [10, 16], strides = [1, 1]} : vector<20x96xf32> to vector<10x16xf32>
    %184 = vector.extract_strided_slice %121 {offsets = [10, 80], sizes = [10, 16], strides = [1, 1]} : vector<20x96xf32> to vector<10x16xf32>
    %cst_82 = arith.constant dense<0.000000e+00> : vector<10x10xf32>
    %185 = tpu.matmul %182, %183, %cst_82 {dimension_numbers = #tpu.dot_dimension_numbers<[1], [1], [0], [0], [0, 0, 1, 0], [], []>} : vector<10x16xf32>, vector<10x16xf32>, vector<10x10xf32> -> vector<10x10xf32>
    %cst_83 = arith.constant 2.500000e-01 : f32
    %186 = vector.broadcast %cst_83 : f32 to vector<10x10xf32>
    %187 = arith.mulf %185, %186 : vector<10x10xf32>
    %cst_84 = arith.constant dense<0xFF800000> : vector<10xf32>
    %188 = vector.multi_reduction <maximumf>, %187, %cst_84 [1] : vector<10x10xf32> to vector<10xf32>
    %189 = vector.shape_cast %188 : vector<10xf32> to vector<10x1xf32>
    %190 = vector.broadcast %189 : vector<10x1xf32> to vector<10x10xf32>
    %191 = arith.subf %187, %190 : vector<10x10xf32>
    %192 = math.exp %191 : vector<10x10xf32>
    %cst_85 = arith.constant dense<0.000000e+00> : vector<10xf32>
    %193 = vector.multi_reduction <add>, %192, %cst_85 [1] : vector<10x10xf32> to vector<10xf32>
    %194 = vector.shape_cast %193 : vector<10xf32> to vector<10x1xf32>
    %195 = tpu.reciprocal %194 {approx = true} : vector<10x1xf32> -> vector<10x1xf32>
    %196 = vector.broadcast %195 : vector<10x1xf32> to vector<10x10xf32>
    %197 = arith.mulf %192, %196 : vector<10x10xf32>
    %cst_86 = arith.constant dense<0.000000e+00> : vector<10x16xf32>
    %198 = tpu.matmul %197, %184, %cst_86 {dimension_numbers = #tpu.dot_dimension_numbers<[1], [0], [0], [1], [0, 0, 1, 1], [], []>} : vector<10x10xf32>, vector<10x16xf32>, vector<10x16xf32> -> vector<10x16xf32>
    %199 = vector.extract_strided_slice %122 {offsets = [16, 0], sizes = [16, 32], strides = [1, 1]} : vector<32x32xf32> to vector<16x32xf32>
    %cst_87 = arith.constant dense<0.000000e+00> : vector<10x32xf32>
    %200 = tpu.matmul %198, %199, %cst_87 {dimension_numbers = #tpu.dot_dimension_numbers<[1], [0], [0], [1], [0, 0, 1, 1], [], []>} : vector<10x16xf32>, vector<16x32xf32>, vector<10x32xf32> -> vector<10x32xf32>
    %201 = arith.addf %181, %200 : vector<10x32xf32>
    %c10_88 = arith.constant 10 : index
    %c0_89 = arith.constant 0 : index
    %202 = vector.load %arg4[%c10_88, %c0_89] : memref<20x32xf32, #tpu.memory_space<vmem>>, vector<10x32xf32>
    tpu.vector_store %arg4[%c10_88, %c0_89], %201 {strides = array<i32>} : memref<20x32xf32, #tpu.memory_space<vmem>>, vector<10x32xf32>,
    %c0_90 = arith.constant 0 : index
    %c0_91 = arith.constant 0 : index
    %203 = vector.load %arg4[%c0_90, %c0_91] : memref<20x32xf32, #tpu.memory_space<vmem>>, vector<20x32xf32>
    %204 = arith.addf %94, %203 : vector<20x32xf32>
    %c504 = arith.constant 504 : index
    %c0_92 = arith.constant 0 : index
    %205 = vector.load %arg2[%c504, %c0_92] : memref<1048x128xf32, #tpu.memory_space<vmem>>, vector<1x32xf32>
    %206 = vector.broadcast %205 : vector<1x32xf32> to vector<20x32xf32>
    %207 = arith.addf %204, %206 : vector<20x32xf32>
    %cst_93 = arith.constant dense<0.000000e+00> : vector<20xf32>
    %208 = vector.multi_reduction <add>, %207, %cst_93 [1] : vector<20x32xf32> to vector<20xf32>
    %209 = vector.shape_cast %208 : vector<20xf32> to vector<20x1xf32>
    %cst_94 = arith.constant 3.200000e+01 : f32
    %210 = vector.broadcast %cst_94 : f32 to vector<20x1xf32>
    %211 = arith.divf %209, %210 : vector<20x1xf32>
    %212 = vector.broadcast %211 : vector<20x1xf32> to vector<20x32xf32>
    %213 = arith.subf %207, %212 : vector<20x32xf32>
    %214 = arith.mulf %213, %213 : vector<20x32xf32>
    %cst_95 = arith.constant dense<0.000000e+00> : vector<20xf32>
    %215 = vector.multi_reduction <add>, %214, %cst_95 [1] : vector<20x32xf32> to vector<20xf32>
    %216 = vector.shape_cast %215 : vector<20xf32> to vector<20x1xf32>
    %cst_96 = arith.constant 3.200000e+01 : f32
    %217 = vector.broadcast %cst_96 : f32 to vector<20x1xf32>
    %218 = arith.divf %216, %217 : vector<20x1xf32>
    %cst_97 = arith.constant 9.99999974E-6 : f32
    %219 = vector.broadcast %cst_97 : f32 to vector<20x1xf32>
    %220 = arith.addf %218, %219 : vector<20x1xf32>
    %221 = math.rsqrt %220 : vector<20x1xf32>
    %222 = vector.broadcast %221 : vector<20x1xf32> to vector<20x32xf32>
    %223 = arith.mulf %213, %222 : vector<20x32xf32>
    %c512 = arith.constant 512 : index
    %c0_98 = arith.constant 0 : index
    %224 = vector.load %arg2[%c512, %c0_98] : memref<1048x128xf32, #tpu.memory_space<vmem>>, vector<1x32xf32>
    %225 = vector.broadcast %224 : vector<1x32xf32> to vector<20x32xf32>
    %226 = arith.mulf %223, %225 : vector<20x32xf32>
    %c520 = arith.constant 520 : index
    %c0_99 = arith.constant 0 : index
    %227 = vector.load %arg2[%c520, %c0_99] : memref<1048x128xf32, #tpu.memory_space<vmem>>, vector<1x32xf32>
    %228 = vector.broadcast %227 : vector<1x32xf32> to vector<20x32xf32>
    %229 = arith.addf %226, %228 : vector<20x32xf32>
    %c528 = arith.constant 528 : index
    %c0_100 = arith.constant 0 : index
    %230 = vector.load %arg2[%c528, %c0_100] : memref<1048x128xf32, #tpu.memory_space<vmem>>, vector<32x128xf32>
    %cst_101 = arith.constant dense<0.000000e+00> : vector<20x128xf32>
    %231 = tpu.matmul %229, %230, %cst_101 {dimension_numbers = #tpu.dot_dimension_numbers<[1], [0], [0], [1], [0, 0, 1, 1], [], []>} : vector<20x32xf32>, vector<32x128xf32>, vector<20x128xf32> -> vector<20x128xf32>
    %c560 = arith.constant 560 : index
    %c0_102 = arith.constant 0 : index
    %232 = vector.load %arg2[%c560, %c0_102] : memref<1048x128xf32, #tpu.memory_space<vmem>>, vector<1x128xf32>
    %233 = vector.broadcast %232 : vector<1x128xf32> to vector<20x128xf32>
    %234 = arith.addf %231, %233 : vector<20x128xf32>
    %235 = arith.mulf %234, %234 : vector<20x128xf32>
    %236 = arith.mulf %234, %235 : vector<20x128xf32>
    %cst_103 = arith.constant 4.471500e-02 : f32
    %237 = vector.broadcast %cst_103 : f32 to vector<20x128xf32>
    %238 = arith.mulf %237, %236 : vector<20x128xf32>
    %239 = arith.addf %234, %238 : vector<20x128xf32>
    %cst_104 = arith.constant 0.797884583 : f32
    %240 = vector.broadcast %cst_104 : f32 to vector<20x128xf32>
    %241 = arith.mulf %240, %239 : vector<20x128xf32>
    %242 = math.tanh %241 : vector<20x128xf32>
    %cst_105 = arith.constant 1.000000e+00 : f32
    %243 = vector.broadcast %cst_105 : f32 to vector<20x128xf32>
    %244 = arith.addf %243, %242 : vector<20x128xf32>
    %cst_106 = arith.constant 5.000000e-01 : f32
    %245 = vector.broadcast %cst_106 : f32 to vector<20x128xf32>
    %246 = arith.mulf %245, %244 : vector<20x128xf32>
    %247 = arith.mulf %234, %246 : vector<20x128xf32>
    %c568 = arith.constant 568 : index
    %c0_107 = arith.constant 0 : index
    %248 = vector.load %arg2[%c568, %c0_107] : memref<1048x128xf32, #tpu.memory_space<vmem>>, vector<128x32xf32>
    %cst_108 = arith.constant dense<0.000000e+00> : vector<20x32xf32>
    %249 = tpu.matmul %247, %248, %cst_108 {dimension_numbers = #tpu.dot_dimension_numbers<[1], [0], [0], [1], [0, 0, 1, 1], [], []>} : vector<20x128xf32>, vector<128x32xf32>, vector<20x32xf32> -> vector<20x32xf32>
    %c696 = arith.constant 696 : index
    %c0_109 = arith.constant 0 : index
    %250 = vector.load %arg2[%c696, %c0_109] : memref<1048x128xf32, #tpu.memory_space<vmem>>, vector<1x32xf32>
    %251 = vector.broadcast %250 : vector<1x32xf32> to vector<20x32xf32>
    %252 = arith.addf %249, %251 : vector<20x32xf32>
    %253 = arith.addf %207, %252 : vector<20x32xf32>
    %cst_110 = arith.constant dense<0.000000e+00> : vector<20xf32>
    %254 = vector.multi_reduction <add>, %253, %cst_110 [1] : vector<20x32xf32> to vector<20xf32>
    %255 = vector.shape_cast %254 : vector<20xf32> to vector<20x1xf32>
    %cst_111 = arith.constant 3.200000e+01 : f32
    %256 = vector.broadcast %cst_111 : f32 to vector<20x1xf32>
    %257 = arith.divf %255, %256 : vector<20x1xf32>
    %258 = vector.broadcast %257 : vector<20x1xf32> to vector<20x32xf32>
    %259 = arith.subf %253, %258 : vector<20x32xf32>
    %260 = arith.mulf %259, %259 : vector<20x32xf32>
    %cst_112 = arith.constant dense<0.000000e+00> : vector<20xf32>
    %261 = vector.multi_reduction <add>, %260, %cst_112 [1] : vector<20x32xf32> to vector<20xf32>
    %262 = vector.shape_cast %261 : vector<20xf32> to vector<20x1xf32>
    %cst_113 = arith.constant 3.200000e+01 : f32
    %263 = vector.broadcast %cst_113 : f32 to vector<20x1xf32>
    %264 = arith.divf %262, %263 : vector<20x1xf32>
    %cst_114 = arith.constant 9.99999974E-6 : f32
    %265 = vector.broadcast %cst_114 : f32 to vector<20x1xf32>
    %266 = arith.addf %264, %265 : vector<20x1xf32>
    %267 = math.rsqrt %266 : vector<20x1xf32>
    %268 = vector.broadcast %267 : vector<20x1xf32> to vector<20x32xf32>
    %269 = arith.mulf %259, %268 : vector<20x32xf32>
    %c704 = arith.constant 704 : index
    %c0_115 = arith.constant 0 : index
    %270 = vector.load %arg2[%c704, %c0_115] : memref<1048x128xf32, #tpu.memory_space<vmem>>, vector<1x32xf32>
    %271 = vector.broadcast %270 : vector<1x32xf32> to vector<20x32xf32>
    %272 = arith.mulf %269, %271 : vector<20x32xf32>
    %c712 = arith.constant 712 : index
    %c0_116 = arith.constant 0 : index
    %273 = vector.load %arg2[%c712, %c0_116] : memref<1048x128xf32, #tpu.memory_space<vmem>>, vector<1x32xf32>
    %274 = vector.broadcast %273 : vector<1x32xf32> to vector<20x32xf32>
    %275 = arith.addf %272, %274 : vector<20x32xf32>
    %c720 = arith.constant 720 : index
    %c0_117 = arith.constant 0 : index
    %276 = vector.load %arg2[%c720, %c0_117] : memref<1048x128xf32, #tpu.memory_space<vmem>>, vector<32x96xf32>
    %cst_118 = arith.constant dense<0.000000e+00> : vector<20x96xf32>
    %277 = tpu.matmul %275, %276, %cst_118 {dimension_numbers = #tpu.dot_dimension_numbers<[1], [0], [0], [1], [0, 0, 1, 1], [], []>} : vector<20x32xf32>, vector<32x96xf32>, vector<20x96xf32> -> vector<20x96xf32>
    %c752 = arith.constant 752 : index
    %c0_119 = arith.constant 0 : index
    %278 = vector.load %arg2[%c752, %c0_119] : memref<1048x128xf32, #tpu.memory_space<vmem>>, vector<1x96xf32>
    %279 = vector.broadcast %278 : vector<1x96xf32> to vector<20x96xf32>
    %280 = arith.addf %277, %279 : vector<20x96xf32>
    %c760 = arith.constant 760 : index
    %c0_120 = arith.constant 0 : index
    %281 = vector.load %arg2[%c760, %c0_120] : memref<1048x128xf32, #tpu.memory_space<vmem>>, vector<32x32xf32>
    %282 = vector.extract_strided_slice %280 {offsets = [0, 0], sizes = [10, 16], strides = [1, 1]} : vector<20x96xf32> to vector<10x16xf32>
    %283 = vector.extract_strided_slice %280 {offsets = [0, 32], sizes = [10, 16], strides = [1, 1]} : vector<20x96xf32> to vector<10x16xf32>
    %284 = vector.extract_strided_slice %280 {offsets = [0, 64], sizes = [10, 16], strides = [1, 1]} : vector<20x96xf32> to vector<10x16xf32>
    %cst_121 = arith.constant dense<0.000000e+00> : vector<10x10xf32>
    %285 = tpu.matmul %282, %283, %cst_121 {dimension_numbers = #tpu.dot_dimension_numbers<[1], [1], [0], [0], [0, 0, 1, 0], [], []>} : vector<10x16xf32>, vector<10x16xf32>, vector<10x10xf32> -> vector<10x10xf32>
    %cst_122 = arith.constant 2.500000e-01 : f32
    %286 = vector.broadcast %cst_122 : f32 to vector<10x10xf32>
    %287 = arith.mulf %285, %286 : vector<10x10xf32>
    %cst_123 = arith.constant dense<0xFF800000> : vector<10xf32>
    %288 = vector.multi_reduction <maximumf>, %287, %cst_123 [1] : vector<10x10xf32> to vector<10xf32>
    %289 = vector.shape_cast %288 : vector<10xf32> to vector<10x1xf32>
    %290 = vector.broadcast %289 : vector<10x1xf32> to vector<10x10xf32>
    %291 = arith.subf %287, %290 : vector<10x10xf32>
    %292 = math.exp %291 : vector<10x10xf32>
    %cst_124 = arith.constant dense<0.000000e+00> : vector<10xf32>
    %293 = vector.multi_reduction <add>, %292, %cst_124 [1] : vector<10x10xf32> to vector<10xf32>
    %294 = vector.shape_cast %293 : vector<10xf32> to vector<10x1xf32>
    %295 = tpu.reciprocal %294 {approx = true} : vector<10x1xf32> -> vector<10x1xf32>
    %296 = vector.broadcast %295 : vector<10x1xf32> to vector<10x10xf32>
    %297 = arith.mulf %292, %296 : vector<10x10xf32>
    %cst_125 = arith.constant dense<0.000000e+00> : vector<10x16xf32>
    %298 = tpu.matmul %297, %284, %cst_125 {dimension_numbers = #tpu.dot_dimension_numbers<[1], [0], [0], [1], [0, 0, 1, 1], [], []>} : vector<10x10xf32>, vector<10x16xf32>, vector<10x16xf32> -> vector<10x16xf32>
    %299 = vector.extract_strided_slice %281 {offsets = [0, 0], sizes = [16, 32], strides = [1, 1]} : vector<32x32xf32> to vector<16x32xf32>
    %cst_126 = arith.constant dense<0.000000e+00> : vector<10x32xf32>
    %300 = tpu.matmul %298, %299, %cst_126 {dimension_numbers = #tpu.dot_dimension_numbers<[1], [0], [0], [1], [0, 0, 1, 1], [], []>} : vector<10x16xf32>, vector<16x32xf32>, vector<10x32xf32> -> vector<10x32xf32>
    %301 = vector.extract_strided_slice %280 {offsets = [0, 16], sizes = [10, 16], strides = [1, 1]} : vector<20x96xf32> to vector<10x16xf32>
    %302 = vector.extract_strided_slice %280 {offsets = [0, 48], sizes = [10, 16], strides = [1, 1]} : vector<20x96xf32> to vector<10x16xf32>
    %303 = vector.extract_strided_slice %280 {offsets = [0, 80], sizes = [10, 16], strides = [1, 1]} : vector<20x96xf32> to vector<10x16xf32>
    %cst_127 = arith.constant dense<0.000000e+00> : vector<10x10xf32>
    %304 = tpu.matmul %301, %302, %cst_127 {dimension_numbers = #tpu.dot_dimension_numbers<[1], [1], [0], [0], [0, 0, 1, 0], [], []>} : vector<10x16xf32>, vector<10x16xf32>, vector<10x10xf32> -> vector<10x10xf32>
    %cst_128 = arith.constant 2.500000e-01 : f32
    %305 = vector.broadcast %cst_128 : f32 to vector<10x10xf32>
    %306 = arith.mulf %304, %305 : vector<10x10xf32>
    %cst_129 = arith.constant dense<0xFF800000> : vector<10xf32>
    %307 = vector.multi_reduction <maximumf>, %306, %cst_129 [1] : vector<10x10xf32> to vector<10xf32>
    %308 = vector.shape_cast %307 : vector<10xf32> to vector<10x1xf32>
    %309 = vector.broadcast %308 : vector<10x1xf32> to vector<10x10xf32>
    %310 = arith.subf %306, %309 : vector<10x10xf32>
    %311 = math.exp %310 : vector<10x10xf32>
    %cst_130 = arith.constant dense<0.000000e+00> : vector<10xf32>
    %312 = vector.multi_reduction <add>, %311, %cst_130 [1] : vector<10x10xf32> to vector<10xf32>
    %313 = vector.shape_cast %312 : vector<10xf32> to vector<10x1xf32>
    %314 = tpu.reciprocal %313 {approx = true} : vector<10x1xf32> -> vector<10x1xf32>
    %315 = vector.broadcast %314 : vector<10x1xf32> to vector<10x10xf32>
    %316 = arith.mulf %311, %315 : vector<10x10xf32>
    %cst_131 = arith.constant dense<0.000000e+00> : vector<10x16xf32>
    %317 = tpu.matmul %316, %303, %cst_131 {dimension_numbers = #tpu.dot_dimension_numbers<[1], [0], [0], [1], [0, 0, 1, 1], [], []>} : vector<10x10xf32>, vector<10x16xf32>, vector<10x16xf32> -> vector<10x16xf32>
    %318 = vector.extract_strided_slice %281 {offsets = [16, 0], sizes = [16, 32], strides = [1, 1]} : vector<32x32xf32> to vector<16x32xf32>
    %cst_132 = arith.constant dense<0.000000e+00> : vector<10x32xf32>
    %319 = tpu.matmul %317, %318, %cst_132 {dimension_numbers = #tpu.dot_dimension_numbers<[1], [0], [0], [1], [0, 0, 1, 1], [], []>} : vector<10x16xf32>, vector<16x32xf32>, vector<10x32xf32> -> vector<10x32xf32>
    %320 = arith.addf %300, %319 : vector<10x32xf32>
    %c0_133 = arith.constant 0 : index
    %c0_134 = arith.constant 0 : index
    %321 = vector.load %arg4[%c0_133, %c0_134] : memref<20x32xf32, #tpu.memory_space<vmem>>, vector<10x32xf32>
    tpu.vector_store %arg4[%c0_133, %c0_134], %320 {strides = array<i32>} : memref<20x32xf32, #tpu.memory_space<vmem>>, vector<10x32xf32>,
    %322 = vector.extract_strided_slice %280 {offsets = [10, 0], sizes = [10, 16], strides = [1, 1]} : vector<20x96xf32> to vector<10x16xf32>
    %323 = vector.extract_strided_slice %280 {offsets = [10, 32], sizes = [10, 16], strides = [1, 1]} : vector<20x96xf32> to vector<10x16xf32>
    %324 = vector.extract_strided_slice %280 {offsets = [10, 64], sizes = [10, 16], strides = [1, 1]} : vector<20x96xf32> to vector<10x16xf32>
    %cst_135 = arith.constant dense<0.000000e+00> : vector<10x10xf32>
    %325 = tpu.matmul %322, %323, %cst_135 {dimension_numbers = #tpu.dot_dimension_numbers<[1], [1], [0], [0], [0, 0, 1, 0], [], []>} : vector<10x16xf32>, vector<10x16xf32>, vector<10x10xf32> -> vector<10x10xf32>
    %cst_136 = arith.constant 2.500000e-01 : f32
    %326 = vector.broadcast %cst_136 : f32 to vector<10x10xf32>
    %327 = arith.mulf %325, %326 : vector<10x10xf32>
    %cst_137 = arith.constant dense<0xFF800000> : vector<10xf32>
    %328 = vector.multi_reduction <maximumf>, %327, %cst_137 [1] : vector<10x10xf32> to vector<10xf32>
    %329 = vector.shape_cast %328 : vector<10xf32> to vector<10x1xf32>
    %330 = vector.broadcast %329 : vector<10x1xf32> to vector<10x10xf32>
    %331 = arith.subf %327, %330 : vector<10x10xf32>
    %332 = math.exp %331 : vector<10x10xf32>
    %cst_138 = arith.constant dense<0.000000e+00> : vector<10xf32>
    %333 = vector.multi_reduction <add>, %332, %cst_138 [1] : vector<10x10xf32> to vector<10xf32>
    %334 = vector.shape_cast %333 : vector<10xf32> to vector<10x1xf32>
    %335 = tpu.reciprocal %334 {approx = true} : vector<10x1xf32> -> vector<10x1xf32>
    %336 = vector.broadcast %335 : vector<10x1xf32> to vector<10x10xf32>
    %337 = arith.mulf %332, %336 : vector<10x10xf32>
    %cst_139 = arith.constant dense<0.000000e+00> : vector<10x16xf32>
    %338 = tpu.matmul %337, %324, %cst_139 {dimension_numbers = #tpu.dot_dimension_numbers<[1], [0], [0], [1], [0, 0, 1, 1], [], []>} : vector<10x10xf32>, vector<10x16xf32>, vector<10x16xf32> -> vector<10x16xf32>
    %339 = vector.extract_strided_slice %281 {offsets = [0, 0], sizes = [16, 32], strides = [1, 1]} : vector<32x32xf32> to vector<16x32xf32>
    %cst_140 = arith.constant dense<0.000000e+00> : vector<10x32xf32>
    %340 = tpu.matmul %338, %339, %cst_140 {dimension_numbers = #tpu.dot_dimension_numbers<[1], [0], [0], [1], [0, 0, 1, 1], [], []>} : vector<10x16xf32>, vector<16x32xf32>, vector<10x32xf32> -> vector<10x32xf32>
    %341 = vector.extract_strided_slice %280 {offsets = [10, 16], sizes = [10, 16], strides = [1, 1]} : vector<20x96xf32> to vector<10x16xf32>
    %342 = vector.extract_strided_slice %280 {offsets = [10, 48], sizes = [10, 16], strides = [1, 1]} : vector<20x96xf32> to vector<10x16xf32>
    %343 = vector.extract_strided_slice %280 {offsets = [10, 80], sizes = [10, 16], strides = [1, 1]} : vector<20x96xf32> to vector<10x16xf32>
    %cst_141 = arith.constant dense<0.000000e+00> : vector<10x10xf32>
    %344 = tpu.matmul %341, %342, %cst_141 {dimension_numbers = #tpu.dot_dimension_numbers<[1], [1], [0], [0], [0, 0, 1, 0], [], []>} : vector<10x16xf32>, vector<10x16xf32>, vector<10x10xf32> -> vector<10x10xf32>
    %cst_142 = arith.constant 2.500000e-01 : f32
    %345 = vector.broadcast %cst_142 : f32 to vector<10x10xf32>
    %346 = arith.mulf %344, %345 : vector<10x10xf32>
    %cst_143 = arith.constant dense<0xFF800000> : vector<10xf32>
    %347 = vector.multi_reduction <maximumf>, %346, %cst_143 [1] : vector<10x10xf32> to vector<10xf32>
    %348 = vector.shape_cast %347 : vector<10xf32> to vector<10x1xf32>
    %349 = vector.broadcast %348 : vector<10x1xf32> to vector<10x10xf32>
    %350 = arith.subf %346, %349 : vector<10x10xf32>
    %351 = math.exp %350 : vector<10x10xf32>
    %cst_144 = arith.constant dense<0.000000e+00> : vector<10xf32>
    %352 = vector.multi_reduction <add>, %351, %cst_144 [1] : vector<10x10xf32> to vector<10xf32>
    %353 = vector.shape_cast %352 : vector<10xf32> to vector<10x1xf32>
    %354 = tpu.reciprocal %353 {approx = true} : vector<10x1xf32> -> vector<10x1xf32>
    %355 = vector.broadcast %354 : vector<10x1xf32> to vector<10x10xf32>
    %356 = arith.mulf %351, %355 : vector<10x10xf32>
    %cst_145 = arith.constant dense<0.000000e+00> : vector<10x16xf32>
    %357 = tpu.matmul %356, %343, %cst_145 {dimension_numbers = #tpu.dot_dimension_numbers<[1], [0], [0], [1], [0, 0, 1, 1], [], []>} : vector<10x10xf32>, vector<10x16xf32>, vector<10x16xf32> -> vector<10x16xf32>
    %358 = vector.extract_strided_slice %281 {offsets = [16, 0], sizes = [16, 32], strides = [1, 1]} : vector<32x32xf32> to vector<16x32xf32>
    %cst_146 = arith.constant dense<0.000000e+00> : vector<10x32xf32>
    %359 = tpu.matmul %357, %358, %cst_146 {dimension_numbers = #tpu.dot_dimension_numbers<[1], [0], [0], [1], [0, 0, 1, 1], [], []>} : vector<10x16xf32>, vector<16x32xf32>, vector<10x32xf32> -> vector<10x32xf32>
    %360 = arith.addf %340, %359 : vector<10x32xf32>
    %c10_147 = arith.constant 10 : index
    %c0_148 = arith.constant 0 : index
    %361 = vector.load %arg4[%c10_147, %c0_148] : memref<20x32xf32, #tpu.memory_space<vmem>>, vector<10x32xf32>
    tpu.vector_store %arg4[%c10_147, %c0_148], %360 {strides = array<i32>} : memref<20x32xf32, #tpu.memory_space<vmem>>, vector<10x32xf32>,
    %c0_149 = arith.constant 0 : index
    %c0_150 = arith.constant 0 : index
    %362 = vector.load %arg4[%c0_149, %c0_150] : memref<20x32xf32, #tpu.memory_space<vmem>>, vector<20x32xf32>
    %363 = arith.addf %253, %362 : vector<20x32xf32>
    %c792 = arith.constant 792 : index
    %c0_151 = arith.constant 0 : index
    %364 = vector.load %arg2[%c792, %c0_151] : memref<1048x128xf32, #tpu.memory_space<vmem>>, vector<1x32xf32>
    %365 = vector.broadcast %364 : vector<1x32xf32> to vector<20x32xf32>
    %366 = arith.addf %363, %365 : vector<20x32xf32>
    %cst_152 = arith.constant dense<0.000000e+00> : vector<20xf32>
    %367 = vector.multi_reduction <add>, %366, %cst_152 [1] : vector<20x32xf32> to vector<20xf32>
    %368 = vector.shape_cast %367 : vector<20xf32> to vector<20x1xf32>
    %cst_153 = arith.constant 3.200000e+01 : f32
    %369 = vector.broadcast %cst_153 : f32 to vector<20x1xf32>
    %370 = arith.divf %368, %369 : vector<20x1xf32>
    %371 = vector.broadcast %370 : vector<20x1xf32> to vector<20x32xf32>
    %372 = arith.subf %366, %371 : vector<20x32xf32>
    %373 = arith.mulf %372, %372 : vector<20x32xf32>
    %cst_154 = arith.constant dense<0.000000e+00> : vector<20xf32>
    %374 = vector.multi_reduction <add>, %373, %cst_154 [1] : vector<20x32xf32> to vector<20xf32>
    %375 = vector.shape_cast %374 : vector<20xf32> to vector<20x1xf32>
    %cst_155 = arith.constant 3.200000e+01 : f32
    %376 = vector.broadcast %cst_155 : f32 to vector<20x1xf32>
    %377 = arith.divf %375, %376 : vector<20x1xf32>
    %cst_156 = arith.constant 9.99999974E-6 : f32
    %378 = vector.broadcast %cst_156 : f32 to vector<20x1xf32>
    %379 = arith.addf %377, %378 : vector<20x1xf32>
    %380 = math.rsqrt %379 : vector<20x1xf32>
    %381 = vector.broadcast %380 : vector<20x1xf32> to vector<20x32xf32>
    %382 = arith.mulf %372, %381 : vector<20x32xf32>
    %c800 = arith.constant 800 : index
    %c0_157 = arith.constant 0 : index
    %383 = vector.load %arg2[%c800, %c0_157] : memref<1048x128xf32, #tpu.memory_space<vmem>>, vector<1x32xf32>
    %384 = vector.broadcast %383 : vector<1x32xf32> to vector<20x32xf32>
    %385 = arith.mulf %382, %384 : vector<20x32xf32>
    %c808 = arith.constant 808 : index
    %c0_158 = arith.constant 0 : index
    %386 = vector.load %arg2[%c808, %c0_158] : memref<1048x128xf32, #tpu.memory_space<vmem>>, vector<1x32xf32>
    %387 = vector.broadcast %386 : vector<1x32xf32> to vector<20x32xf32>
    %388 = arith.addf %385, %387 : vector<20x32xf32>
    %c816 = arith.constant 816 : index
    %c0_159 = arith.constant 0 : index
    %389 = vector.load %arg2[%c816, %c0_159] : memref<1048x128xf32, #tpu.memory_space<vmem>>, vector<32x128xf32>
    %cst_160 = arith.constant dense<0.000000e+00> : vector<20x128xf32>
    %390 = tpu.matmul %388, %389, %cst_160 {dimension_numbers = #tpu.dot_dimension_numbers<[1], [0], [0], [1], [0, 0, 1, 1], [], []>} : vector<20x32xf32>, vector<32x128xf32>, vector<20x128xf32> -> vector<20x128xf32>
    %c848 = arith.constant 848 : index
    %c0_161 = arith.constant 0 : index
    %391 = vector.load %arg2[%c848, %c0_161] : memref<1048x128xf32, #tpu.memory_space<vmem>>, vector<1x128xf32>
    %392 = vector.broadcast %391 : vector<1x128xf32> to vector<20x128xf32>
    %393 = arith.addf %390, %392 : vector<20x128xf32>
    %394 = arith.mulf %393, %393 : vector<20x128xf32>
    %395 = arith.mulf %393, %394 : vector<20x128xf32>
    %cst_162 = arith.constant 4.471500e-02 : f32
    %396 = vector.broadcast %cst_162 : f32 to vector<20x128xf32>
    %397 = arith.mulf %396, %395 : vector<20x128xf32>
    %398 = arith.addf %393, %397 : vector<20x128xf32>
    %cst_163 = arith.constant 0.797884583 : f32
    %399 = vector.broadcast %cst_163 : f32 to vector<20x128xf32>
    %400 = arith.mulf %399, %398 : vector<20x128xf32>
    %401 = math.tanh %400 : vector<20x128xf32>
    %cst_164 = arith.constant 1.000000e+00 : f32
    %402 = vector.broadcast %cst_164 : f32 to vector<20x128xf32>
    %403 = arith.addf %402, %401 : vector<20x128xf32>
    %cst_165 = arith.constant 5.000000e-01 : f32
    %404 = vector.broadcast %cst_165 : f32 to vector<20x128xf32>
    %405 = arith.mulf %404, %403 : vector<20x128xf32>
    %406 = arith.mulf %393, %405 : vector<20x128xf32>
    %c856 = arith.constant 856 : index
    %c0_166 = arith.constant 0 : index
    %407 = vector.load %arg2[%c856, %c0_166] : memref<1048x128xf32, #tpu.memory_space<vmem>>, vector<128x32xf32>
    %cst_167 = arith.constant dense<0.000000e+00> : vector<20x32xf32>
    %408 = tpu.matmul %406, %407, %cst_167 {dimension_numbers = #tpu.dot_dimension_numbers<[1], [0], [0], [1], [0, 0, 1, 1], [], []>} : vector<20x128xf32>, vector<128x32xf32>, vector<20x32xf32> -> vector<20x32xf32>
    %c984 = arith.constant 984 : index
    %c0_168 = arith.constant 0 : index
    %409 = vector.load %arg2[%c984, %c0_168] : memref<1048x128xf32, #tpu.memory_space<vmem>>, vector<1x32xf32>
    %410 = vector.broadcast %409 : vector<1x32xf32> to vector<20x32xf32>
    %411 = arith.addf %408, %410 : vector<20x32xf32>
    %412 = arith.addf %366, %411 : vector<20x32xf32>
    %cst_169 = arith.constant dense<0.000000e+00> : vector<20xf32>
    %413 = vector.multi_reduction <add>, %412, %cst_169 [1] : vector<20x32xf32> to vector<20xf32>
    %414 = vector.shape_cast %413 : vector<20xf32> to vector<20x1xf32>
    %cst_170 = arith.constant 3.200000e+01 : f32
    %415 = vector.broadcast %cst_170 : f32 to vector<20x1xf32>
    %416 = arith.divf %414, %415 : vector<20x1xf32>
    %417 = vector.broadcast %416 : vector<20x1xf32> to vector<20x32xf32>
    %418 = arith.subf %412, %417 : vector<20x32xf32>
    %419 = arith.mulf %418, %418 : vector<20x32xf32>
    %cst_171 = arith.constant dense<0.000000e+00> : vector<20xf32>
    %420 = vector.multi_reduction <add>, %419, %cst_171 [1] : vector<20x32xf32> to vector<20xf32>
    %421 = vector.shape_cast %420 : vector<20xf32> to vector<20x1xf32>
    %cst_172 = arith.constant 3.200000e+01 : f32
    %422 = vector.broadcast %cst_172 : f32 to vector<20x1xf32>
    %423 = arith.divf %421, %422 : vector<20x1xf32>
    %cst_173 = arith.constant 9.99999974E-6 : f32
    %424 = vector.broadcast %cst_173 : f32 to vector<20x1xf32>
    %425 = arith.addf %423, %424 : vector<20x1xf32>
    %426 = math.rsqrt %425 : vector<20x1xf32>
    %427 = vector.broadcast %426 : vector<20x1xf32> to vector<20x32xf32>
    %428 = arith.mulf %418, %427 : vector<20x32xf32>
    %c992 = arith.constant 992 : index
    %c0_174 = arith.constant 0 : index
    %429 = vector.load %arg2[%c992, %c0_174] : memref<1048x128xf32, #tpu.memory_space<vmem>>, vector<1x32xf32>
    %430 = vector.broadcast %429 : vector<1x32xf32> to vector<20x32xf32>
    %431 = arith.mulf %428, %430 : vector<20x32xf32>
    %c1000 = arith.constant 1000 : index
    %c0_175 = arith.constant 0 : index
    %432 = vector.load %arg2[%c1000, %c0_175] : memref<1048x128xf32, #tpu.memory_space<vmem>>, vector<1x32xf32>
    %433 = vector.broadcast %432 : vector<1x32xf32> to vector<20x32xf32>
    %434 = arith.addf %431, %433 : vector<20x32xf32>
    %435 = vector.extract_strided_slice %434 {offsets = [6, 0], sizes = [4, 32], strides = [1, 1]} : vector<20x32xf32> to vector<4x32xf32>
    %c1008 = arith.constant 1008 : index
    %c0_176 = arith.constant 0 : index
    %436 = vector.load %arg2[%c1008, %c0_176] : memref<1048x128xf32, #tpu.memory_space<vmem>>, vector<32x128xf32>
    %cst_177 = arith.constant dense<0.000000e+00> : vector<4x128xf32>
    %437 = tpu.matmul %435, %436, %cst_177 {dimension_numbers = #tpu.dot_dimension_numbers<[1], [0], [0], [1], [0, 0, 1, 1], [], []>} : vector<4x32xf32>, vector<32x128xf32>, vector<4x128xf32> -> vector<4x128xf32>
    %c1040 = arith.constant 1040 : index
    %c0_178 = arith.constant 0 : index
    %438 = vector.load %arg2[%c1040, %c0_178] : memref<1048x128xf32, #tpu.memory_space<vmem>>, vector<1x128xf32>
    %439 = vector.broadcast %438 : vector<1x128xf32> to vector<4x128xf32>
    %440 = arith.addf %437, %439 : vector<4x128xf32>
    %c0_179 = arith.constant 0 : index
    %c0_180 = arith.constant 0 : index
    %441 = vector.load %arg3[%c0_179, %c0_180] : memref<8x128xf32, #tpu.memory_space<vmem>>, vector<4x128xf32>
    tpu.vector_store %arg3[%c0_179, %c0_180], %440 {strides = array<i32>} : memref<8x128xf32, #tpu.memory_space<vmem>>, vector<4x128xf32>,
    %442 = vector.extract_strided_slice %434 {offsets = [16, 0], sizes = [4, 32], strides = [1, 1]} : vector<20x32xf32> to vector<4x32xf32>
    %c1008_181 = arith.constant 1008 : index
    %c0_182 = arith.constant 0 : index
    %443 = vector.load %arg2[%c1008_181, %c0_182] : memref<1048x128xf32, #tpu.memory_space<vmem>>, vector<32x128xf32>
    %cst_183 = arith.constant dense<0.000000e+00> : vector<4x128xf32>
    %444 = tpu.matmul %442, %443, %cst_183 {dimension_numbers = #tpu.dot_dimension_numbers<[1], [0], [0], [1], [0, 0, 1, 1], [], []>} : vector<4x32xf32>, vector<32x128xf32>, vector<4x128xf32> -> vector<4x128xf32>
    %c1040_184 = arith.constant 1040 : index
    %c0_185 = arith.constant 0 : index
    %445 = vector.load %arg2[%c1040_184, %c0_185] : memref<1048x128xf32, #tpu.memory_space<vmem>>, vector<1x128xf32>
    %446 = vector.broadcast %445 : vector<1x128xf32> to vector<4x128xf32>
    %447 = arith.addf %444, %446 : vector<4x128xf32>
    %c4_186 = arith.constant 4 : index
    %c0_187 = arith.constant 0 : index
    %448 = vector.load %arg3[%c4_186, %c0_187] : memref<8x128xf32, #tpu.memory_space<vmem>>, vector<4x128xf32>
    tpu.vector_store %arg3[%c4_186, %c0_187], %447 {strides = array<i32>} : memref<8x128xf32, #tpu.memory_space<vmem>>, vector<4x128xf32>,
    return
  }
}

</mosaic_0001>

<bundles_post_ra>
// kernel: rt1_forward.1
= control target key start
LH: loop header
LB: loop body
LE: loop exit
PB: predicated region body
PF: predicated region fallthrough
CT: control target
= control target key end

     0   :  { %v5673_v3 = vmov 0.0|0.0   ;;  %vm5674_vm0 = vmmov 0   ;;  %v5675_v8 = vmov 0.0   ;;  %vm124_vm1 = vcmask 130048   ;;  %s6639_s0 = inlined_call_operand.vmem [shape: f32[8,192], index: 0, kind: input, shape index: {}]   ;;  %s6640_s1 = inlined_call_operand.vmem [shape: f32[2,8], index: 1, kind: input, shape index: {}]   ;;  %s6641_s2 = inlined_call_operand.vmem [shape: f32[1048,128], index: 2, kind: input, shape index: {}]   ;;  %s6642_s3 = inlined_call_operand.hbm [shape: f32[8,128], index: 3, kind: output, shape index: {}]  }
   0x1   :  { %v18_v0 = vld [vmem:[%s6641_s2] sm:$0xff]  ;;  %v19_v1 = vld [vmem:[%s6641_s2 + $0x8] sm:$0xff]  ;;  %5157 = vmatprep.subr.bf16.mxu0 %v5673_v3  ;;  %5193 = vmatprep.subr.bf16.mxu1 %v5673_v3  ;;  %v122_v5 = vld [vmem:[%s6641_s2 + $0xd0] sm:$0xff]  ;;  %vm47_vm2 = vcmask 523264  }
   0x2   :  { %v121_v2 = vld [vmem:[%s6641_s2 + $0xc8] sm:$0xff]  ;;  %v5158_v4 = vpack.c.bf16 %v19_v1, %v18_v0  ;;  %v20_v6 = vld [vmem:[%s6641_s2 + $0x10] sm:$0xff]  ;;  %4750 = vmatprep.mubr.msk.f32.mxu1 %vm5674_vm0, %v5675_v8  ;;  %v21_v9 = vld [vmem:[%s6641_s2 + $0x18] sm:$0xff] }
   0x3   :  { %v5194_v7 = vpack.c.bf16 %v122_v5, %v121_v2  ;;  %v5161_v10 = vpack.c.bf16 %v21_v9, %v20_v6  ;;  %v5730_v11 = vld [vmem:[%s6641_s2 + $0x180] sm:$0x1]  ;;  %v23_v13 = vld [vmem:[%s6641_s2 + $0x28] sm:$0xff]  ;;  %v24_v15 = vld [vmem:[%s6641_s2 + $0x30] sm:$0xff] }
   0x4   :  { %5159 = vmatpush1.bf16.msra.mxu0 %v5158_v4  ;;  %v22_v12 = vld [vmem:[%s6641_s2 + $0x20] sm:$0xff]  ;;  %v25_v16 = vld [vmem:[%s6641_s2 + $0x38] sm:$0xff]  ;;  %v17_v17 = vld [vmem:[%s6639_s0 + $0x8] sm:$0xff] }
   0x5   :  { %5195 = vmatpush3.bf16.msra.mxu1 %v5194_v7  ;;  %5160 = vmatprep.subr.bf16.mxu0 %v5673_v3  ;;  %v5164_v14 = vpack.c.bf16 %v23_v13, %v22_v12 }
   0x6   :  { %5196 = vmatprep.subr.bf16.mxu1 %v5673_v3  ;;  %4419 = vmatprep.mubr.msk.f32.mxu0 %vm47_vm2, %v17_v17 }
   0x8   :  { %4751 = vmatmul.mubr.msk.f32.vlgmr.msra.gmra.mrb[0].mxu1 %vm124_vm1, %v5730_v11  ;;  %5162 = vmatpush1.bf16.msra.mxu0 %v5161_v10 }
   0x9   :  { %5163 = vmatprep.subr.bf16.mxu0 %v5673_v3  ;;  %4759 = vmatprep.mubr.msk.f32.mxu1 %vm5674_vm0, %v5675_v8 }
   0xa   :  { %8 = vsyncpa [#allocation4], 0  ;;  %v5167_v18 = vpack.c.bf16 %v25_v16, %v24_v15  ;;  %v26_v19 = vld [vmem:[%s6641_s2 + $0x40] sm:$0xff]  ;;  %v27_v20 = vld [vmem:[%s6641_s2 + $0x48] sm:$0xff]  ;;  %v199_v44 = vlaneseq  ;;  %s5676_s18 = smov 104   ;;  %vm228_vm3 = vcmask 195584  }
   0xb   :  { %v5170_v21 = vpack.c.bf16 %v27_v20, %v26_v19  ;;  %v28_v22 = vld [vmem:[%s6641_s2 + $0x50] sm:$0xff]  ;;  %v29_v23 = vld [vmem:[%s6641_s2 + $0x58] sm:$0xff]  ;;  %v30_v25 = vld [vmem:[%s6641_s2 + $0x60] sm:$0xff]  ;;  %vm311_vm4 = vcmask 261120   ;;  %vm441_vm5 = vcmask 1043456   ;;  %vm385_vm6 = vcmask 27648  }
   0xc   :  { %5165 = vmatpush1.bf16.msra.mxu0 %v5164_v14  ;;  %v5173_v24 = vpack.c.bf16 %v29_v23, %v28_v22  ;;  %v31_v26 = vld [vmem:[%s6641_s2 + $0x68] sm:$0xff]  ;;  %v32_v28 = vld [vmem:[%s6641_s2 + $0x70] sm:$0xff]  ;;  %v33_v29 = vld [vmem:[%s6641_s2 + $0x78] sm:$0xff]  ;;  %v200_v45 = vshrl.u32 %v199_v44, 7  ;;  %vm598_vm7 = vcmask 31748   ;;  %vm437_vm8 = vcmask 31744  }
   0xd   :  { %5166 = vmatprep.subr.bf16.mxu0 %v5673_v3  ;;  %v5176_v27 = vpack.c.bf16 %v31_v26, %v30_v25  ;;  %v5179_v30 = vpack.c.bf16 %v33_v29, %v32_v28  ;;  %v34_v31 = vld [vmem:[%s6641_s2 + $0x80] sm:$0xff]  ;;  %v35_v32 = vld [vmem:[%s6641_s2 + $0x88] sm:$0xff]  ;;  %v36_v34 = vld [vmem:[%s6641_s2 + $0x90] sm:$0xff]  ;;  %vm596_vm9 = vcmask 257024   ;;  %vm822_vm10 = vcmask 64512   ;;  %s5677_s25 = smov 112  }
   0xe   :  { %v5182_v33 = vpack.c.bf16 %v35_v32, %v34_v31  ;;  %v37_v35 = vld [vmem:[%s6641_s2 + $0x98] sm:$0xff]  ;;  %v38_v37 = vld [vmem:[%s6641_s2 + $0xa0] sm:$0xff]  ;;  %v39_v38 = vld [vmem:[%s6641_s2 + $0xa8] sm:$0xff]  ;;  %v201_v47 = vsub.s32 0, %v200_v45  ;;  %vm970_vm11 = vcmask 253952   ;;  %vm974_vm12 = vcmask 254977  }
   0xf   :  { %v5185_v36 = vpack.c.bf16 %v37_v35, %v36_v34  ;;  %v5188_v39 = vpack.c.bf16 %v39_v38, %v38_v37  ;;  %v40_v40 = vld [vmem:[%s6641_s2 + $0xb0] sm:$0xff]  ;;  %v41_v41 = vld [vmem:[%s6641_s2 + $0xb8] sm:$0xff]  ;;  %v16_v43 = vld [vmem:[%s6639_s0] sm:$0xff]  ;;  %s5678_s26 = smov 96   ;;  %s5679_s27 = smov 80   ;;  %vm1718_vm14 = vcmask 1045504  }
  0x10   :  { %5168 = vmatpush1.bf16.msra.mxu0 %v5167_v18  ;;  %v5191_v42 = vpack.c.bf16 %v41_v41, %v40_v40  ;;  %v123_v46 = vld [vmem:[%s6641_s2 + $0xd8] sm:$0x1]  ;;  %v220_v54 = vld [vmem:[%s6641_s2 + $0xe0] sm:$0xff]  ;;  %v221_v55 = vld [vmem:[%s6641_s2 + $0xe8] sm:$0xff]  ;;  %vm1240_vm15 = vcmask 74752   ;;  %vm1236_vm2 = vcmask 80896  }
  0x11   :  { %5169 = vmatprep.subr.bf16.mxu0 %v5673_v3  ;;  %v5197_v56 = vpack.c.bf16 %v221_v55, %v220_v54  ;;  %v222_v57 = vld [vmem:[%s6641_s2 + $0xf0] sm:$0xff]  ;;  %v302_v58 = vld [vmem:[%s6641_s2 + $0x100] sm:$0xff]  ;;  %v303_v59 = vld [vmem:[%s6641_s2 + $0x108] sm:$0xff]  ;;  %s5680_s28 = smov 64   ;;  %s5681_s29 = smov 48  }
  0x12   :  { %v5200_v60 = vpack.c.bf16 %v303_v59, %v302_v58  ;;  %v4418_v61 = vld [vmem:[%s6641_s2 + $0xc0] ss:$0 sm:$0xff]  ;;  %v304_v12 = vld [vmem:[%s6641_s2 + $0x110] sm:$0xff]  ;;  %v305_v13 = vld [vmem:[%s6641_s2 + $0x118] sm:$0xff]  ;;  %s5683_s11 = smov [#allocation3]  }
  0x13   :  { %5198 = vmatpush3.bf16.msra.mxu1 %v5197_v56  ;;  %v5203_v14 = vpack.c.bf16 %v305_v13, %v304_v12  ;;  %v4422_v15 = vld [vmem:[%s6641_s2 + $0xf8] ss:$0 sm:$0xff]  ;;  %v4424_v19 = vld [vmem:[%s6641_s2 + $0x120] ss:$0 sm:$0xff]  ;;  %v4428_v13 = vld [vmem:[%s6641_s2 + $0x148] ss:$0 sm:$0xff] }
  0x14   :  { %5171 = vmatpush1.bf16.msra.mxu0 %v5170_v21  ;;  %4757 = vmatprep.subr.mxu1 %v5675_v8  ;;  %vm5999_vm13 = vmpackc.low %vm124_vm1, %vm124_vm1  ;;  %s4410_s12 = sshll.u32 %s5683_s11, 4  ;;  %s4411_s12 = int_to_ptr.vmem [resolvable:$true] %s4410_s12 }
  0x15   :  { %5172 = vmatprep.subr.bf16.mxu0 %v5673_v3  ;;  %s5649_s13 = scalar_lea.vmem %s4411_s12, 128  ;;  %p5654_p1 = scmp.lt.s32.totalorder %s4411_s12, %s4411_s12 }
  0x16   :  { %p5650_p0 = scmp.ne.s32.totalorder %s4411_s12, %s5649_s13  ;;  %p5655_p2 = scmp.lt.s32.totalorder %s5649_s13, %s5649_s13 }
  0x17   :  { %4758 = vmatpush3.msra.mxu1 %v222_v57 }
  0x18   :  { %5174 = vmatpush1.bf16.msra.mxu0 %v5173_v24  ;;  %4773 = vmatprep.subr.mxu1 %v5675_v8  ;;  %p5656_p3 = por %p5655_p2, %p5654_p1 }
  0x19   :  { %5175 = vmatprep.subr.bf16.mxu0 %v5673_v3 }
  0x1a   :  { %p5657_p4 = pnand %p5656_p3, %p5650_p0 }
  0x1c   :  { %5177 = vmatpush1.bf16.msra.mxu0 %v5176_v27 }
  0x1d   :  { %5178 = vmatprep.subr.bf16.mxu0 %v5673_v3 }
  0x20   :  { %5180 = vmatpush1.bf16.msra.mxu0 %v5179_v30 }
  0x21   :  { %5181 = vmatprep.subr.bf16.mxu0 %v5673_v3 }
  0x24   :  { %5183 = vmatpush1.bf16.msra.mxu0 %v5182_v33 }
  0x25   :  { %5184 = vmatprep.subr.bf16.mxu0 %v5673_v3 }
  0x28   :  { %5186 = vmatpush1.bf16.msra.mxu0 %v5185_v36 }
  0x29   :  { %5187 = vmatprep.subr.bf16.mxu0 %v5673_v3 }
  0x2c   :  { %5189 = vmatpush1.bf16.msra.mxu0 %v5188_v39 }
  0x2d   :  { %5190 = vmatprep.subr.bf16.mxu0 %v5673_v3 }
  0x30   :  { %5192 = vmatpush1.bf16.msra.mxu0 %v5191_v42 }
  0x31   :  { %5199 = vmatprep.subr.bf16.mxu0 %v5673_v3 }
  0x33   :  { %116 = vmatmul.mubr.f32.vlgmr.msra.gmra.mrb[0].mxu0 %v16_v43 }
  0x34   :  { %4770 = vmatprep.mubr.msk.f32.mxu0 %vm5674_vm0, %v5675_v8  ;;  %5201 = vmatpush3.bf16.msra.mxu0 %v5200_v60 }
  0x35   :  { %5202 = vmatprep.subr.bf16.mxu0 %v5673_v3 }
  0x38   :  { %5204 = vmatpush3.bf16.msra.mxu0 %v5203_v14 }
  0x39   :  { %5220 = vmatprep.subr.bf16.mxu0 %v5673_v3 }
  0xdb   :  { %v194_v48 = vpop.f32.mrb[0].mxu1 }
  0xdc   :  { %v195_v49 = vadd.f32 %v194_v48, %v123_v46  ;;  %v4752_v50 = vpop.f32.mrb[1].mxu1 }
  0xde   :  { %v198_v51 = vadd.f32 1.0, %v195_v49  ;;  %v207_v52 = vrot.slane %v195_v49, %v201_v47 }
  0xe0   :  { %209 = vrot.lane.b32.xlu0 %v207_v52, %s5676_s18  ;;  %v202_v53 = vrot.slane %v198_v51, %v201_v47 }
 0x106   :  { %v117_v62 = vpop.f32.mrb[0].mxu0 }
 0x107   :  { %v118_v63 = vadd.f32 %v4418_v61, %v117_v62  ;;  %v119_v0 = vpop.f32.mrb[1].mxu0 }
 0x108   :  { %v515_v0 = vld [vmem:[%s6641_s2 + $0x130] sm:$0xff] }
 0x109   :  { %v203_v1 = vmul.f32 %v202_v53, %v118_v63  ;;  %v514_v63 = vld [vmem:[%s6641_s2 + $0x128] sm:$0xff] }
 0x152   :  { %v210_v2 = vpop.permute.xlu0 %209 }
 0x153   :  { %v212_v4 = vadd.f32 %v210_v2, %v203_v1  ;;  %v5206_v1 = vpack.c.bf16 %v515_v0, %v514_v63  ;;  %v516_v2 = vld [vmem:[%s6641_s2 + $0x138] sm:$0xff] }
 0x155   :  { %v4421_v5 = vmul.f32 -1.442695, %v212_v4 }
 0x157   :  { %5531 = vpow2.f32 %v4421_v5 }
 0x161   :  { %v5532_v6 = vpop.eup %5531 }
 0x162   :  { %v216_v7 = vadd.f32 1.0, %v5532_v6 }
 0x164   :  { %5533 = vrcp.f32 %v216_v7 }
 0x16e   :  { %v5534_v9 = vpop.eup %5533 }
 0x16f   :  { %v219_v10 = vmul.f32 %v5534_v9, %v212_v4  ;;  %v517_v4 = vld [vmem:[%s6641_s2 + $0x140] sm:$0xff] }
 0x170   :  { %v5209_v6 = vpack.c.bf16 %v517_v4, %v516_v2 }
 0x171   :  { %4760 = vmatmul.mubr.msk.f32.vlgmr.msra.gmra.mrb[2].mxu1 %vm228_vm3, %v219_v10  ;;  %vm1271_vm3 = vcmask 1041408  }
 0x172   :  { %4775 = vmatprep.mubr.msk.f32.mxu1 %vm5674_vm0, %v5675_v8 }
 0x244   :  { %v298_v16 = vpop.f32.mrb[2].mxu1 }
 0x245   :  { %v5852_v17 = vadd.f32 %v4422_v15, %v298_v16  ;;  %v4761_v18 = vpop.f32.mrb[3].mxu1 }
 0x246   :  { %v896_v18 = vld [vmem:[%s6641_s2 + $0x160] sm:$0xff] }
 0x247   :  { %4771 = vmatmul.mubr.msk.f32.vlgmr.msra.gmra.mrb[2].mxu0 %vm311_vm4, %v5852_v17  ;;  %4774 = vmatpush3.msk.msra.mxu1 %vm441_vm5, %v5852_v17  ;;  %v656_v7 = vrot.slane %v5852_v17, 4  ;;  %v816_v17 = vld [vmem:[%s6641_s2 + $0x150] sm:$0xff] }
 0x248   :  { %5205 = vmatprep.subr.bf16.mxu1 %v5673_v3  ;;  %4825 = vmatprep.mubr.msk.f32.mxu0 %vm5674_vm0, %v5675_v8 }
 0x31a   :  { %v381_v20 = vpop.f32.mrb[2].mxu0 }
 0x31b   :  { %v382_v21 = vadd.f32 %v4424_v19, %v381_v20  ;;  %v4772_v22 = vpop.f32.mrb[3].mxu0  ;;  %v897_v19 = vld [vmem:[%s6641_s2 + $0x168] sm:$0xff] }
 0x31c   :  { %v815_v22 = vld [vmem:[%s6640_s1] sm:$0x3] }
 0x31d   :  { %v386_v23 = vsel %vm385_vm6, %v382_v21, -inf  ;;  %v599_v24 = vsel %vm598_vm7, %v382_v21, -inf  ;;  %vm1715_vm7 = vcmask 254976  }
 0x31e   :  { %v387_v25 = vrot.slane %v386_v23, 4  ;;  %v600_v26 = vrot.slane %v599_v24, 4 }
 0x320   :  { %v388_v27 = vmax.f32 %v386_v23, %v387_v25  ;;  %v601_v28 = vmax.f32 %v599_v24, %v600_v26  ;;  %v5218_v23 = vpack.c.bf16 %v897_v19, %v896_v18  ;;  %v969_v24 = vld [vmem:[%s6641_s2 + $0x178] sm:$0xf] }
 0x321   :  { %973 = vst.msk [vmem:[#allocation2 + $0x6] sm:$0xf] %vm596_vm9, %v969_v24  ;;  %977 = vst.msk [vmem:[#allocation2 + $0x10] sm:$0xf] %vm596_vm9, %v969_v24 }
 0x322   :  { %v389_v29 = vrot.slane %v388_v27, 2  ;;  %v602_v30 = vrot.slane %v601_v28, 2 }
 0x324   :  { %v390_v31 = vmax.f32 %v388_v27, %v389_v29  ;;  %v603_v32 = vmax.f32 %v601_v28, %v602_v30  ;;  %v4434_v28 = vld [vmem:[%s6641_s2 + $0x158] ss:$0 sm:$0xff] }
 0x326   :  { %v391_v33 = vrot.slane %v390_v31, 1  ;;  %v604_v34 = vrot.slane %v603_v32, 1 }
 0x328   :  { %v392_v35 = vmax.f32 %v390_v31, %v391_v33  ;;  %v605_v36 = vmax.f32 %v603_v32, %v604_v34  ;;  %v898_v31 = vld [vmem:[%s6641_s2 + $0x170] sm:$0x1] }
 0x32a   :  { %v393_v37 = vsub.f32 %v382_v21, %v392_v35  ;;  %v606_v38 = vsub.f32 %v382_v21, %v605_v36  ;;  %v982_v35 = vld [vmem:[%s6641_s2 + $0x190] sm:$0xff]  ;;  %v981_v36 = vld [vmem:[%s6641_s2 + $0x188] sm:$0xff] }
 0x32c   :  { %v394_v39 = vmul.f32 1.442695, %v393_v37  ;;  %v607_v40 = vmul.f32 1.442695, %v606_v38 }
 0x32e   :  { %5535 = vpow2.f32 %v394_v39 }
 0x32f   :  { %5537 = vpow2.f32 %v607_v40 }
 0x338   :  { %v5536_v41 = vpop.eup %5535 }
 0x339   :  { %v5538_v42 = vpop.eup %5537  ;;  %v396_v43 = vsel %vm385_vm6, %v5536_v41, 0.0 }
 0x33a   :  { %v397_v44 = vrot.slane %v396_v43, 4  ;;  %v610_v45 = vrot.slane %v5538_v42, 4 }
 0x33c   :  { %v398_v46 = vadd.f32 %v397_v44, %v396_v43  ;;  %v612_v47 = vsel %vm385_vm6, %v610_v45, 0.0 }
 0x33d   :  { %v613_v48 = vrot.slane %v612_v47, 4 }
 0x33e   :  { %v399_v49 = vrot.slane %v398_v46, 2 }
 0x33f   :  { %v614_v50 = vadd.f32 %v613_v48, %v612_v47 }
 0x340   :  { %v400_v51 = vadd.f32 %v399_v49, %v398_v46 }
 0x341   :  { %v615_v52 = vrot.slane %v614_v50, 2 }
 0x342   :  { %v401_v53 = vrot.slane %v400_v51, 1 }
 0x343   :  { %v616_v54 = vadd.f32 %v615_v52, %v614_v50  ;;  %v980_v50 = vld [vmem:[#allocation2 + $0x10] sm:$0xf] }
 0x344   :  { %v402_v55 = vadd.f32 %v401_v53, %v400_v51  ;;  %v983_v51 = vld [vmem:[%s6641_s2 + $0x198] sm:$0xf] }
 0x345   :  { %v617_v56 = vrot.slane %v616_v54, 1 }
 0x346   :  { %5539 = vrcp.f32 %v402_v55 }
 0x347   :  { %v618_v57 = vadd.f32 %v617_v56, %v616_v54  ;;  %v5951_v54 = vadd.f32 %v983_v51, %v980_v50 }
 0x349   :  { %5541 = vrcp.f32 %v618_v57  ;;  %v993_v56 = vsel %vm596_vm9, %v5951_v54, 0.0  ;;  %v1043_v57 = vld [vmem:[%s6641_s2 + $0x1b0] sm:$0xff] }
 0x350   :  { %v5540_v58 = vpop.eup %5539 }
 0x351   :  { %v404_v59 = vmul.f32 %v5540_v58, %v5536_v41  ;;  %v1044_v58 = vld [vmem:[%s6641_s2 + $0x1b8] sm:$0xff] }
 0x353   :  { %v5542_v60 = vpop.eup %5541  ;;  %405 = vxpose.xlu0.b32.start.end [1/1] (short) (narrow) %v404_v59, 8  ;;  %v5221_v59 = vpack.c.bf16 %v1044_v58, %v1043_v57 }
 0x354   :  { %v620_v61 = vmul.f32 %v5542_v60, %v5538_v42  ;;  %v1045_v60 = vld [vmem:[%s6641_s2 + $0x1c0] sm:$0xff] }
 0x355   :  { %5222 = vmatpush3.bf16.msra.mxu0 %v5221_v59 }
 0x356   :  { %v622_v62 = vrot.slane %v620_v61, 4  ;;  %v1046_v61 = vld [vmem:[%s6641_s2 + $0x1c8] sm:$0xff]  ;;  %5223 = vmatprep.subr.bf16.mxu0 %v5673_v3 }
 0x358   :  { %624 = vxpose.xlu1.b32.start.end [1/1] (short) (narrow) %v622_v62, 8  ;;  %v5224_v62 = vpack.c.bf16 %v1046_v61, %v1045_v60 }
 0x35a   :  { %5225 = vmatpush3.bf16.msra.mxu0 %v5224_v62 }
 0x3d3   :  { %v421_v5 = vpop.trf.xlu0 }
 0x3d4   :  { %4776 = vmatmul.mubr.msk.f32.vlgmr.msra.gmra.mrb[4].mxu1 %vm437_vm8, %v421_v5 }
 0x3d5   :  { %5207 = vmatpush3.bf16.msra.mxu1 %v5206_v1  ;;  %4786 = vmatprep.mubr.msk.f32.mxu1 %vm5674_vm0, %v5675_v8 }
 0x3d6   :  { %5208 = vmatprep.subr.bf16.mxu1 %v5673_v3 }
 0x3d8   :  { %v640_v12 = vpop.trf.xlu1 }
 0x3d9   :  { %5210 = vmatpush3.bf16.msra.mxu1 %v5209_v6 }
 0x3da   :  { %4789 = vmatprep.subr.mxu1 %v5675_v8 }
 0x4a7   :  { %v510_v9 = vpop.f32.mrb[4].mxu1 }
 0x4a8   :  { %v4777_v10 = vpop.f32.mrb[5].mxu1  ;;  %4787 = vmatmul.mubr.msk.f32.vlgmr.msra.gmra.mrb[6].mxu1 %vm311_vm4, %v510_v9 }
 0x4a9   :  { %4790 = vmatpush3.msk.msra.mxu1 %vm441_vm5, %v656_v7  ;;  %4791 = vmatprep.mubr.msk.f32.mxu1 %vm5674_vm0, %v5675_v8  ;;  %vm5682_vm5 = vmmov 1  }
 0x4aa   :  { %5211 = vmatprep.subr.bf16.mxu1 %v5673_v3  ;;  %vm6054_vm6 = vmpackc.low %vm1271_vm3, %vm5682_vm5 }
 0x4ac   :  { %4792 = vmatmul.mubr.msk.f32.vlgmr.msra.gmra.mrb[8].mxu1 %vm437_vm8, %v640_v12 }
 0x4ad   :  { %5213 = vmatpush3.bf16.msra.mxu1 %v5206_v1  ;;  %4802 = vmatprep.mubr.msk.f32.mxu1 %vm5674_vm0, %v5675_v8 }
 0x4ae   :  { %5214 = vmatprep.subr.bf16.mxu1 %v5673_v3 }
 0x4b1   :  { %5216 = vmatpush3.bf16.msra.mxu1 %v5209_v6 }
 0x4b2   :  { %4805 = vmatprep.subr.mxu1 %v5675_v8 }
 0x57b   :  { %v592_v14 = vpop.f32.mrb[6].mxu1 }
 0x57c   :  { %v593_v15 = vadd.f32 %v4428_v13, %v592_v14  ;;  %v4788_v16 = vpop.f32.mrb[7].mxu1  ;;  %v4437_v14 = vld [vmem:[%s6641_s2 + $0x1a0] ss:$0 sm:$0xff] }
 0x57d   :  { %v4438_v16 = vld [vmem:[%s6641_s2 + $0x1a8] ss:$0 sm:$0xff] }
 0x57e   :  { %597 = vst.msk [vmem:[#allocation2] sm:$0xf] %vm596_vm9, %v593_v15 }
 0x57f   :  { %v728_v20 = vpop.f32.mrb[8].mxu1 }
 0x580   :  { %v4793_v21 = vpop.f32.mrb[9].mxu1  ;;  %4803 = vmatmul.mubr.msk.f32.vlgmr.msra.gmra.mrb[10].mxu1 %vm311_vm4, %v728_v20 }
 0x581   :  { %4806 = vmatpush3.msra.mxu1 %v816_v17  ;;  %4807 = vmatprep.mubr.msk.f32.mxu1 %vm5674_vm0, %v5675_v8 }
 0x582   :  { %5217 = vmatprep.subr.bf16.mxu1 %v5673_v3 }
 0x584   :  { %4808 = vmatmul.mubr.msk.f32.vlgmr.msra.gmra.mrb[12].mxu1 %vm822_vm10, %v815_v22 }
 0x585   :  { %5219 = vmatpush3.bf16.msra.mxu1 %v5218_v23  ;;  %4814 = vmatprep.mubr.msk.f32.mxu1 %vm5674_vm0, %v5675_v8 }
 0x588   :  { %4815 = vmatmul.mubr.msk.f32.vlgmr.msra.gmra.mrb[14].mxu1 %vm124_vm1, %v5730_v11 }
 0x653   :  { %v810_v25 = vpop.f32.mrb[10].mxu1 }
 0x654   :  { %v811_v26 = vadd.f32 %v4428_v13, %v810_v25  ;;  %v4804_v27 = vpop.f32.mrb[11].mxu1 }
 0x656   :  { %814 = vst.msk [vmem:[#allocation2 + $0xa] sm:$0xf] %vm596_vm9, %v811_v26 }
 0x657   :  { %v892_v29 = vpop.f32.mrb[12].mxu1 }
 0x658   :  { %v893_v11 = vadd.f32 %v4434_v28, %v892_v29  ;;  %v4809_v30 = vpop.f32.mrb[13].mxu1 }
 0x65a   :  { %971 = vst.msk [vmem:[#allocation2 + $0x4] sm:$0x1] %vm970_vm11, %v893_v11 }
 0x65b   :  { %975 = vst.msk [vmem:[#allocation2 + $0xd] sm:$0x2] %vm974_vm12, %v893_v11  ;;  %v965_v32 = vpop.f32.mrb[14].mxu1  ;;  %v4439_v11 = vld [vmem:[%s6641_s2 + $0x1d0] ss:$0 sm:$0xff] }
 0x65c   :  { %v966_v33 = vadd.f32 %v965_v32, %v898_v31  ;;  %v4816_v34 = vpop.f32.mrb[15].mxu1 }
 0x65e   :  { %972 = vst.msk [vmem:[#allocation2 + $0x5] sm:$0x1] %vm970_vm11, %v966_v33  ;;  %976 = vst.msk [vmem:[#allocation2 + $0xf] sm:$0x1] %vm970_vm11, %v966_v33 }
 0x665   :  { %v979_v37 = vld [vmem:[#allocation2 + $0x8] sm:$0xff]  ;;  %v978_v38 = vld [vmem:[#allocation2] sm:$0xff] }
 0x666   :  { %v5937_v39 = vadd.f32 %v982_v35, %v979_v37  ;;  %v5939_v40 = vadd.f32 %v981_v36, %v978_v38 }
 0x668   :  { %v990_v41 = vsel %vm311_vm4, %v5937_v39, 0.0  ;;  %v987_v42 = vsel %vm311_vm4, %v5939_v40, 0.0 }
 0x669   :  { %991 = vadd.xlane.f32.xlu0 %v990_v41  ;;  %988 = vadd.xlane.f32.xlu1 %v987_v42 }
 0x6f6   :  { %v992_v43 = vpop.xlane.xlu0 %991  ;;  %v989_v44 = vpop.xlane.xlu1 %988 }
 0x6f7   :  { %v998_v45 = vmul.f32 0.03125, %v992_v43  ;;  %v997_v46 = vmul.f32 0.03125, %v989_v44 }
 0x6f9   :  { %v1001_v47 = vsub.f32 %v5937_v39, %v998_v45  ;;  %v1000_v48 = vsub.f32 %v5939_v40, %v997_v46 }
 0x6fb   :  { %v1003_v49 = vmul.f32 %v1000_v48, %v1000_v48  ;;  %v1004_v53 = vmul.f32 %v1001_v47, %v1001_v47 }
 0x6fd   :  { %v1006_v52 = vsel %vm311_vm4, %v1003_v49, 0.0  ;;  %v1009_v55 = vsel %vm311_vm4, %v1004_v53, 0.0 }
 0x6fe   :  { %1007 = vadd.xlane.f32.xlu1 %v1006_v52 }
 0x702   :  { %1010 = vadd.xlane.f32.xlu1 %v1009_v55 }
 0x706   :  { %994 = vadd.xlane.f32.xlu1 %v993_v56 }
 0x78b   :  { %v1008_v63 = vpop.xlane.xlu1 %1007 }
 0x78c   :  { %v1015_v0 = vmul.f32 0.03125, %v1008_v63 }
 0x78e   :  { %v1018_v1 = vadd.f32 1e-05, %v1015_v0 }
 0x78f   :  { %v1011_v2 = vpop.xlane.xlu1 %1010 }
 0x790   :  { %5543 = vrsqrt.f32 %v1018_v1  ;;  %v1016_v4 = vmul.f32 0.03125, %v1011_v2 }
 0x792   :  { %v1019_v5 = vadd.f32 1e-05, %v1016_v4 }
 0x793   :  { %v995_v6 = vpop.xlane.xlu1 %994 }
 0x794   :  { %5545 = vrsqrt.f32 %v1019_v5  ;;  %v999_v7 = vmul.f32 0.03125, %v995_v6 }
 0x796   :  { %v1002_v9 = vsub.f32 %v5951_v54, %v999_v7 }
 0x798   :  { %v1005_v10 = vmul.f32 %v1002_v9, %v1002_v9 }
 0x79a   :  { %v5544_v12 = vpop.eup %5543  ;;  %v1012_v13 = vsel %vm596_vm9, %v1005_v10, 0.0 }
 0x79b   :  { %v1024_v15 = vmul.f32 %v5544_v12, %v1000_v48  ;;  %1013 = vadd.xlane.f32.xlu1 %v1012_v13 }
 0x79d   :  { %v1032_v17 = vmul.f32 %v4437_v14, %v1024_v15 }
 0x79e   :  { %v5546_v18 = vpop.eup %5545 }
 0x79f   :  { %v1040_v19 = vadd.f32 %v4438_v16, %v1032_v17  ;;  %v1025_v20 = vmul.f32 %v5546_v18, %v1001_v47 }
 0x7a1   :  { %4826 = vmatmul.mubr.msk.f32.vlgmr.msra.gmra.mrb[4].mxu0 %vm311_vm4, %v1040_v19  ;;  %v1033_v21 = vmul.f32 %v4437_v14, %v1025_v20 }
 0x7a2   :  { %4828 = vmatprep.mubr.msk.f32.mxu0 %vm5674_vm0, %v5675_v8 }
 0x7a3   :  { %v1041_v22 = vadd.f32 %v4438_v16, %v1033_v21 }
 0x7a5   :  { %4829 = vmatmul.mubr.msk.f32.gmra.mrb[6].mxu0 %vm311_vm4, %v1041_v22 }
 0x7a6   :  { %4831 = vmatprep.mubr.msk.f32.mxu0 %vm5674_vm0, %v5675_v8 }
 0x828   :  { %v1014_v23 = vpop.xlane.xlu1 %1013 }
 0x829   :  { %v1017_v24 = vmul.f32 0.03125, %v1014_v23 }
 0x82b   :  { %v1020_v25 = vadd.f32 1e-05, %v1017_v24 }
 0x82d   :  { %5547 = vrsqrt.f32 %v1020_v25 }
 0x837   :  { %v5548_v26 = vpop.eup %5547 }
 0x838   :  { %v1026_v27 = vmul.f32 %v5548_v26, %v1002_v9 }
 0x83a   :  { %v1034_v28 = vmul.f32 %v4437_v14, %v1026_v27 }
 0x83c   :  { %v1042_v29 = vadd.f32 %v4438_v16, %v1034_v28 }
 0x83e   :  { %4832 = vmatmul.mubr.msk.f32.gmra.mrb[8].mxu0 %vm311_vm4, %v1042_v29 }
 0x874   :  { %v1127_v30 = vpop.f32.mrb[4].mxu0 }
 0x875   :  { %v1128_v31 = vadd.f32 %v4439_v11, %v1127_v30  ;;  %v4827_v32 = vpop.f32.mrb[5].mxu0 }
 0x877   :  { %1349 = vrot.lane.b32.xlu0 %v1128_v31, %s5677_s25  ;;  %4838 = vmatprep.mubr.msk.f32.mxu1 %vm124_vm1, %v1128_v31 }
 0x878   :  { %v1132_v33 = vpop.f32.mrb[6].mxu0 }
 0x879   :  { %v1133_v34 = vadd.f32 %v4439_v11, %v1132_v33  ;;  %v4830_v35 = vpop.f32.mrb[7].mxu0 }
 0x87b   :  { %v5989_v36 = vpack.i.bf16 %v1133_v34, %v1128_v31  ;;  %v1719_v55 = vrot.slane %v1133_v34, 2 }
 0x87d   :  { %5452 = vrot.lane.b32.xlu1 %v5989_v36, %s5678_s26 }
 0x881   :  { %5457 = vrot.lane.b32.xlu1 %v5989_v36, %s5679_s27 }
 0x885   :  { %1351 = vrot.lane.b32.xlu1 %v1133_v34, %s5677_s25 }
 0x8e9   :  { %v1350_v37 = vpop.permute.xlu0 %1349 }
 0x8ea   :  { %4852 = vmatprep.mubr.msk.f32.mxu0 %vm124_vm1, %v1350_v37 }
 0x8ef   :  { %v5453_v38 = vpop.permute.xlu1 %5452 }
 0x8f0   :  { %v5455_v41 = vunpack.i.h.bf16 %v5453_v38  ;;  %v5454_v42 = vunpack.i.l.bf16 %v5453_v38 }
 0x8f2   :  { %v5226_v44 = vpack.c.bf16 %v5455_v41, %v5454_v42 }
 0x8f3   :  { %v5458_v45 = vpop.permute.xlu1 %5457 }
 0x8f4   :  { %v5460_v46 = vunpack.i.h.bf16 %v5458_v45  ;;  %v5459_v47 = vunpack.i.l.bf16 %v5458_v45  ;;  %5228 = vmatprep.subr.msk.bf16.mxu1 %vm5999_vm13, %v5226_v44 }
 0x8f5   :  { %5231 = vmatpush3.bf16.xpose.msk.msra.mxu1 %vm5999_vm13, %v5226_v44 }
 0x8f6   :  { %v5238_v48 = vpack.c.bf16 %v5460_v46, %v5459_v47 }
 0x8f7   :  { %v1352_v49 = vpop.permute.xlu1 %1351 }
 0x8f8   :  { %5240 = vmatprep.subr.msk.bf16.mxu0 %vm5999_vm13, %v5238_v48 }
 0x8f9   :  { %5243 = vmatpush3.bf16.xpose.msk.msra.mxu0 %vm5999_vm13, %v5238_v48 }
 0x8fc   :  { %4839 = vmatmul.mubr.msk.f32.vlgmr.msra.gmra.mrb[16].mxu1 %vm124_vm1, %v1133_v34 }
 0x900   :  { %4853 = vmatmul.mubr.msk.f32.vlgmr.msra.gmra.mrb[10].mxu0 %vm124_vm1, %v1352_v49 }
 0x911   :  { %v1137_v50 = vpop.f32.mrb[8].mxu0 }
 0x912   :  { %v1138_v51 = vadd.f32 %v4439_v11, %v1137_v50  ;;  %v4833_v52 = vpop.f32.mrb[9].mxu0 }
 0x914   :  { %v1720_v53 = vrot.slane %v1138_v51, 2 }
 0x916   :  { %v1721_v56 = vsel %vm1718_vm14, %v1719_v55, %v1720_v53 }
 0x917   :  { %4880 = vmatprep.mubr.msk.f32.mxu0 %vm124_vm1, %v1721_v56  ;;  %v6015_v57 = vpack.i.bf16 %v1720_v53, %v1721_v56 }
 0x919   :  { %5462 = vrot.lane.b32.xlu1 %v6015_v57, %s5678_s26 }
 0x91d   :  { %5467 = vrot.lane.b32.xlu1 %v6015_v57, %s5679_s27 }
 0x921   :  { %1921 = vrot.lane.b32.xlu1 %v1721_v56, %s5677_s25 }
 0x925   :  { %1923 = vrot.lane.b32.xlu1 %v1720_v53, %s5677_s25 }
 0x98b   :  { %v5463_v58 = vpop.permute.xlu1 %5462 }
 0x98c   :  { %v5465_v59 = vunpack.i.h.bf16 %v5463_v58  ;;  %v5464_v60 = vunpack.i.l.bf16 %v5463_v58 }
 0x98e   :  { %v5258_v61 = vpack.c.bf16 %v5465_v59, %v5464_v60 }
 0x98f   :  { %v5468_v62 = vpop.permute.xlu1 %5467 }
 0x990   :  { %v5470_v63 = vunpack.i.h.bf16 %v5468_v62  ;;  %v5469_v0 = vunpack.i.l.bf16 %v5468_v62  ;;  %5260 = vmatprep.subr.msk.bf16.mxu0 %vm5999_vm13, %v5258_v61 }
 0x991   :  { %5263 = vmatpush3.bf16.xpose.msk.msra.mxu0 %vm5999_vm13, %v5258_v61 }
 0x992   :  { %v5270_v1 = vpack.c.bf16 %v5470_v63, %v5469_v0 }
 0x993   :  { %v1922_v2 = vpop.permute.xlu1 %1921 }
 0x994   :  { %5272 = vmatprep.subr.msk.bf16.mxu0 %vm5999_vm13, %v5270_v1 }
 0x997   :  { %v1924_v4 = vpop.permute.xlu1 %1923 }
 0x998   :  { %4881 = vmatmul.mubr.msk.f32.vlgmr.msra.gmra.mrb[12].mxu0 %vm124_vm1, %v1720_v53 }
 0x999   :  { %5275 = vmatpush3.bf16.xpose.msk.msra.mxu0 %vm5999_vm13, %v5270_v1  ;;  %4894 = vmatprep.mubr.msk.f32.mxu0 %vm124_vm1, %v1922_v2 }
 0x99a   :  { %5290 = vmatprep.subr.bf16.mxu0 %v5673_v3 }
 0x9a0   :  { %4895 = vmatmul.mubr.msk.f32.vlgmr.msra.gmra.mrb[14].mxu0 %vm124_vm1, %v1924_v4 }
 0x9a1   :  { %4926 = vmatprep.mubr.msk.f32.mxu0 %vm5674_vm0, %v5675_v8 }
 0x9cf   :  { %v4840_v5 = vpop.f32.mrb[16].mxu1 }
 0x9d0   :  { %v1235_v6 = vmul.f32 0.25, %v4840_v5  ;;  %v1225_v7 = vpop.f32.mrb[17].mxu1 }
 0x9d1   :  { %v1234_v9 = vmul.f32 0.25, %v1225_v7 }
 0x9d2   :  { %v1241_v10 = vsel %vm1240_vm15, %v1235_v6, -inf }
 0x9d3   :  { %v4854_v12 = vpop.f32.mrb[10].mxu0  ;;  %1242 = vmax.xlane.f32.xlu0 %v1241_v10  ;;  %v1237_v13 = vsel %vm1236_vm2, %v1234_v9, -inf }
 0x9d4   :  { %v1431_v14 = vpop.f32.mrb[11].mxu0  ;;  %1238 = vmax.xlane.f32.xlu1 %v1237_v13  ;;  %v1441_v16 = vmul.f32 0.25, %v4854_v12 }
 0x9d5   :  { %v1440_v15 = vmul.f32 0.25, %v1431_v14 }
 0x9d6   :  { %v1445_v18 = vsel %vm1240_vm15, %v1441_v16, -inf }
 0x9d7   :  { %v1442_v17 = vsel %vm1236_vm2, %v1440_v15, -inf }
 0x9d8   :  { %1443 = vmax.xlane.f32.xlu0 %v1442_v17 }
 0x9dc   :  { %1446 = vmax.xlane.f32.xlu0 %v1445_v18 }
 0xa60   :  { %v1243_v19 = vpop.xlane.xlu0 %1242 }
 0xa61   :  { %v1245_v20 = vsub.f32 %v1235_v6, %v1243_v19  ;;  %v1239_v21 = vpop.xlane.xlu1 %1238 }
 0xa62   :  { %v1244_v22 = vsub.f32 %v1234_v9, %v1239_v21 }
 0xa63   :  { %v1248_v23 = vmul.f32 1.442695, %v1245_v20 }
 0xa64   :  { %v1246_v24 = vmul.f32 1.442695, %v1244_v22 }
 0xa65   :  { %5549 = vpow2.f32 %v1248_v23  ;;  %v1444_v25 = vpop.xlane.xlu0 %1443 }
 0xa66   :  { %5551 = vpow2.f32 %v1246_v24  ;;  %v1448_v26 = vsub.f32 %v1440_v15, %v1444_v25 }
 0xa68   :  { %v1450_v27 = vmul.f32 1.442695, %v1448_v26 }
 0xa69   :  { %v1447_v28 = vpop.xlane.xlu0 %1446 }
 0xa6a   :  { %5553 = vpow2.f32 %v1450_v27  ;;  %v1449_v29 = vsub.f32 %v1441_v16, %v1447_v28 }
 0xa6b   :  { %v4882_v11 = vpop.f32.mrb[12].mxu0 }
 0xa6c   :  { %v1452_v30 = vmul.f32 1.442695, %v1449_v29  ;;  %v1800_v31 = vpop.f32.mrb[13].mxu0  ;;  %v1810_v47 = vmul.f32 0.25, %v4882_v11 }
 0xa6d   :  { %v1809_v46 = vmul.f32 0.25, %v1800_v31 }
 0xa6e   :  { %5555 = vpow2.f32 %v1452_v30  ;;  %v1814_v51 = vsel %vm1240_vm15, %v1810_v47, -inf }
 0xa6f   :  { %v5550_v32 = vpop.eup %5549  ;;  %v1811_v49 = vsel %vm1236_vm2, %v1809_v46, -inf }
 0xa70   :  { %v5552_v33 = vpop.eup %5551  ;;  %v1253_v34 = vsel %vm1240_vm15, %v5550_v32, 0.0 }
 0xa71   :  { %1254 = vadd.xlane.f32.xlu0 %v1253_v34  ;;  %v1250_v35 = vsel %vm1236_vm2, %v5552_v33, 0.0  ;;  %v1143_v34 = vld [vmem:[%s6641_s2 + $0x1e8] sm:$0xff] }
 0xa72   :  { %1251 = vadd.xlane.f32.xlu1 %v1250_v35  ;;  %v1144_v35 = vld [vmem:[%s6641_s2 + $0x1f0] sm:$0xff] }
 0xa73   :  { %v4896_v37 = vpop.f32.mrb[14].mxu0 }
 0xa74   :  { %v5554_v38 = vpop.eup %5553  ;;  %v2003_v41 = vpop.f32.mrb[15].mxu0  ;;  %v2013_v50 = vmul.f32 0.25, %v4896_v37  ;;  %v5250_v37 = vpack.c.bf16 %v1144_v35, %v1143_v34 }
 0xa75   :  { %v1454_v42 = vsel %vm1236_vm2, %v5554_v38, 0.0  ;;  %v2012_v48 = vmul.f32 0.25, %v2003_v41  ;;  %v1142_v41 = vld [vmem:[%s6641_s2 + $0x1e0] sm:$0xff] }
 0xa76   :  { %1455 = vadd.xlane.f32.xlu1 %v1454_v42  ;;  %v2017_v53 = vsel %vm1240_vm15, %v2013_v50, -inf }
 0xa77   :  { %v2014_v52 = vsel %vm1236_vm2, %v2012_v48, -inf }
 0xa78   :  { %v5556_v44 = vpop.eup %5555 }
 0xa79   :  { %v1457_v45 = vsel %vm1240_vm15, %v5556_v44, 0.0 }
 0xa7a   :  { %1458 = vadd.xlane.f32.xlu0 %v1457_v45 }
 0xa87   :  { %5472 = vrot.lane.b32.xlu1 %v5989_v36, %s5680_s28 }
 0xa90   :  { %5477 = vrot.lane.b32.xlu0 %v5989_v36, %s5681_s29 }
 0xaab   :  { %1812 = vmax.xlane.f32.xlu1 %v1811_v49 }
 0xaaf   :  { %1815 = vmax.xlane.f32.xlu0 %v1814_v51  ;;  %2015 = vmax.xlane.f32.xlu1 %v2014_v52 }
 0xab3   :  { %2018 = vmax.xlane.f32.xlu0 %v2017_v53 }
 0xafe   :  { %v1255_v55 = vpop.xlane.xlu0 %1254 }
 0xaff   :  { %v1252_v56 = vpop.xlane.xlu1 %1251 }
 0xb00   :  { %5557 = vrcp.f32 %v1252_v56 }
 0xb01   :  { %5559 = vrcp.f32 %v1255_v55 }
 0xb03   :  { %v1456_v36 = vpop.xlane.xlu1 %1455 }
 0xb04   :  { %5561 = vrcp.f32 %v1456_v36 }
 0xb07   :  { %v1459_v58 = vpop.xlane.xlu0 %1458  ;;  %v5473_v59 = vpop.permute.xlu1 %5472 }
 0xb08   :  { %5563 = vrcp.f32 %v1459_v58  ;;  %v5475_v60 = vunpack.i.h.bf16 %v5473_v59  ;;  %v5474_v61 = vunpack.i.l.bf16 %v5473_v59 }
 0xb0a   :  { %v5558_v63 = vpop.eup %5557  ;;  %v5232_v0 = vpack.c.bf16 %v5475_v60, %v5474_v61 }
 0xb0b   :  { %v5560_v1 = vpop.eup %5559  ;;  %v5478_v2 = vpop.permute.xlu0 %5477  ;;  %v1258_v4 = vmul.f32 %v5558_v63, %v5552_v33 }
 0xb0c   :  { %v5480_v5 = vunpack.i.h.bf16 %v5478_v2  ;;  %v5479_v6 = vunpack.i.l.bf16 %v5478_v2  ;;  %5234 = vmatprep.subr.msk.bf16.mxu1 %vm6054_vm6, %v5232_v0  ;;  %v1259_v9 = vmul.f32 %v5560_v1, %v5550_v32 }
 0xb0d   :  { %5237 = vmatpush3.bf16.msk.msra.mxu1 %vm6054_vm6, %v5232_v0  ;;  %4845 = vmatprep.mubr.msk.f32.mxu1 %vm1236_vm2, %v1258_v4 }
 0xb0e   :  { %v5562_v7 = vpop.eup %5561  ;;  %v5244_v10 = vpack.c.bf16 %v5480_v5, %v5479_v6 }
 0xb0f   :  { %v1462_v12 = vmul.f32 %v5562_v7, %v5554_v38  ;;  %v1141_v38 = vld [vmem:[%s6641_s2 + $0x1d8] sm:$0xff] }
 0xb10   :  { %4846 = vmatmul.mubr.msk.f32.vlgmr.msra.gmra.mrb[18].mxu1 %vm1236_vm2, %v1259_v9  ;;  %5246 = vmatprep.subr.msk.bf16.mxu1 %vm6054_vm6, %v5244_v10  ;;  %v5254_v42 = vpack.c.bf16 %v1142_v41, %v1141_v38 }
 0xb11   :  { %5249 = vmatpush3.bf16.msk.msra.mxu1 %vm6054_vm6, %v5244_v10  ;;  %4859 = vmatprep.mubr.msk.f32.mxu1 %vm1236_vm2, %v1462_v12 }
 0xb12   :  { %v5564_v13 = vpop.eup %5563  ;;  %5251 = vmatprep.subr.bf16.mxu1 %v5250_v37 }
 0xb13   :  { %v1463_v14 = vmul.f32 %v5564_v13, %v5556_v44 }
 0xb15   :  { %4860 = vmatmul.mubr.msk.f32.vlgmr.msra.gmra.mrb[20].mxu1 %vm1236_vm2, %v1463_v14 }
 0xb16   :  { %5253 = vmatpush3.bf16.msra.mxu1 %v5250_v37 }
 0xb17   :  { %5255 = vmatprep.subr.bf16.mxu1 %v5254_v42 }
 0xb38   :  { %v1813_v15 = vpop.xlane.xlu1 %1812 }
 0xb39   :  { %v1817_v16 = vsub.f32 %v1809_v46, %v1813_v15  ;;  %v4479_v15 = vld [vmem:[%s6641_s2 + $0x1f8] ss:$0 sm:$0xff] }
 0xb3b   :  { %v1819_v17 = vmul.f32 1.442695, %v1817_v16 }
 0xb3c   :  { %v1816_v18 = vpop.xlane.xlu0 %1815  ;;  %v2016_v19 = vpop.xlane.xlu1 %2015 }
 0xb3d   :  { %5565 = vpow2.f32 %v1819_v17  ;;  %v1818_v20 = vsub.f32 %v1810_v47, %v1816_v18  ;;  %v2020_v21 = vsub.f32 %v2012_v48, %v2016_v19 }
 0xb3f   :  { %v1821_v22 = vmul.f32 1.442695, %v1818_v20  ;;  %v2022_v23 = vmul.f32 1.442695, %v2020_v21 }
 0xb40   :  { %v2019_v24 = vpop.xlane.xlu0 %2018 }
 0xb41   :  { %5567 = vpow2.f32 %v1821_v22  ;;  %v2021_v25 = vsub.f32 %v2013_v50, %v2019_v24  ;;  %v2358_v24 = vld [vmem:[%s6641_s2 + $0x218] sm:$0xff] }
 0xb42   :  { %5569 = vpow2.f32 %v2022_v23  ;;  %v2357_v23 = vld [vmem:[%s6641_s2 + $0x210] sm:$0xff] }
 0xb43   :  { %v2024_v26 = vmul.f32 1.442695, %v2021_v25  ;;  %v5291_v25 = vpack.c.bf16 %v2358_v24, %v2357_v23 }
 0xb45   :  { %5571 = vpow2.f32 %v2024_v26  ;;  %5292 = vmatpush3.bf16.msra.mxu0 %v5291_v25  ;;  %v2359_v26 = vld [vmem:[%s6641_s2 + $0x220] sm:$0xff]  ;;  %v4482_v25 = vld [vmem:[%s6641_s2 + $0x230] ss:$0 sm:$0xff] }
 0xb46   :  { %5293 = vmatprep.subr.bf16.mxu0 %v5673_v3 }
 0xb47   :  { %v5566_v27 = vpop.eup %5565 }
 0xb48   :  { %v1823_v28 = vsel %vm1236_vm2, %v5566_v27, 0.0 }
 0xb49   :  { %1824 = vadd.xlane.f32.xlu1 %v1823_v28 }
 0xb4b   :  { %v5568_v29 = vpop.eup %5567 }
 0xb4c   :  { %v5570_v11 = vpop.eup %5569  ;;  %v1826_v30 = vsel %vm1240_vm15, %v5568_v29, 0.0 }
 0xb4d   :  { %1827 = vadd.xlane.f32.xlu0 %v1826_v30  ;;  %v2026_v31 = vsel %vm1236_vm2, %v5570_v11, 0.0 }
 0xb4e   :  { %2027 = vadd.xlane.f32.xlu1 %v2026_v31 }
 0xb4f   :  { %v5572_v32 = vpop.eup %5571 }
 0xb50   :  { %v2029_v33 = vsel %vm1240_vm15, %v5572_v32, 0.0 }
 0xb51   :  { %2030 = vadd.xlane.f32.xlu0 %v2029_v33 }
 0xb5f   :  { %5482 = vrot.lane.b32.xlu1 %v6015_v57, %s5680_s28 }
 0xb67   :  { %5487 = vrot.lane.b32.xlu0 %v6015_v57, %s5681_s29 }
 0xbd6   :  { %v1825_v44 = vpop.xlane.xlu1 %1824 }
 0xbd7   :  { %5573 = vrcp.f32 %v1825_v44 }
 0xbda   :  { %v1828_v46 = vpop.xlane.xlu0 %1827 }
 0xbdb   :  { %v2028_v45 = vpop.xlane.xlu1 %2027  ;;  %5575 = vrcp.f32 %v1828_v46  ;;  %v6159_v46 = vld [vmem:[%s6641_s2 + $0x208] ss:$0 sm:$0xff] }
 0xbdc   :  { %5577 = vrcp.f32 %v2028_v45 }
 0xbde   :  { %v2031_v57 = vpop.xlane.xlu0 %2030 }
 0xbdf   :  { %v5483_v48 = vpop.permute.xlu1 %5482  ;;  %5579 = vrcp.f32 %v2031_v57 }
 0xbe0   :  { %v5485_v50 = vunpack.i.h.bf16 %v5483_v48  ;;  %v5484_v51 = vunpack.i.l.bf16 %v5483_v48 }
 0xbe1   :  { %v5574_v36 = vpop.eup %5573 }
 0xbe2   :  { %v5264_v55 = vpack.c.bf16 %v5485_v50, %v5484_v51  ;;  %v5488_v56 = vpop.permute.xlu0 %5487  ;;  %v1831_v61 = vmul.f32 %v5574_v36, %v5566_v27  ;;  %v2360_v27 = vld [vmem:[%s6641_s2 + $0x228] sm:$0xff] }
 0xbe3   :  { %v4847_v47 = vpop.f32.mrb[18].mxu1  ;;  %v5490_v58 = vunpack.i.h.bf16 %v5488_v56  ;;  %v5489_v59 = vunpack.i.l.bf16 %v5488_v56  ;;  %v5294_v28 = vpack.c.bf16 %v2360_v27, %v2359_v26 }
 0xbe4   :  { %v1340_v49 = vpop.f32.mrb[19].mxu1 }
 0xbe5   :  { %v5576_v60 = vpop.eup %5575  ;;  %v5276_v0 = vpack.c.bf16 %v5490_v58, %v5489_v59  ;;  %5295 = vmatpush3.bf16.msra.mxu0 %v5294_v28  ;;  %v2482_v59 = vld [vmem:[%s6641_s2 + $0x238] sm:$0xff] }
 0xbe6   :  { %v5578_v63 = vpop.eup %5577  ;;  %v1832_v1 = vmul.f32 %v5576_v60, %v5568_v29  ;;  %5320 = vmatprep.subr.bf16.mxu0 %v5673_v3  ;;  %v2483_v60 = vld [vmem:[%s6641_s2 + $0x240] sm:$0xff] }
 0xbe7   :  { %v2034_v4 = vmul.f32 %v5578_v63, %v5570_v11  ;;  %v2484_v63 = vld [vmem:[%s6641_s2 + $0x248] sm:$0xff] }
 0xbe8   :  { %v4861_v52 = vpop.f32.mrb[20].mxu1 }
 0xbe9   :  { %v1543_v53 = vpop.f32.mrb[21].mxu1  ;;  %v5580_v2 = vpop.eup %5579 }
 0xbea   :  { %4866 = vmatprep.mubr.msk.f32.mxu1 %vm124_vm1, %v1543_v53  ;;  %v2035_v5 = vmul.f32 %v5580_v2, %v5572_v32  ;;  %v2486_v2 = vld [vmem:[%s6641_s2 + $0x258] sm:$0xff] }
 0xbeb   :  { %4867 = vmatmul.mubr.msk.f32.vlgmr.msra.gmra.mrb[22].mxu1 %vm124_vm1, %v4861_v52 }
 0xbec   :  { %5257 = vmatpush3.bf16.msra.mxu1 %v5254_v42  ;;  %4873 = vmatprep.mubr.msk.f32.mxu1 %vm124_vm1, %v1340_v49 }
 0xbed   :  { %5266 = vmatprep.subr.msk.bf16.mxu1 %vm6054_vm6, %v5264_v55 }
 0xbf3   :  { %4874 = vmatmul.mubr.msk.f32.vlgmr.msra.gmra.mrb[22].mxu1 %vm124_vm1, %v4847_v47 }
 0xbf4   :  { %5269 = vmatpush3.bf16.msk.msra.mxu1 %vm6054_vm6, %v5264_v55  ;;  %4887 = vmatprep.mubr.msk.f32.mxu1 %vm1236_vm2, %v1831_v61  ;;  %v5297_v61 = vpack.c.bf16 %v2483_v60, %v2482_v59 }
 0xbf5   :  { %5278 = vmatprep.subr.msk.bf16.mxu1 %vm6054_vm6, %v5276_v0 }
 0xbf7   :  { %4888 = vmatmul.mubr.msk.f32.vlgmr.msra.gmra.mrb[24].mxu1 %vm1236_vm2, %v1832_v1 }
 0xbf8   :  { %5281 = vmatpush3.bf16.msk.msra.mxu1 %vm6054_vm6, %v5276_v0  ;;  %4901 = vmatprep.mubr.msk.f32.mxu1 %vm1236_vm2, %v2034_v4  ;;  %v2485_v0 = vld [vmem:[%s6641_s2 + $0x250] sm:$0xff]  ;;  %v2487_v4 = vld [vmem:[%s6641_s2 + $0x260] sm:$0xff] }
 0xbf9   :  { %5283 = vmatprep.subr.bf16.mxu1 %v5250_v37  ;;  %v5300_v1 = vpack.c.bf16 %v2485_v0, %v2484_v63 }
 0xbfb   :  { %4902 = vmatmul.mubr.msk.f32.vlgmr.msra.gmra.mrb[26].mxu1 %vm1236_vm2, %v2035_v5  ;;  %v5303_v5 = vpack.c.bf16 %v2487_v4, %v2486_v2  ;;  %v4486_v2 = vld [vmem:[%s6641_s2 + $0x2b8] ss:$0 sm:$0xff] }
 0xbfc   :  { %5285 = vmatpush3.bf16.msra.mxu1 %v5250_v37 }
 0xbfd   :  { %5287 = vmatprep.subr.bf16.mxu1 %v5254_v42 }
 0xcc6   :  { %v4875_v6 = vpop.f32.mrb[22].mxu1 }
 0xcc7   :  { %1716 = vst.msk [vmem:[#allocation2 + $0x8] sm:$0x3] %vm1715_vm7, %v4875_v6  ;;  %v1705_v7 = vpop.f32.mrb[23].mxu1  ;;  %v2488_v6 = vld [vmem:[%s6641_s2 + $0x268] sm:$0xff] }
 0xcc8   :  { %1714 = vst.msk [vmem:[#allocation2] sm:$0xff] %vm311_vm4, %v1705_v7  ;;  %v2489_v7 = vld [vmem:[%s6641_s2 + $0x270] sm:$0xff] }
 0xcca   :  { %v4889_v9 = vpop.f32.mrb[24].mxu1 }
 0xccb   :  { %v1912_v10 = vpop.f32.mrb[25].mxu1 }
 0xcce   :  { %v4903_v12 = vpop.f32.mrb[26].mxu1 }
 0xccf   :  { %v2115_v13 = vpop.f32.mrb[27].mxu1  ;;  %v2288_v14 = vld [vmem:[#allocation2] sm:$0xff] }
 0xcd0   :  { %4908 = vmatprep.mubr.msk.f32.mxu1 %vm124_vm1, %v2115_v13  ;;  %v2291_v16 = vadd.f32 %v2288_v14, %v5939_v40  ;;  %v2492_v14 = vld [vmem:[%s6641_s2 + $0x288] sm:$0xff] }
 0xcd1   :  { %4909 = vmatmul.mubr.msk.f32.vlgmr.msra.gmra.mrb[28].mxu1 %vm124_vm1, %v4903_v12  ;;  %v2491_v12 = vld [vmem:[%s6641_s2 + $0x280] sm:$0xff] }
 0xcd2   :  { %4915 = vmatprep.mubr.msk.f32.mxu1 %vm124_vm1, %v1912_v10  ;;  %v6115_v17 = vadd.f32 %v4479_v15, %v2291_v16  ;;  %5289 = vmatpush3.bf16.msra.mxu1 %v5254_v42  ;;  %v2490_v10 = vld [vmem:[%s6641_s2 + $0x278] sm:$0xff] }
 0xcd3   :  { %5296 = vmatprep.subr.bf16.mxu1 %v5673_v3  ;;  %v5309_v13 = vpack.c.bf16 %v2491_v12, %v2490_v10 }
 0xcd4   :  { %v2302_v18 = vsel %vm311_vm4, %v6115_v17, 0.0 }
 0xcd5   :  { %2303 = vadd.xlane.f32.xlu1 %v2302_v18  ;;  %v2494_v18 = vld [vmem:[%s6641_s2 + $0x298] sm:$0xff] }
 0xcd9   :  { %4916 = vmatmul.mubr.msk.f32.vlgmr.msra.gmra.mrb[28].mxu1 %vm124_vm1, %v4889_v9  ;;  %v5306_v9 = vpack.c.bf16 %v2489_v7, %v2488_v6 }
 0xcda   :  { %4967 = vmatprep.mubr.msk.f32.mxu1 %vm5674_vm0, %v5675_v8  ;;  %5298 = vmatpush3.bf16.msra.mxu1 %v5297_v61 }
 0xcdb   :  { %5299 = vmatprep.subr.bf16.mxu1 %v5673_v3 }
 0xcde   :  { %5301 = vmatpush3.bf16.msra.mxu1 %v5300_v1 }
 0xcdf   :  { %5302 = vmatprep.subr.bf16.mxu1 %v5673_v3 }
 0xce2   :  { %5304 = vmatpush3.bf16.msra.mxu1 %v5303_v5 }
 0xce3   :  { %5305 = vmatprep.subr.bf16.mxu1 %v5673_v3 }
 0xce6   :  { %5307 = vmatpush3.bf16.msra.mxu1 %v5306_v9 }
 0xce7   :  { %5308 = vmatprep.subr.bf16.mxu1 %v5673_v3 }
 0xcea   :  { %5310 = vmatpush3.bf16.msra.mxu1 %v5309_v13 }
 0xceb   :  { %5311 = vmatprep.subr.bf16.mxu1 %v5673_v3 }
 0xd62   :  { %v2304_v19 = vpop.xlane.xlu1 %2303 }
 0xd63   :  { %v2311_v40 = vmul.f32 0.03125, %v2304_v19  ;;  %v2495_v19 = vld [vmem:[%s6641_s2 + $0x2a0] sm:$0xff] }
 0xd65   :  { %v2314_v20 = vsub.f32 %v6115_v17, %v2311_v40  ;;  %v5315_v40 = vpack.c.bf16 %v2495_v19, %v2494_v18 }
 0xd67   :  { %v2317_v21 = vmul.f32 %v2314_v20, %v2314_v20 }
 0xd69   :  { %v2320_v22 = vsel %vm311_vm4, %v2317_v21, 0.0  ;;  %v2497_v21 = vld [vmem:[%s6641_s2 + $0x2b0] sm:$0xff] }
 0xd6a   :  { %2321 = vadd.xlane.f32.xlu1 %v2320_v22 }
 0xdac   :  { %v4917_v29 = vpop.f32.mrb[28].mxu1 }
 0xdad   :  { %2287 = vst.msk [vmem:[#allocation2 + $0x12] sm:$0x3] %vm1715_vm7, %v4917_v29  ;;  %v2277_v11 = vpop.f32.mrb[29].mxu1 }
 0xdae   :  { %2286 = vst.msk [vmem:[#allocation2 + $0xa] sm:$0xff] %vm311_vm4, %v2277_v11 }
 0xdb5   :  { %v2289_v30 = vld [vmem:[#allocation2 + $0x8] sm:$0xff]  ;;  %v2290_v31 = vld [vmem:[#allocation2 + $0x10] sm:$0xf] }
 0xdb6   :  { %v2292_v32 = vadd.f32 %v2289_v30, %v5937_v39  ;;  %v2293_v33 = vadd.f32 %v2290_v31, %v5951_v54  ;;  %v6154_v39 = vld [vmem:[%s6641_s2 + $0x200] ss:$0 sm:$0xff] }
 0xdb8   :  { %v6143_v34 = vadd.f32 %v4479_v15, %v2292_v32  ;;  %v6145_v35 = vadd.f32 %v4479_v15, %v2293_v33  ;;  %v2493_v15 = vld [vmem:[%s6641_s2 + $0x290] sm:$0xff] }
 0xdb9   :  { %v5312_v16 = vpack.c.bf16 %v2493_v15, %v2492_v14 }
 0xdba   :  { %v2305_v37 = vsel %vm311_vm4, %v6143_v34, 0.0  ;;  %v2308_v38 = vsel %vm596_vm9, %v6145_v35, 0.0 }
 0xdbb   :  { %2306 = vadd.xlane.f32.xlu0 %v2305_v37  ;;  %2309 = vadd.xlane.f32.xlu1 %v2308_v38 }
 0xdbc   :  { %5313 = vmatpush3.bf16.msra.mxu1 %v5312_v16 }
 0xdbd   :  { %5314 = vmatprep.subr.bf16.mxu1 %v5673_v3 }
 0xdc0   :  { %5316 = vmatpush3.bf16.msra.mxu1 %v5315_v40 }
 0xdc1   :  { %5317 = vmatprep.subr.bf16.mxu1 %v5673_v3 }
 0xdf7   :  { %v2322_v41 = vpop.xlane.xlu1 %2321 }
 0xdf8   :  { %v2329_v42 = vmul.f32 0.03125, %v2322_v41 }
 0xdfa   :  { %v2332_v44 = vadd.f32 1e-05, %v2329_v42 }
 0xdfc   :  { %5581 = vrsqrt.f32 %v2332_v44 }
 0xe06   :  { %v5582_v45 = vpop.eup %5581 }
 0xe07   :  { %v2338_v54 = vmul.f32 %v5582_v45, %v2314_v20  ;;  %v2496_v20 = vld [vmem:[%s6641_s2 + $0x2a8] sm:$0xff] }
 0xe08   :  { %v5318_v22 = vpack.c.bf16 %v2497_v21, %v2496_v20 }
 0xe09   :  { %v2346_v47 = vmul.f32 %v6154_v39, %v2338_v54 }
 0xe0a   :  { %5319 = vmatpush3.bf16.msra.mxu1 %v5318_v22 }
 0xe0b   :  { %v2354_v48 = vadd.f32 %v6159_v46, %v2346_v47 }
 0xe0d   :  { %4927 = vmatmul.mubr.msk.f32.vlgmr.msra.gmra.mrb[16].mxu0 %vm311_vm4, %v2354_v48 }
 0xe0e   :  { %4929 = vmatprep.mubr.msk.f32.mxu0 %vm5674_vm0, %v5675_v8 }
 0xe48   :  { %v2307_v49 = vpop.xlane.xlu0 %2306  ;;  %v2310_v57 = vpop.xlane.xlu1 %2309 }
 0xe49   :  { %v2312_v50 = vmul.f32 0.03125, %v2307_v49  ;;  %v2313_v51 = vmul.f32 0.03125, %v2310_v57 }
 0xe4b   :  { %v6167_v52 = vsub.f32 %v6143_v34, %v2312_v50  ;;  %v6170_v53 = vsub.f32 %v6145_v35, %v2313_v51 }
 0xe4d   :  { %v2318_v55 = vmul.f32 %v6167_v52, %v6167_v52  ;;  %v2319_v36 = vmul.f32 %v6170_v53, %v6170_v53 }
 0xe4f   :  { %v2323_v56 = vsel %vm311_vm4, %v2318_v55, 0.0  ;;  %v2326_v58 = vsel %vm596_vm9, %v2319_v36, 0.0 }
 0xe50   :  { %2324 = vadd.xlane.f32.xlu0 %v2323_v56 }
 0xe54   :  { %2327 = vadd.xlane.f32.xlu0 %v2326_v58 }
 0xedd   :  { %v2325_v23 = vpop.xlane.xlu0 %2324 }
 0xede   :  { %v2330_v24 = vmul.f32 0.03125, %v2325_v23 }
 0xee0   :  { %v2333_v26 = vadd.f32 1e-05, %v2330_v24  ;;  %v2441_v27 = vpop.f32.mrb[16].mxu0 }
 0xee1   :  { %v2442_v28 = vadd.f32 %v4482_v25, %v2441_v27  ;;  %v4928_v29 = vpop.f32.mrb[17].mxu0  ;;  %v2328_v11 = vpop.xlane.xlu0 %2327  ;;  %v2641_v27 = vld [vmem:[%s6641_s2 + $0x2d0] sm:$0xff] }
 0xee2   :  { %5583 = vrsqrt.f32 %v2333_v26  ;;  %v2331_v30 = vmul.f32 0.03125, %v2328_v11  ;;  %v2643_v11 = vld [vmem:[%s6641_s2 + $0x2e0] sm:$0xff] }
 0xee3   :  { %v2455_v31 = vmul.f32 %v2442_v28, %v2442_v28 }
 0xee4   :  { %v2334_v32 = vadd.f32 1e-05, %v2331_v30  ;;  %v2644_v30 = vld [vmem:[%s6641_s2 + $0x2e8] sm:$0xff] }
 0xee5   :  { %v2458_v33 = vmul.f32 %v2455_v31, %v2442_v28  ;;  %v5324_v31 = vpack.c.bf16 %v2644_v30, %v2643_v11 }
 0xee6   :  { %5585 = vrsqrt.f32 %v2334_v32 }
 0xee7   :  { %v2461_v37 = vmul.f32 0.044715, %v2458_v33 }
 0xee9   :  { %v2464_v38 = vadd.f32 %v2461_v37, %v2442_v28 }
 0xeeb   :  { %v2467_v41 = vmul.f32 0.7978846, %v2464_v38 }
 0xeec   :  { %v5584_v42 = vpop.eup %5583 }
 0xeed   :  { %5587 = vtanh.f32 %v2467_v41  ;;  %v2339_v44 = vmul.f32 %v5584_v42, %v6167_v52 }
 0xeef   :  { %v2347_v45 = vmul.f32 %v6154_v39, %v2339_v44 }
 0xef0   :  { %v5586_v54 = vpop.eup %5585 }
 0xef1   :  { %v2355_v47 = vadd.f32 %v6159_v46, %v2347_v45  ;;  %v2340_v48 = vmul.f32 %v5586_v54, %v6170_v53 }
 0xef3   :  { %4930 = vmatmul.mubr.msk.f32.gmra.mrb[18].mxu0 %vm311_vm4, %v2355_v47  ;;  %v2348_v49 = vmul.f32 %v6154_v39, %v2340_v48 }
 0xef4   :  { %4932 = vmatprep.mubr.msk.f32.mxu0 %vm5674_vm0, %v5675_v8 }
 0xef5   :  { %v2356_v57 = vadd.f32 %v6159_v46, %v2348_v49 }
 0xef7   :  { %v5588_v50 = vpop.eup %5587  ;;  %4933 = vmatmul.mubr.msk.f32.gmra.mrb[20].mxu0 %vm311_vm4, %v2356_v57 }
 0xef8   :  { %v2473_v51 = vadd.f32 1.0, %v5588_v50  ;;  %4984 = vmatprep.mubr.msk.f32.mxu0 %vm5674_vm0, %v5675_v8  ;;  %v4487_v50 = vld [vmem:[%s6641_s2 + $0x2c0] ss:$0 sm:$0xff] }
 0xefa   :  { %v2476_v52 = vmul.f32 0.5, %v2473_v51 }
 0xefc   :  { %v2479_v55 = vmul.f32 %v2476_v52, %v2442_v28  ;;  %v2642_v28 = vld [vmem:[%s6641_s2 + $0x2d8] sm:$0xff]  ;;  %v4488_v52 = vld [vmem:[%s6641_s2 + $0x2c8] ss:$0 sm:$0xff] }
 0xefd   :  { %v5321_v29 = vpack.c.bf16 %v2642_v28, %v2641_v27 }
 0xefe   :  { %4968 = vmatmul.mubr.f32.vlgmr.msra.gmra.mrb[30].mxu1 %v2479_v55 }
 0xeff   :  { %4970 = vmatprep.mubr.msk.f32.mxu1 %vm5674_vm0, %v5675_v8  ;;  %5322 = vmatpush3.bf16.msra.mxu0 %v5321_v29 }
 0xf00   :  { %5323 = vmatprep.subr.bf16.mxu0 %v5673_v3 }
 0xf03   :  { %5325 = vmatpush3.bf16.msra.mxu0 %v5324_v31 }
 0xfc6   :  { %v2446_v53 = vpop.f32.mrb[18].mxu0 }
 0xfc7   :  { %v2447_v39 = vadd.f32 %v4482_v25, %v2446_v53  ;;  %v4931_v56 = vpop.f32.mrb[19].mxu0 }
 0xfc9   :  { %v2456_v36 = vmul.f32 %v2447_v39, %v2447_v39 }
 0xfca   :  { %v2451_v58 = vpop.f32.mrb[20].mxu0 }
 0xfcb   :  { %v2459_v59 = vmul.f32 %v2456_v36, %v2447_v39  ;;  %v2452_v46 = vadd.f32 %v4482_v25, %v2451_v58  ;;  %v4934_v60 = vpop.f32.mrb[21].mxu0 }
 0xfcd   :  { %v2462_v61 = vmul.f32 0.044715, %v2459_v59  ;;  %v2457_v63 = vmul.f32 %v2452_v46, %v2452_v46 }
 0xfcf   :  { %v2465_v0 = vadd.f32 %v2462_v61, %v2447_v39  ;;  %v2460_v1 = vmul.f32 %v2457_v63, %v2452_v46 }
 0xfd1   :  { %v2468_v4 = vmul.f32 0.7978846, %v2465_v0  ;;  %v2463_v5 = vmul.f32 0.044715, %v2460_v1  ;;  %v2569_v6 = vpop.f32.mrb[30].mxu1 }
 0xfd2   :  { %v2570_v7 = vadd.f32 %v4486_v2, %v2569_v6  ;;  %v4969_v9 = vpop.f32.mrb[31].mxu1 }
 0xfd3   :  { %v2466_v10 = vadd.f32 %v2463_v5, %v2452_v46  ;;  %5589 = vtanh.f32 %v2468_v4 }
 0xfd4   :  { %v6254_v12 = vadd.f32 %v2570_v7, %v6115_v17 }
 0xfd5   :  { %v2469_v13 = vmul.f32 0.7978846, %v2466_v10 }
 0xfd6   :  { %v2586_v14 = vsel %vm311_vm4, %v6254_v12, 0.0 }
 0xfd7   :  { %2587 = vadd.xlane.f32.xlu1 %v2586_v14  ;;  %5591 = vtanh.f32 %v2469_v13 }
 0xfdd   :  { %v5590_v15 = vpop.eup %5589 }
 0xfde   :  { %v2474_v16 = vadd.f32 1.0, %v5590_v15 }
 0xfe0   :  { %v2477_v18 = vmul.f32 0.5, %v2474_v16 }
 0xfe1   :  { %v5592_v19 = vpop.eup %5591 }
 0xfe2   :  { %v2480_v40 = vmul.f32 %v2477_v18, %v2447_v39  ;;  %v2475_v20 = vadd.f32 1.0, %v5592_v19  ;;  %v6301_v19 = vld [vmem:[%s6641_s2 + $0x2f0] ss:$0 sm:$0xff] }
 0xfe4   :  { %4971 = vmatmul.mubr.f32.gmra.mrb[32].mxu1 %v2480_v40  ;;  %v2478_v21 = vmul.f32 0.5, %v2475_v20 }
 0xfe5   :  { %4973 = vmatprep.mubr.msk.f32.mxu1 %vm5674_vm0, %v5675_v8 }
 0xfe6   :  { %v2481_v22 = vmul.f32 %v2478_v21, %v2452_v46 }
 0xfe8   :  { %4974 = vmatmul.mubr.f32.gmra.mrb[34].mxu1 %v2481_v22 }
0x1064   :  { %v2588_v17 = vpop.xlane.xlu1 %2587 }
0x1065   :  { %v2595_v23 = vmul.f32 0.03125, %v2588_v17 }
0x1067   :  { %v2598_v24 = vsub.f32 %v6254_v12, %v2595_v23 }
0x1069   :  { %v2601_v25 = vmul.f32 %v2598_v24, %v2598_v24 }
0x106b   :  { %v2604_v26 = vsel %vm311_vm4, %v2601_v25, 0.0 }
0x106c   :  { %2605 = vadd.xlane.f32.xlu1 %v2604_v26 }
0x10b7   :  { %v2574_v32 = vpop.f32.mrb[32].mxu1 }
0x10b8   :  { %v2575_v33 = vadd.f32 %v4486_v2, %v2574_v32  ;;  %v4972_v37 = vpop.f32.mrb[33].mxu1 }
0x10ba   :  { %v6276_v38 = vadd.f32 %v2575_v33, %v6143_v34 }
0x10bb   :  { %v2579_v41 = vpop.f32.mrb[34].mxu1 }
0x10bc   :  { %v2580_v42 = vadd.f32 %v4486_v2, %v2579_v41  ;;  %v4975_v44 = vpop.f32.mrb[35].mxu1  ;;  %v2589_v45 = vsel %vm311_vm4, %v6276_v38, 0.0 }
0x10bd   :  { %2590 = vadd.xlane.f32.xlu0 %v2589_v45 }
0x10be   :  { %v6281_v54 = vadd.f32 %v2580_v42, %v6145_v35 }
0x10c0   :  { %v2592_v47 = vsel %vm596_vm9, %v6281_v54, 0.0 }
0x10c1   :  { %2593 = vadd.xlane.f32.xlu1 %v2592_v47 }
0x10f9   :  { %v2606_v48 = vpop.xlane.xlu1 %2605 }
0x10fa   :  { %v2613_v49 = vmul.f32 0.03125, %v2606_v48 }
0x10fc   :  { %v2616_v57 = vadd.f32 1e-05, %v2613_v49 }
0x10fe   :  { %5593 = vrsqrt.f32 %v2616_v57 }
0x1108   :  { %v5594_v34 = vpop.eup %5593 }
0x1109   :  { %v2622_v51 = vmul.f32 %v5594_v34, %v2598_v24 }
0x110b   :  { %v2630_v35 = vmul.f32 %v4487_v50, %v2622_v51 }
0x110d   :  { %v2638_v55 = vadd.f32 %v4488_v52, %v2630_v35 }
0x110f   :  { %4985 = vmatmul.mubr.msk.f32.vlgmr.msra.gmra.mrb[22].mxu0 %vm311_vm4, %v2638_v55 }
0x1110   :  { %4987 = vmatprep.mubr.msk.f32.mxu0 %vm5674_vm0, %v5675_v8 }
0x114a   :  { %v2591_v53 = vpop.xlane.xlu0 %2590 }
0x114b   :  { %v2596_v39 = vmul.f32 0.03125, %v2591_v53 }
0x114d   :  { %v2599_v56 = vsub.f32 %v6276_v38, %v2596_v39 }
0x114e   :  { %v2594_v36 = vpop.xlane.xlu1 %2593 }
0x114f   :  { %v2597_v58 = vmul.f32 0.03125, %v2594_v36  ;;  %v2602_v59 = vmul.f32 %v2599_v56, %v2599_v56 }
0x1151   :  { %v2600_v46 = vsub.f32 %v6281_v54, %v2597_v58  ;;  %v2607_v60 = vsel %vm311_vm4, %v2602_v59, 0.0 }
0x1152   :  { %2608 = vadd.xlane.f32.xlu0 %v2607_v60 }
0x1153   :  { %v2603_v61 = vmul.f32 %v2600_v46, %v2600_v46 }
0x1155   :  { %v2610_v63 = vsel %vm596_vm9, %v2603_v61, 0.0 }
0x1156   :  { %2611 = vadd.xlane.f32.xlu0 %v2610_v63 }
0x11df   :  { %v2609_v0 = vpop.xlane.xlu0 %2608 }
0x11e0   :  { %v2614_v1 = vmul.f32 0.03125, %v2609_v0 }
0x11e2   :  { %v2617_v2 = vadd.f32 1e-05, %v2614_v1  ;;  %v2725_v4 = vpop.f32.mrb[22].mxu0 }
0x11e3   :  { %v4986_v5 = vpop.f32.mrb[23].mxu0  ;;  %v2612_v6 = vpop.xlane.xlu0 %2611  ;;  %v2726_v21 = vadd.f32 %v6301_v19, %v2725_v4 }
0x11e4   :  { %5595 = vrsqrt.f32 %v2617_v2  ;;  %v2615_v7 = vmul.f32 0.03125, %v2612_v6 }
0x11e6   :  { %v2618_v9 = vadd.f32 1e-05, %v2615_v7 }
0x11e8   :  { %5597 = vrsqrt.f32 %v2618_v9 }
0x11ee   :  { %v5596_v10 = vpop.eup %5595 }
0x11ef   :  { %v2623_v13 = vmul.f32 %v5596_v10, %v2599_v56 }
0x11f1   :  { %v2631_v14 = vmul.f32 %v4487_v50, %v2623_v13 }
0x11f2   :  { %v5598_v15 = vpop.eup %5597 }
0x11f3   :  { %v2639_v16 = vadd.f32 %v4488_v52, %v2631_v14  ;;  %v2624_v18 = vmul.f32 %v5598_v15, %v2600_v46 }
0x11f5   :  { %4988 = vmatmul.mubr.msk.f32.gmra.mrb[24].mxu0 %vm311_vm4, %v2639_v16  ;;  %v2632_v40 = vmul.f32 %v4487_v50, %v2624_v18 }
0x11f6   :  { %4990 = vmatprep.mubr.msk.f32.mxu0 %vm5674_vm0, %v5675_v8 }
0x11f7   :  { %v2640_v20 = vadd.f32 %v4488_v52, %v2632_v40 }
0x11f9   :  { %4991 = vmatmul.mubr.msk.f32.gmra.mrb[26].mxu0 %vm311_vm4, %v2640_v20 }
0x11fa   :  { %4997 = vmatprep.mubr.msk.f32.mxu0 %vm124_vm1, %v2726_v21 }
0x12c8   :  { %v2730_v22 = vpop.f32.mrb[24].mxu0 }
0x12c9   :  { %v6310_v17 = vadd.f32 %v6301_v19, %v2730_v22  ;;  %v4989_v23 = vpop.f32.mrb[25].mxu0 }
0x12cb   :  { %v6313_v24 = vpack.i.bf16 %v6310_v17, %v2726_v21  ;;  %v3312_v18 = vrot.slane %v6310_v17, 2 }
0x12cc   :  { %v6315_v25 = vpop.f32.mrb[26].mxu0 }
0x12cd   :  { %5492 = vrot.lane.b32.xlu1 %v6313_v24, %s5678_s26  ;;  %v4992_v26 = vpop.f32.mrb[27].mxu0  ;;  %v2736_v15 = vadd.f32 %v6301_v19, %v6315_v25 }
0x12cf   :  { %v3313_v16 = vrot.slane %v2736_v15, 2 }
0x12d1   :  { %5497 = vrot.lane.b32.xlu1 %v6313_v24, %s5680_s28  ;;  %v3314_v40 = vsel %vm1718_vm14, %v3312_v18, %v3313_v16 }
0x12d2   :  { %v6358_v20 = vpack.i.bf16 %v3313_v16, %v3314_v40 }
0x12d5   :  { %2944 = vrot.lane.b32.xlu1 %v2726_v21, %s5677_s25 }
0x12d9   :  { %2946 = vrot.lane.b32.xlu1 %v6310_v17, %s5677_s25 }
0x133f   :  { %v5493_v27 = vpop.permute.xlu1 %5492 }
0x1340   :  { %v5495_v28 = vunpack.i.h.bf16 %v5493_v27  ;;  %v5494_v29 = vunpack.i.l.bf16 %v5493_v27 }
0x1342   :  { %v5326_v11 = vpack.c.bf16 %v5495_v28, %v5494_v29 }
0x1343   :  { %v5498_v30 = vpop.permute.xlu1 %5497 }
0x1344   :  { %v5500_v31 = vunpack.i.h.bf16 %v5498_v30  ;;  %v5499_v32 = vunpack.i.l.bf16 %v5498_v30  ;;  %5328 = vmatprep.subr.msk.bf16.mxu0 %vm5999_vm13, %v5326_v11 }
0x1345   :  { %5331 = vmatpush3.bf16.xpose.msk.msra.mxu0 %vm5999_vm13, %v5326_v11 }
0x1346   :  { %v5332_v33 = vpack.c.bf16 %v5500_v31, %v5499_v32 }
0x1347   :  { %v2945_v1 = vpop.permute.xlu1 %2944 }
0x1348   :  { %5334 = vmatprep.subr.msk.bf16.mxu0 %vm6054_vm6, %v5332_v33 }
0x134b   :  { %v2947_v2 = vpop.permute.xlu1 %2946 }
0x134c   :  { %4998 = vmatmul.mubr.msk.f32.vlgmr.msra.gmra.mrb[28].mxu0 %vm124_vm1, %v6310_v17 }
0x134d   :  { %5337 = vmatpush3.bf16.msk.msra.mxu0 %vm6054_vm6, %v5332_v33 }
0x141f   :  { %v4999_v37 = vpop.f32.mrb[28].mxu0 }
0x1420   :  { %v2823_v41 = vpop.f32.mrb[29].mxu0  ;;  %v2833_v44 = vmul.f32 0.25, %v4999_v37 }
0x1421   :  { %v2832_v42 = vmul.f32 0.25, %v2823_v41 }
0x1422   :  { %v2837_v47 = vsel %vm1240_vm15, %v2833_v44, -inf }
0x1423   :  { %v2834_v45 = vsel %vm1236_vm2, %v2832_v42, -inf }
0x1424   :  { %2835 = vmax.xlane.f32.xlu0 %v2834_v45 }
0x1428   :  { %2838 = vmax.xlane.f32.xlu0 %v2837_v47 }
0x14b1   :  { %v2836_v48 = vpop.xlane.xlu0 %2835 }
0x14b2   :  { %v2840_v49 = vsub.f32 %v2832_v42, %v2836_v48  ;;  %v2741_v42 = vld [vmem:[%s6641_s2 + $0x308] sm:$0xff] }
0x14b4   :  { %v2842_v50 = vmul.f32 1.442695, %v2840_v49 }
0x14b5   :  { %v2839_v57 = vpop.xlane.xlu0 %2838 }
0x14b6   :  { %v2841_v34 = vsub.f32 %v2833_v44, %v2839_v57  ;;  %v2742_v44 = vld [vmem:[%s6641_s2 + $0x310] sm:$0xff] }
0x14b7   :  { %v6382_v45 = vpack.c.bf16 %v2742_v44, %v2741_v42 }
0x14b8   :  { %v2844_v51 = vmul.f32 1.442695, %v2841_v34 }
0x14b9   :  { %5351 = vmatprep.subr.bf16.mxu1 %v6382_v45 }
0x14ba   :  { %5599 = vpow2.f32 %v2844_v51  ;;  %5353 = vmatpush3.bf16.msra.mxu1 %v6382_v45 }
0x14bb   :  { %5601 = vpow2.f32 %v2842_v50 }
0x14c4   :  { %v5600_v52 = vpop.eup %5599 }
0x14c5   :  { %v2849_v35 = vsel %vm1240_vm15, %v5600_v52, 0.0  ;;  %v5602_v55 = vpop.eup %5601 }
0x14c6   :  { %2850 = vadd.xlane.f32.xlu0 %v2849_v35  ;;  %v2846_v53 = vsel %vm1236_vm2, %v5602_v55, 0.0 }
0x14ca   :  { %2847 = vadd.xlane.f32.xlu0 %v2846_v53 }
0x14e0   :  { %5502 = vrot.lane.b32.xlu0 %v6313_v24, %s5679_s27 }
0x1553   :  { %v2851_v39 = vpop.xlane.xlu0 %2850 }
0x1554   :  { %5603 = vrcp.f32 %v2851_v39 }
0x1557   :  { %v2848_v56 = vpop.xlane.xlu0 %2847 }
0x1558   :  { %5605 = vrcp.f32 %v2848_v56  ;;  %v2739_v56 = vld [vmem:[%s6641_s2 + $0x2f8] sm:$0xff] }
0x155b   :  { %v5503_v36 = vpop.permute.xlu0 %5502 }
0x155c   :  { %v5505_v58 = vunpack.i.h.bf16 %v5503_v36  ;;  %v5504_v59 = vunpack.i.l.bf16 %v5503_v36  ;;  %v2740_v36 = vld [vmem:[%s6641_s2 + $0x300] sm:$0xff] }
0x155d   :  { %v6407_v43 = vpack.c.bf16 %v2740_v36, %v2739_v56 }
0x155e   :  { %v5338_v46 = vpack.c.bf16 %v5505_v58, %v5504_v59  ;;  %v5604_v60 = vpop.eup %5603 }
0x155f   :  { %v2855_v0 = vmul.f32 %v5604_v60, %v5600_v52  ;;  %5355 = vmatprep.subr.bf16.mxu1 %v6407_v43 }
0x1560   :  { %5340 = vmatprep.subr.msk.bf16.mxu0 %vm5999_vm13, %v5338_v46 }
0x1562   :  { %v5606_v61 = vpop.eup %5605 }
0x1563   :  { %v2854_v63 = vmul.f32 %v5606_v61, %v5602_v55 }
0x1565   :  { %5004 = vmatprep.mubr.msk.f32.mxu0 %vm1236_vm2, %v2854_v63 }
0x1566   :  { %5005 = vmatmul.mubr.msk.f32.vlgmr.msra.gmra.mrb[30].mxu0 %vm1236_vm2, %v2855_v0 }
0x1567   :  { %5343 = vmatpush3.bf16.xpose.msk.msra.mxu0 %vm5999_vm13, %v5338_v46  ;;  %5011 = vmatprep.mubr.msk.f32.mxu0 %vm124_vm1, %v2945_v1 }
0x156e   :  { %5012 = vmatmul.mubr.msk.f32.vlgmr.msra.gmra.mrb[32].mxu0 %vm124_vm1, %v2947_v2 }
0x1639   :  { %v6348_v4 = vpop.f32.mrb[30].mxu0 }
0x163a   :  { %v6350_v5 = vpop.f32.mrb[31].mxu0 }
0x1641   :  { %v5013_v6 = vpop.f32.mrb[32].mxu0 }
0x1642   :  { %v3036_v7 = vmul.f32 0.25, %v5013_v6  ;;  %v3026_v9 = vpop.f32.mrb[33].mxu0 }
0x1643   :  { %v3035_v10 = vmul.f32 0.25, %v3026_v9 }
0x1644   :  { %v3040_v13 = vsel %vm1240_vm15, %v3036_v7, -inf }
0x1645   :  { %3041 = vmax.xlane.f32.xlu0 %v3040_v13  ;;  %v3037_v14 = vsel %vm1236_vm2, %v3035_v10, -inf }
0x1646   :  { %3038 = vmax.xlane.f32.xlu1 %v3037_v14 }
0x1657   :  { %5512 = vrot.lane.b32.xlu1 %v6358_v20, %s5678_s26 }
0x165b   :  { %5507 = vrot.lane.b32.xlu0 %v6313_v24, %s5681_s29 }
0x165f   :  { %3516 = vrot.lane.b32.xlu0 %v3313_v16, %s5677_s25 }
0x16d2   :  { %v3042_v21 = vpop.xlane.xlu0 %3041 }
0x16d3   :  { %v3044_v22 = vsub.f32 %v3036_v7, %v3042_v21  ;;  %v3039_v23 = vpop.xlane.xlu1 %3038 }
0x16d4   :  { %v3043_v26 = vsub.f32 %v3035_v10, %v3039_v23 }
0x16d5   :  { %v3047_v19 = vmul.f32 1.442695, %v3044_v22 }
0x16d6   :  { %v3045_v25 = vmul.f32 1.442695, %v3043_v26  ;;  %v5508_v27 = vpop.permute.xlu0 %5507 }
0x16d7   :  { %5607 = vpow2.f32 %v3047_v19  ;;  %v5510_v17 = vunpack.i.h.bf16 %v5508_v27  ;;  %v5509_v28 = vunpack.i.l.bf16 %v5508_v27  ;;  %v5513_v29 = vpop.permute.xlu1 %5512 }
0x16d8   :  { %v5515_v11 = vunpack.i.h.bf16 %v5513_v29  ;;  %v5514_v30 = vunpack.i.l.bf16 %v5513_v29  ;;  %5609 = vpow2.f32 %v3045_v25 }
0x16d9   :  { %v5344_v31 = vpack.c.bf16 %v5510_v17, %v5509_v28 }
0x16da   :  { %v5358_v32 = vpack.c.bf16 %v5515_v11, %v5514_v30  ;;  %v3517_v39 = vpop.permute.xlu0 %3516 }
0x16db   :  { %5346 = vmatprep.subr.msk.bf16.mxu0 %vm6054_vm6, %v5344_v31 }
0x16dc   :  { %5349 = vmatpush3.bf16.msk.msra.mxu0 %vm6054_vm6, %v5344_v31 }
0x16dd   :  { %5360 = vmatprep.subr.msk.bf16.mxu0 %vm5999_vm13, %v5358_v32 }
0x16e1   :  { %v5608_v24 = vpop.eup %5607 }
0x16e2   :  { %v3052_v33 = vsel %vm1240_vm15, %v5608_v24, 0.0  ;;  %v5610_v37 = vpop.eup %5609 }
0x16e3   :  { %3053 = vadd.xlane.f32.xlu1 %v3052_v33  ;;  %v3049_v41 = vsel %vm1236_vm2, %v5610_v37, 0.0 }
0x16e7   :  { %3050 = vadd.xlane.f32.xlu1 %v3049_v41 }
0x16f8   :  { %5517 = vrot.lane.b32.xlu1 %v6358_v20, %s5679_s27 }
0x16fc   :  { %3514 = vrot.lane.b32.xlu1 %v3314_v40, %s5677_s25 }
0x1770   :  { %v3054_v47 = vpop.xlane.xlu1 %3053 }
0x1771   :  { %5611 = vrcp.f32 %v3054_v47 }
0x1774   :  { %v3051_v48 = vpop.xlane.xlu1 %3050 }
0x1775   :  { %5613 = vrcp.f32 %v3051_v48 }
0x1778   :  { %v5518_v49 = vpop.permute.xlu1 %5517 }
0x1779   :  { %v5520_v50 = vunpack.i.h.bf16 %v5518_v49  ;;  %v5519_v51 = vunpack.i.l.bf16 %v5518_v49 }
0x177b   :  { %v5612_v57 = vpop.eup %5611  ;;  %v5370_v55 = vpack.c.bf16 %v5520_v50, %v5519_v51 }
0x177c   :  { %v3058_v35 = vmul.f32 %v5612_v57, %v5608_v24  ;;  %v3515_v53 = vpop.permute.xlu1 %3514 }
0x177f   :  { %v5614_v34 = vpop.eup %5613 }
0x1780   :  { %v3057_v52 = vmul.f32 %v5614_v34, %v5610_v37  ;;  %v6434_v37 = vld [vmem:[%s6641_s2 + $0x318] ss:$0 sm:$0xff] }
0x1782   :  { %5018 = vmatprep.mubr.msk.f32.mxu0 %vm1236_vm2, %v3057_v52 }
0x1783   :  { %5019 = vmatmul.mubr.msk.f32.vlgmr.msra.gmra.mrb[34].mxu0 %vm1236_vm2, %v3058_v35 }
0x1784   :  { %5363 = vmatpush3.bf16.xpose.msk.msra.mxu0 %vm5999_vm13, %v5358_v32  ;;  %5039 = vmatprep.mubr.msk.f32.mxu0 %vm124_vm1, %v3314_v40 }
0x1785   :  { %5372 = vmatprep.subr.msk.bf16.mxu0 %vm5999_vm13, %v5370_v55 }
0x178b   :  { %5040 = vmatmul.mubr.msk.f32.vlgmr.msra.gmra.mrb[36].mxu0 %vm124_vm1, %v3313_v16 }
0x178c   :  { %5375 = vmatpush3.bf16.xpose.msk.msra.mxu0 %vm5999_vm13, %v5370_v55  ;;  %5053 = vmatprep.mubr.msk.f32.mxu0 %vm124_vm1, %v3515_v53 }
0x178d   :  { %5390 = vmatprep.subr.bf16.mxu0 %v5673_v3 }
0x1793   :  { %5054 = vmatmul.mubr.msk.f32.vlgmr.msra.gmra.mrb[38].mxu0 %vm124_vm1, %v3517_v39 }
0x1794   :  { %5085 = vmatprep.mubr.msk.f32.mxu0 %vm5674_vm0, %v5675_v8 }
0x1856   :  { %v5020_v58 = vpop.f32.mrb[34].mxu0 }
0x1857   :  { %v3138_v59 = vpop.f32.mrb[35].mxu0 }
0x1858   :  { %5025 = vmatprep.mubr.msk.f32.mxu1 %vm124_vm1, %v3138_v59 }
0x1859   :  { %5026 = vmatmul.mubr.msk.f32.vlgmr.msra.gmra.mrb[36].mxu1 %vm124_vm1, %v5020_v58 }
0x185a   :  { %5032 = vmatprep.mubr.msk.f32.mxu1 %vm124_vm1, %v6350_v5  ;;  %5357 = vmatpush3.bf16.msra.mxu1 %v6407_v43 }
0x185e   :  { %v5041_v46 = vpop.f32.mrb[36].mxu0 }
0x185f   :  { %v3403_v60 = vmul.f32 0.25, %v5041_v46  ;;  %v3393_v61 = vpop.f32.mrb[37].mxu0 }
0x1860   :  { %v3402_v63 = vmul.f32 0.25, %v3393_v61 }
0x1861   :  { %5033 = vmatmul.mubr.msk.f32.vlgmr.msra.gmra.mrb[36].mxu1 %vm124_vm1, %v6348_v4  ;;  %v3407_v0 = vsel %vm1240_vm15, %v3403_v60, -inf }
0x1862   :  { %3408 = vmax.xlane.f32.xlu0 %v3407_v0  ;;  %v3404_v1 = vsel %vm1236_vm2, %v3402_v63, -inf }
0x1863   :  { %3405 = vmax.xlane.f32.xlu1 %v3404_v1 }
0x1866   :  { %v5055_v2 = vpop.f32.mrb[38].mxu0 }
0x1867   :  { %v3596_v6 = vpop.f32.mrb[39].mxu0  ;;  %v3606_v9 = vmul.f32 0.25, %v5055_v2 }
0x1868   :  { %v3605_v7 = vmul.f32 0.25, %v3596_v6 }
0x1869   :  { %v3610_v10 = vsel %vm1240_vm15, %v3606_v9, -inf }
0x186a   :  { %v3607_v5 = vsel %vm1236_vm2, %v3605_v7, -inf }
0x186b   :  { %3608 = vmax.xlane.f32.xlu0 %v3607_v5 }
0x186f   :  { %3611 = vmax.xlane.f32.xlu0 %v3610_v10 }
0x18ef   :  { %v3409_v13 = vpop.xlane.xlu0 %3408 }
0x18f0   :  { %v3411_v14 = vsub.f32 %v3403_v60, %v3409_v13  ;;  %v3406_v15 = vpop.xlane.xlu1 %3405 }
0x18f1   :  { %v3410_v4 = vsub.f32 %v3402_v63, %v3406_v15 }
0x18f2   :  { %v3414_v16 = vmul.f32 1.442695, %v3411_v14 }
0x18f3   :  { %v3412_v18 = vmul.f32 1.442695, %v3410_v4 }
0x18f4   :  { %5615 = vpow2.f32 %v3414_v16 }
0x18f5   :  { %5617 = vpow2.f32 %v3412_v18 }
0x18f8   :  { %v3609_v40 = vpop.xlane.xlu0 %3608 }
0x18f9   :  { %v3613_v21 = vsub.f32 %v3605_v7, %v3609_v40 }
0x18fb   :  { %v3615_v22 = vmul.f32 1.442695, %v3613_v21  ;;  %v3952_v21 = vld [vmem:[%s6641_s2 + $0x340] sm:$0xff] }
0x18fc   :  { %v3612_v23 = vpop.xlane.xlu0 %3611 }
0x18fd   :  { %5619 = vpow2.f32 %v3615_v22  ;;  %v3614_v26 = vsub.f32 %v3606_v9, %v3612_v23  ;;  %v3953_v22 = vld [vmem:[%s6641_s2 + $0x348] sm:$0xff] }
0x18fe   :  { %v5616_v19 = vpop.eup %5615  ;;  %v5394_v23 = vpack.c.bf16 %v3953_v22, %v3952_v21  ;;  %v4532_v22 = vld [vmem:[%s6641_s2 + $0x350] ss:$0 sm:$0xff] }
0x18ff   :  { %v5618_v25 = vpop.eup %5617  ;;  %v3617_v27 = vmul.f32 1.442695, %v3614_v26  ;;  %v3419_v17 = vsel %vm1240_vm15, %v5616_v19, 0.0 }
0x1900   :  { %3420 = vadd.xlane.f32.xlu0 %v3419_v17  ;;  %v3416_v28 = vsel %vm1236_vm2, %v5618_v25, 0.0 }
0x1901   :  { %5621 = vpow2.f32 %v3617_v27  ;;  %3417 = vadd.xlane.f32.xlu1 %v3416_v28 }
0x1907   :  { %v5620_v29 = vpop.eup %5619 }
0x1908   :  { %v3619_v11 = vsel %vm1236_vm2, %v5620_v29, 0.0 }
0x1909   :  { %3620 = vadd.xlane.f32.xlu1 %v3619_v11 }
0x190b   :  { %v5622_v30 = vpop.eup %5621 }
0x190c   :  { %v3622_v31 = vsel %vm1240_vm15, %v5622_v30, 0.0 }
0x190d   :  { %3623 = vadd.xlane.f32.xlu0 %v3622_v31 }
0x191a   :  { %5522 = vrot.lane.b32.xlu1 %v6358_v20, %s5680_s28 }
0x1923   :  { %5527 = vrot.lane.b32.xlu0 %v6358_v20, %s5681_s29 }
0x1934   :  { %v5034_v32 = vpop.f32.mrb[36].mxu1 }
0x1935   :  { %3310 = vst.msk [vmem:[#allocation2 + $0x8] sm:$0x3] %vm1715_vm7, %v5034_v32  ;;  %v3300_v24 = vpop.f32.mrb[37].mxu1 }
0x1936   :  { %3309 = vst.msk [vmem:[#allocation2] sm:$0xff] %vm311_vm4, %v3300_v24 }
0x193d   :  { %v3881_v33 = vld [vmem:[#allocation2] sm:$0xff] }
0x193e   :  { %v3884_v41 = vadd.f32 %v3881_v33, %v6254_v12 }
0x1940   :  { %v6438_v42 = vadd.f32 %v6434_v37, %v3884_v41  ;;  %v4530_v41 = vld [vmem:[%s6641_s2 + $0x320] ss:$0 sm:$0xff] }
0x1942   :  { %v3895_v20 = vsel %vm311_vm4, %v6438_v42, 0.0 }
0x1943   :  { %3896 = vadd.xlane.f32.xlu1 %v3895_v20 }
0x198d   :  { %v3421_v47 = vpop.xlane.xlu0 %3420 }
0x198e   :  { %v3418_v44 = vpop.xlane.xlu1 %3417 }
0x198f   :  { %5623 = vrcp.f32 %v3418_v44  ;;  %v4531_v44 = vld [vmem:[%s6641_s2 + $0x328] ss:$0 sm:$0xff] }
0x1990   :  { %5625 = vrcp.f32 %v3421_v47 }
0x1996   :  { %v3621_v48 = vpop.xlane.xlu1 %3620 }
0x1997   :  { %5627 = vrcp.f32 %v3621_v48 }
0x1999   :  { %v5624_v49 = vpop.eup %5623 }
0x199a   :  { %v3624_v57 = vpop.xlane.xlu0 %3623  ;;  %v5523_v34 = vpop.permute.xlu1 %5522  ;;  %v3424_v50 = vmul.f32 %v5624_v49, %v5618_v25  ;;  %v4075_v49 = vld [vmem:[%s6641_s2 + $0x358] sm:$0xff] }
0x199b   :  { %5629 = vrcp.f32 %v3624_v57  ;;  %v5525_v51 = vunpack.i.h.bf16 %v5523_v34  ;;  %v5524_v12 = vunpack.i.l.bf16 %v5523_v34  ;;  %v5626_v35 = vpop.eup %5625  ;;  %v4076_v57 = vld [vmem:[%s6641_s2 + $0x360] sm:$0xff] }
0x199c   :  { %5046 = vmatprep.mubr.msk.f32.mxu1 %vm1236_vm2, %v3424_v50  ;;  %v3425_v36 = vmul.f32 %v5626_v35, %v5616_v19  ;;  %v5397_v34 = vpack.c.bf16 %v4076_v57, %v4075_v49  ;;  %v4077_v50 = vld [vmem:[%s6641_s2 + $0x368] sm:$0xff]  ;;  %v4080_v35 = vld [vmem:[%s6641_s2 + $0x380] sm:$0xff] }
0x199d   :  { %v5364_v52 = vpack.c.bf16 %v5525_v51, %v5524_v12  ;;  %v4078_v51 = vld [vmem:[%s6641_s2 + $0x370] sm:$0xff] }
0x199e   :  { %v5528_v55 = vpop.permute.xlu0 %5527  ;;  %v5400_v12 = vpack.c.bf16 %v4078_v51, %v4077_v50 }
0x199f   :  { %v5530_v53 = vunpack.i.h.bf16 %v5528_v55  ;;  %v5529_v39 = vunpack.i.l.bf16 %v5528_v55  ;;  %5366 = vmatprep.subr.msk.bf16.mxu1 %vm6054_vm6, %v5364_v52 }
0x19a0   :  { %5369 = vmatpush3.bf16.msk.msra.mxu1 %vm6054_vm6, %v5364_v52  ;;  %v4079_v52 = vld [vmem:[%s6641_s2 + $0x378] sm:$0xff] }
0x19a1   :  { %v5628_v56 = vpop.eup %5627  ;;  %v5376_v58 = vpack.c.bf16 %v5530_v53, %v5529_v39  ;;  %v5403_v55 = vpack.c.bf16 %v4080_v35, %v4079_v52  ;;  %v4081_v53 = vld [vmem:[%s6641_s2 + $0x388] sm:$0xff]  ;;  %v4082_v39 = vld [vmem:[%s6641_s2 + $0x390] sm:$0xff] }
0x19a2   :  { %v3627_v59 = vmul.f32 %v5628_v56, %v5620_v29  ;;  %v5406_v56 = vpack.c.bf16 %v4082_v39, %v4081_v53 }
0x19a3   :  { %5047 = vmatmul.mubr.msk.f32.vlgmr.msra.gmra.mrb[38].mxu1 %vm1236_vm2, %v3425_v36  ;;  %5378 = vmatprep.subr.msk.bf16.mxu1 %vm6054_vm6, %v5376_v58  ;;  %v4083_v36 = vld [vmem:[%s6641_s2 + $0x398] sm:$0xff] }
0x19a4   :  { %5381 = vmatpush3.bf16.msk.msra.mxu1 %vm6054_vm6, %v5376_v58  ;;  %5060 = vmatprep.mubr.msk.f32.mxu1 %vm1236_vm2, %v3627_v59  ;;  %v4084_v58 = vld [vmem:[%s6641_s2 + $0x3a0] sm:$0xff]  ;;  %v4085_v59 = vld [vmem:[%s6641_s2 + $0x3a8] sm:$0xff] }
0x19a5   :  { %v5630_v46 = vpop.eup %5629  ;;  %5383 = vmatprep.subr.bf16.mxu1 %v6382_v45 }
0x19a6   :  { %v3628_v60 = vmul.f32 %v5630_v46, %v5622_v30  ;;  %v5409_v46 = vpack.c.bf16 %v4084_v58, %v4083_v36 }
0x19a8   :  { %5061 = vmatmul.mubr.msk.f32.vlgmr.msra.gmra.mrb[40].mxu1 %vm1236_vm2, %v3628_v60  ;;  %v4086_v60 = vld [vmem:[%s6641_s2 + $0x3b0] sm:$0xff] }
0x19a9   :  { %5385 = vmatpush3.bf16.msra.mxu1 %v6382_v45 }
0x19aa   :  { %5387 = vmatprep.subr.bf16.mxu1 %v6407_v43 }
0x19d0   :  { %v3897_v2 = vpop.xlane.xlu1 %3896 }
0x19d1   :  { %v3904_v6 = vmul.f32 0.03125, %v3897_v2 }
0x19d3   :  { %v3907_v5 = vsub.f32 %v6438_v42, %v3904_v6 }
0x19d5   :  { %v3910_v16 = vmul.f32 %v3907_v5, %v3907_v5 }
0x19d7   :  { %v3913_v18 = vsel %vm311_vm4, %v3910_v16, 0.0 }
0x1a76   :  { %v5048_v61 = vpop.f32.mrb[38].mxu1 }
0x1a77   :  { %v3505_v63 = vpop.f32.mrb[39].mxu1 }
0x1a7b   :  { %v5062_v0 = vpop.f32.mrb[40].mxu1 }
0x1a7c   :  { %v3708_v1 = vpop.f32.mrb[41].mxu1 }
0x1a7d   :  { %5067 = vmatprep.mubr.msk.f32.mxu1 %vm124_vm1, %v3708_v1 }
0x1a7e   :  { %5068 = vmatmul.mubr.msk.f32.vlgmr.msra.gmra.mrb[42].mxu1 %vm124_vm1, %v5062_v0  ;;  %v4088_v0 = vld [vmem:[%s6641_s2 + $0x3c0] sm:$0xff] }
0x1a7f   :  { %5074 = vmatprep.mubr.msk.f32.mxu1 %vm124_vm1, %v3505_v63  ;;  %5389 = vmatpush3.bf16.msra.mxu1 %v6407_v43  ;;  %v4087_v63 = vld [vmem:[%s6641_s2 + $0x3b8] sm:$0xff] }
0x1a80   :  { %5396 = vmatprep.subr.bf16.mxu1 %v5673_v3  ;;  %v5415_v1 = vpack.c.bf16 %v4088_v0, %v4087_v63 }
0x1a86   :  { %5075 = vmatmul.mubr.msk.f32.vlgmr.msra.gmra.mrb[42].mxu1 %vm124_vm1, %v5048_v61  ;;  %v5412_v61 = vpack.c.bf16 %v4086_v60, %v4085_v59  ;;  %v4536_v60 = vld [vmem:[%s6641_s2 + $0x3d8] ss:$0 sm:$0xff] }
0x1a87   :  { %5126 = vmatprep.mubr.msk.f32.mxu1 %vm5674_vm0, %v5675_v8  ;;  %5398 = vmatpush3.bf16.msra.mxu1 %v5397_v34 }
0x1a88   :  { %5399 = vmatprep.subr.bf16.mxu1 %v5673_v3 }
0x1a8b   :  { %5401 = vmatpush3.bf16.msra.mxu1 %v5400_v12 }
0x1a8c   :  { %5402 = vmatprep.subr.bf16.mxu1 %v5673_v3 }
0x1a8f   :  { %5404 = vmatpush3.bf16.msra.mxu1 %v5403_v55 }
0x1a90   :  { %5405 = vmatprep.subr.bf16.mxu1 %v5673_v3 }
0x1a93   :  { %5407 = vmatpush3.bf16.msra.mxu1 %v5406_v56 }
0x1a94   :  { %5408 = vmatprep.subr.bf16.mxu1 %v5673_v3 }
0x1a97   :  { %5410 = vmatpush3.bf16.msra.mxu1 %v5409_v46 }
0x1a98   :  { %5411 = vmatprep.subr.bf16.mxu1 %v5673_v3 }
0x1a9b   :  { %5413 = vmatpush3.bf16.msra.mxu1 %v5412_v61 }
0x1a9c   :  { %5414 = vmatprep.subr.bf16.mxu1 %v5673_v3 }
0x1a9f   :  { %5416 = vmatpush3.bf16.msra.mxu1 %v5415_v1 }
0x1aa0   :  { %5417 = vmatprep.subr.bf16.mxu1 %v5673_v3 }
0x1b59   :  { %v5076_v62 = vpop.f32.mrb[42].mxu1 }
0x1b5a   :  { %3880 = vst.msk [vmem:[#allocation2 + $0x12] sm:$0x3] %vm1715_vm7, %v5076_v62  ;;  %v3870_v45 = vpop.f32.mrb[43].mxu1  ;;  %v4089_v62 = vld [vmem:[%s6641_s2 + $0x3c8] sm:$0xff] }
0x1b5b   :  { %3879 = vst.msk [vmem:[#allocation2 + $0xa] sm:$0xff] %vm311_vm4, %v3870_v45  ;;  %v4090_v45 = vld [vmem:[%s6641_s2 + $0x3d0] sm:$0xff] }
0x1b5c   :  { %v5418_v2 = vpack.c.bf16 %v4090_v45, %v4089_v62 }
0x1b5e   :  { %5419 = vmatpush3.bf16.msra.mxu1 %v5418_v2 }
0x1b62   :  { %v3883_v7 = vld [vmem:[#allocation2 + $0x10] sm:$0xf]  ;;  %v3882_v9 = vld [vmem:[#allocation2 + $0x8] sm:$0xff] }
0x1b63   :  { %v3886_v43 = vadd.f32 %v3883_v7, %v6281_v54  ;;  %v3885_v10 = vadd.f32 %v3882_v9, %v6276_v38  ;;  %v3950_v38 = vld [vmem:[%s6641_s2 + $0x330] sm:$0xff]  ;;  %v3951_v54 = vld [vmem:[%s6641_s2 + $0x338] sm:$0xff] }
0x1b64   :  { %v5391_v40 = vpack.c.bf16 %v3951_v54, %v3950_v38 }
0x1b65   :  { %v6471_v13 = vadd.f32 %v6434_v37, %v3886_v43  ;;  %v6474_v14 = vadd.f32 %v6434_v37, %v3885_v10 }
0x1b66   :  { %5392 = vmatpush3.bf16.msra.mxu0 %v5391_v40 }
0x1b67   :  { %v3901_v15 = vsel %vm596_vm9, %v6471_v13, 0.0  ;;  %v3898_v4 = vsel %vm311_vm4, %v6474_v14, 0.0  ;;  %5393 = vmatprep.subr.bf16.mxu0 %v5673_v3 }
0x1b68   :  { %3902 = vadd.xlane.f32.xlu1 %v3901_v15  ;;  %3899 = vadd.xlane.f32.xlu0 %v3898_v4 }
0x1b6a   :  { %5395 = vmatpush3.bf16.msra.mxu0 %v5394_v23 }
0x1b6b   :  { %5420 = vmatprep.subr.bf16.mxu0 %v5673_v3 }
0x1b6c   :  { %3914 = vadd.xlane.f32.xlu0 %v3913_v18 }
0x1bf5   :  { %v3903_v26 = vpop.xlane.xlu1 %3902  ;;  %v3900_v19 = vpop.xlane.xlu0 %3899 }
0x1bf6   :  { %v3906_v25 = vmul.f32 0.03125, %v3903_v26  ;;  %v3905_v27 = vmul.f32 0.03125, %v3900_v19 }
0x1bf8   :  { %v6496_v17 = vsub.f32 %v6471_v13, %v3906_v25  ;;  %v6499_v28 = vsub.f32 %v6474_v14, %v3905_v27 }
0x1bf9   :  { %v3915_v29 = vpop.xlane.xlu0 %3914 }
0x1bfa   :  { %v3922_v11 = vmul.f32 0.03125, %v3915_v29  ;;  %v3912_v30 = vmul.f32 %v6496_v17, %v6496_v17  ;;  %v3911_v31 = vmul.f32 %v6499_v28, %v6499_v28 }
0x1bfc   :  { %v3925_v32 = vadd.f32 1e-05, %v3922_v11  ;;  %v3919_v24 = vsel %vm596_vm9, %v3912_v30, 0.0  ;;  %v3916_v33 = vsel %vm311_vm4, %v3911_v31, 0.0 }
0x1bfd   :  { %3920 = vadd.xlane.f32.xlu0 %v3919_v24  ;;  %3917 = vadd.xlane.f32.xlu1 %v3916_v33 }
0x1bfe   :  { %5631 = vrsqrt.f32 %v3925_v32 }
0x1c08   :  { %v5632_v37 = vpop.eup %5631 }
0x1c09   :  { %v3931_v20 = vmul.f32 %v5632_v37, %v3907_v5 }
0x1c0b   :  { %v3939_v47 = vmul.f32 %v4530_v41, %v3931_v20 }
0x1c0d   :  { %v3947_v48 = vadd.f32 %v4531_v44, %v3939_v47 }
0x1c0f   :  { %5086 = vmatmul.mubr.msk.f32.vlgmr.msra.gmra.mrb[40].mxu0 %vm311_vm4, %v3947_v48 }
0x1c10   :  { %5088 = vmatprep.mubr.msk.f32.mxu0 %vm5674_vm0, %v5675_v8 }
0x1c8a   :  { %v3918_v6 = vpop.xlane.xlu1 %3917  ;;  %v3921_v7 = vpop.xlane.xlu0 %3920 }
0x1c8b   :  { %v3923_v9 = vmul.f32 0.03125, %v3918_v6  ;;  %v3924_v5 = vmul.f32 0.03125, %v3921_v7 }
0x1c8d   :  { %v3926_v43 = vadd.f32 1e-05, %v3923_v9  ;;  %v3927_v10 = vadd.f32 1e-05, %v3924_v5 }
0x1c8f   :  { %5633 = vrsqrt.f32 %v3926_v43 }
0x1c90   :  { %5635 = vrsqrt.f32 %v3927_v10 }
0x1c99   :  { %v5634_v15 = vpop.eup %5633 }
0x1c9a   :  { %v5636_v4 = vpop.eup %5635  ;;  %v3932_v16 = vmul.f32 %v5634_v15, %v6499_v28 }
0x1c9b   :  { %v3933_v18 = vmul.f32 %v5636_v4, %v6496_v17 }
0x1c9c   :  { %v3940_v38 = vmul.f32 %v4530_v41, %v3932_v16 }
0x1c9d   :  { %v3941_v40 = vmul.f32 %v4530_v41, %v3933_v18 }
0x1c9e   :  { %v3948_v54 = vadd.f32 %v4531_v44, %v3940_v38 }
0x1c9f   :  { %v3949_v21 = vadd.f32 %v4531_v44, %v3941_v40 }
0x1ca0   :  { %5089 = vmatmul.mubr.msk.f32.gmra.mrb[42].mxu0 %vm311_vm4, %v3948_v54 }
0x1ca1   :  { %5091 = vmatprep.mubr.msk.f32.mxu0 %vm5674_vm0, %v5675_v8 }
0x1ca4   :  { %5092 = vmatmul.mubr.msk.f32.gmra.mrb[44].mxu0 %vm311_vm4, %v3949_v21 }
0x1ca5   :  { %5143 = vmatprep.mubr.msk.f32.mxu0 %vm5674_vm0, %v5675_v8 }
0x1ce2   :  { %v4034_v23 = vpop.f32.mrb[40].mxu0 }
0x1ce3   :  { %v4035_v26 = vadd.f32 %v4532_v22, %v4034_v23  ;;  %v5087_v19 = vpop.f32.mrb[41].mxu0 }
0x1ce5   :  { %v4048_v25 = vmul.f32 %v4035_v26, %v4035_v26 }
0x1ce7   :  { %v4051_v27 = vmul.f32 %v4048_v25, %v4035_v26 }
0x1ce9   :  { %v4054_v17 = vmul.f32 0.044715, %v4051_v27 }
0x1ceb   :  { %v4057_v28 = vadd.f32 %v4054_v17, %v4035_v26 }
0x1ced   :  { %v4060_v29 = vmul.f32 0.7978846, %v4057_v28  ;;  %v4235_v28 = vld [vmem:[%s6641_s2 + $0x3f8] sm:$0xff] }
0x1cef   :  { %5637 = vtanh.f32 %v4060_v29 }
0x1cf9   :  { %v5638_v11 = vpop.eup %5637 }
0x1cfa   :  { %v4066_v30 = vadd.f32 1.0, %v5638_v11  ;;  %v4236_v11 = vld [vmem:[%s6641_s2 + $0x400] sm:$0xff] }
0x1cfc   :  { %v4069_v31 = vmul.f32 0.5, %v4066_v30  ;;  %v4237_v30 = vld [vmem:[%s6641_s2 + $0x408] sm:$0xff] }
0x1cfe   :  { %v4072_v32 = vmul.f32 %v4069_v31, %v4035_v26  ;;  %v5424_v31 = vpack.c.bf16 %v4237_v30, %v4236_v11 }
0x1d00   :  { %5127 = vmatmul.mubr.f32.vlgmr.msra.gmra.mrb[44].mxu1 %v4072_v32 }
0x1d01   :  { %5129 = vmatprep.mubr.msk.f32.mxu1 %vm5674_vm0, %v5675_v8 }
0x1d73   :  { %v4039_v24 = vpop.f32.mrb[42].mxu0 }
0x1d74   :  { %v4040_v33 = vadd.f32 %v4532_v22, %v4039_v24  ;;  %v5090_v37 = vpop.f32.mrb[43].mxu0 }
0x1d76   :  { %v4049_v41 = vmul.f32 %v4040_v33, %v4040_v33 }
0x1d77   :  { %v4044_v20 = vpop.f32.mrb[44].mxu0 }
0x1d78   :  { %v4052_v44 = vmul.f32 %v4049_v41, %v4040_v33  ;;  %v4045_v47 = vadd.f32 %v4532_v22, %v4044_v20  ;;  %v5093_v48 = vpop.f32.mrb[45].mxu0 }
0x1d7a   :  { %v4055_v49 = vmul.f32 0.044715, %v4052_v44  ;;  %v4050_v57 = vmul.f32 %v4045_v47, %v4045_v47 }
0x1d7c   :  { %v4058_v34 = vadd.f32 %v4055_v49, %v4040_v33  ;;  %v4053_v50 = vmul.f32 %v4050_v57, %v4045_v47 }
0x1d7e   :  { %v4061_v51 = vmul.f32 0.7978846, %v4058_v34  ;;  %v4056_v12 = vmul.f32 0.044715, %v4053_v50  ;;  %v4537_v34 = vld [vmem:[%s6641_s2 + $0x3e0] ss:$0 sm:$0xff] }
0x1d80   :  { %v4059_v52 = vadd.f32 %v4056_v12, %v4045_v47  ;;  %5639 = vtanh.f32 %v4061_v51  ;;  %v4538_v12 = vld [vmem:[%s6641_s2 + $0x3e8] ss:$0 sm:$0xff] }
0x1d82   :  { %v4062_v35 = vmul.f32 0.7978846, %v4059_v52 }
0x1d84   :  { %5641 = vtanh.f32 %v4062_v35 }
0x1d8a   :  { %v5640_v55 = vpop.eup %5639 }
0x1d8b   :  { %v4067_v53 = vadd.f32 1.0, %v5640_v55 }
0x1d8d   :  { %v4070_v39 = vmul.f32 0.5, %v4067_v53 }
0x1d8e   :  { %v5642_v56 = vpop.eup %5641 }
0x1d8f   :  { %v4073_v36 = vmul.f32 %v4070_v39, %v4040_v33  ;;  %v4068_v58 = vadd.f32 1.0, %v5642_v56 }
0x1d91   :  { %5130 = vmatmul.mubr.f32.gmra.mrb[46].mxu1 %v4073_v36  ;;  %v4071_v59 = vmul.f32 0.5, %v4068_v58 }
0x1d92   :  { %5132 = vmatprep.mubr.msk.f32.mxu1 %vm5674_vm0, %v5675_v8 }
0x1d93   :  { %v4074_v46 = vmul.f32 %v4071_v59, %v4045_v47 }
0x1d95   :  { %5133 = vmatmul.mubr.f32.gmra.mrb[48].mxu1 %v4074_v46 }
0x1dd3   :  { %v4162_v61 = vpop.f32.mrb[44].mxu1 }
0x1dd4   :  { %v4163_v63 = vadd.f32 %v4536_v60, %v4162_v61  ;;  %v5128_v0 = vpop.f32.mrb[45].mxu1  ;;  %v4539_v61 = vld [vmem:[%s6641_s2 + $0x410] ss:$0 sm:$0xff] }
0x1dd6   :  { %v4176_v1 = vadd.f32 %v4163_v63, %v6438_v42 }
0x1dd8   :  { %v4179_v62 = vsel %vm311_vm4, %v4176_v1, 0.0 }
0x1dd9   :  { %4180 = vadd.xlane.f32.xlu1 %v4179_v62 }
0x1e64   :  { %v4167_v45 = vpop.f32.mrb[46].mxu1 }
0x1e65   :  { %v4168_v2 = vadd.f32 %v4536_v60, %v4167_v45  ;;  %v5131_v6 = vpop.f32.mrb[47].mxu1 }
0x1e66   :  { %v4181_v7 = vpop.xlane.xlu1 %4180 }
0x1e67   :  { %v4188_v9 = vmul.f32 0.03125, %v4181_v7  ;;  %v4177_v5 = vadd.f32 %v4168_v2, %v6474_v14 }
0x1e68   :  { %v4172_v43 = vpop.f32.mrb[48].mxu1 }
0x1e69   :  { %v4191_v10 = vsub.f32 %v4176_v1, %v4188_v9  ;;  %v4173_v15 = vadd.f32 %v4536_v60, %v4172_v43  ;;  %v5134_v4 = vpop.f32.mrb[49].mxu1  ;;  %v4182_v16 = vsel %vm311_vm4, %v4177_v5, 0.0 }
0x1e6a   :  { %4183 = vadd.xlane.f32.xlu0 %v4182_v16 }
0x1e6b   :  { %v4194_v18 = vmul.f32 %v4191_v10, %v4191_v10  ;;  %v4178_v42 = vadd.f32 %v4173_v15, %v6471_v13  ;;  %v4234_v13 = vld [vmem:[%s6641_s2 + $0x3f0] sm:$0xff] }
0x1e6c   :  { %v5421_v29 = vpack.c.bf16 %v4235_v28, %v4234_v13 }
0x1e6d   :  { %v4197_v38 = vsel %vm311_vm4, %v4194_v18, 0.0  ;;  %v4185_v54 = vsel %vm596_vm9, %v4178_v42, 0.0 }
0x1e6e   :  { %4198 = vadd.xlane.f32.xlu0 %v4197_v38  ;;  %4186 = vadd.xlane.f32.xlu1 %v4185_v54 }
0x1e6f   :  { %5422 = vmatpush3.bf16.msra.mxu0 %v5421_v29 }
0x1e70   :  { %5423 = vmatprep.subr.bf16.mxu0 %v5673_v3 }
0x1e73   :  { %5425 = vmatpush3.bf16.msra.mxu0 %v5424_v31 }
0x1e74   :  { %5426 = vmatprep.subr.bf16.mxu0 %v5673_v3 }
0x1ef7   :  { %v4184_v40 = vpop.xlane.xlu0 %4183 }
0x1ef8   :  { %v4189_v21 = vmul.f32 0.03125, %v4184_v40 }
0x1efa   :  { %v4192_v22 = vsub.f32 %v4177_v5, %v4189_v21 }
0x1efb   :  { %v4187_v14 = vpop.xlane.xlu1 %4186  ;;  %v4199_v32 = vpop.xlane.xlu0 %4198 }
0x1efc   :  { %v4190_v23 = vmul.f32 0.03125, %v4187_v14  ;;  %v4195_v26 = vmul.f32 %v4192_v22, %v4192_v22  ;;  %v4206_v24 = vmul.f32 0.03125, %v4199_v32 }
0x1efe   :  { %v4193_v19 = vsub.f32 %v4178_v42, %v4190_v23  ;;  %v4200_v25 = vsel %vm311_vm4, %v4195_v26, 0.0  ;;  %v4209_v33 = vadd.f32 1e-05, %v4206_v24 }
0x1eff   :  { %4201 = vadd.xlane.f32.xlu1 %v4200_v25 }
0x1f00   :  { %v4196_v27 = vmul.f32 %v4193_v19, %v4193_v19  ;;  %5643 = vrsqrt.f32 %v4209_v33 }
0x1f02   :  { %v4203_v17 = vsel %vm596_vm9, %v4196_v27, 0.0 }
0x1f03   :  { %4204 = vadd.xlane.f32.xlu0 %v4203_v17 }
0x1f0a   :  { %v5644_v48 = vpop.eup %5643 }
0x1f0b   :  { %v4215_v57 = vmul.f32 %v5644_v48, %v4191_v10 }
0x1f0d   :  { %v4223_v50 = vmul.f32 %v4537_v34, %v4215_v57 }
0x1f0f   :  { %v4231_v55 = vadd.f32 %v4538_v12, %v4223_v50 }
0x1f11   :  { %v4245_v56 = vrot.slane %v4231_v55, 6 }
0x1f8c   :  { %v4202_v37 = vpop.xlane.xlu1 %4201 }
0x1f8d   :  { %v4207_v41 = vmul.f32 0.03125, %v4202_v37 }
0x1f8f   :  { %v4210_v20 = vadd.f32 1e-05, %v4207_v41 }
0x1f90   :  { %v4205_v44 = vpop.xlane.xlu0 %4204 }
0x1f91   :  { %5645 = vrsqrt.f32 %v4210_v20  ;;  %v4208_v47 = vmul.f32 0.03125, %v4205_v44 }
0x1f93   :  { %v4211_v49 = vadd.f32 1e-05, %v4208_v47 }
0x1f95   :  { %5647 = vrsqrt.f32 %v4211_v49 }
0x1f9b   :  { %v5646_v51 = vpop.eup %5645 }
0x1f9c   :  { %v4216_v52 = vmul.f32 %v5646_v51, %v4192_v22 }
0x1f9e   :  { %v4224_v35 = vmul.f32 %v4537_v34, %v4216_v52 }
0x1f9f   :  { %v5648_v53 = vpop.eup %5647 }
0x1fa0   :  { %v4232_v39 = vadd.f32 %v4538_v12, %v4224_v35  ;;  %v4217_v58 = vmul.f32 %v5648_v53, %v4193_v19 }
0x1fa2   :  { %v4246_v36 = vrot.slane %v4232_v39, 6  ;;  %v4225_v46 = vmul.f32 %v4537_v34, %v4217_v58 }
0x1fa4   :  { %v4247_v59 = vsel %vm1271_vm3, %v4245_v56, %v4246_v36  ;;  %v4233_v60 = vadd.f32 %v4538_v12, %v4225_v46 }
0x1fa5   :  { %5144 = vmatmul.mubr.msk.f32.vlgmr.msra.gmra.mrb[46].mxu0 %vm311_vm4, %v4247_v59 }
0x1fa6   :  { %5428 = vmatpush3.bf16.msra.mxu0 %v5421_v29  ;;  %5154 = vmatprep.mubr.msk.f32.mxu0 %vm5674_vm0, %v5675_v8 }
0x1fa7   :  { %5429 = vmatprep.subr.bf16.mxu0 %v5673_v3 }
0x1faa   :  { %5431 = vmatpush3.bf16.msra.mxu0 %v5424_v31 }
0x1fad   :  { %5155 = vmatmul.mubr.msk.f32.vlgmr.msra.gmra.mrb[48].mxu0 %vm311_vm4, %v4233_v60 }
0x2078   :  { %v4316_v63 = vpop.f32.mrb[46].mxu0 }
0x2079   :  { %v4317_v0 = vadd.f32 %v4539_v61, %v4316_v63  ;;  %v5145_v1 = vpop.f32.mrb[47].mxu0 }
0x207b   :  { %4320 = vst [vmem:[#allocation3] sm:$0xf] %v4317_v0 }
0x2080   :  { %v4399_v62 = vpop.f32.mrb[48].mxu0 }
0x2081   :  { %v4400_v45 = vadd.f32 %v4539_v61, %v4399_v62  ;;  %v5156_v8 = vpop.f32.mrb[49].mxu0 }
0x2083   :  { %4403 = vst [vmem:[#allocation3 + $0x4] sm:$0xf] %v4400_v45 }
0x2084   :  { %5660 = shalt.err (!%p5657_p4)
}
0x2085   :  { %s5661_s15 = scalar_lea.hbm %s6642_s3, 128 }
0x2086   :  { %p5662_p5 = scmp.ne.s32.totalorder %s6642_s3, %s5661_s15  ;;  %p5665_p6 = scmp.lt.u32.totalorder %s5661_s15, %s6642_s3 }
0x2088   :  { %p5667_p7 = pnand %p5665_p6, %p5662_p5 }
0x208a   :  { %5670 = shalt.err (!%p5667_p7)
}
0x208b   :  { %4413 = dma.vmem_to_hbm [thread:$0]  %s4411_s12, 128, %s6642_s3, [#allocation4]  }
0x208c   :  { %5671 = dma.done.wait [#allocation4], 128  }
0x208d   :  { %5672 = vsyncadd [#allocation4], 4294967168 }
0x208e   :  { %4417 = vsyncpa [#allocation4], 1 }

</bundles_post_ra>
